<compile_context>
chip_gen: v6e
topology: v6e:2x2x1
jax: 0.10.0
libtpu: 0.0.40
codegen_flags: <defaults>
</compile_context>

<pallas_src>
import functools
import numpy as np
import jax
import jax.numpy as jnp
from jax import lax
from jax.experimental import pallas as pl
from jax.experimental.pallas import tpu as pltpu

EPS = 1e-5              # BatchNorm2d eps (PyTorch default, eval mode)
LOGSCALE_FACTOR = 3.0   # Glow Conv2dZeros logscale factor
TEMPORAL_K = 9          # temporal kernel size from STGCN.__init__


# --------------------------------------------------------------------------
# BlockSpec helpers: grid is (N,) - one batch element per grid step; all
# parameters use a constant index map (same block every step).
# --------------------------------------------------------------------------
def _data_spec(shape):
    nd = len(shape)
    return pl.BlockSpec((1,) + tuple(shape[1:]),
                        lambda n, _nd=nd: (n,) + (0,) * (_nd - 1))


def _param_spec(shape):
    nd = len(shape)
    return pl.BlockSpec(tuple(shape), lambda n, _nd=nd: (0,) * _nd)


# --------------------------------------------------------------------------
# Fused forward kernel: layer1 (GCN + TCN + res + cond), layer2 (GCN + TCN + id res),
# then Conv2dZeros head.  One batch element per grid step.
# --------------------------------------------------------------------------
def _stgcn_fused_kernel(x_ref, cond_ref,
                        at1_ref, wg1_ref, bg1_ref, wt1_ref, bt1_ref, wr1_ref, br1_ref,
                        at2_ref, wg2_ref, bg2_ref, wt2_ref, bt2_ref,
                        wf_ref, bf_ref,
                        o_ref, *, K, KT, T, V):
    H = wg1_ref.shape[2]
    Cin = x_ref.shape[3]

    def gcn(x2_bf16, at_ref, wg_ref, bg_ref):
        # x2_bf16: (T*V, Cin) bf16.  Graph conv: 1x1 channel mix, then contraction over V
        # per time step (einsum('nkctv,kvw->nctw') in the reference), BN1 folded into wg/bg.
        Cout = wg_ref.shape[2]
        acc = jnp.zeros((T, V, Cout), jnp.float32)
        for k in range(K):
            hk = jnp.dot(x2_bf16, wg_ref[k], preferred_element_type=jnp.float32)  # (T*V, Cout)
            hk3 = hk.reshape(T, V, Cout).astype(jnp.bfloat16)
            atb = jnp.broadcast_to(at_ref[k], (T, V, V))                          # A_k^T per t
            # batched matmul over t: out[t, w, c] = sum_v A_k[v, w] * hk3[t, v, c]
            acc = acc + lax.dot_general(
                atb, hk3,
                dimension_numbers=(((2,), (1,)), ((0,), (0,))),
                preferred_element_type=jnp.float32)
        h = acc + bg_ref[...].astype(jnp.float32)[None, :, :]   # folded conv-bias + BN1
        return jnp.maximum(h, 0.0)                               # ReLU (head of tcn Sequential)

    def tconv(h3, wt_ref, bt_ref):
        # 9x1 temporal conv ("same" padding along T), BN2 folded into wt/bt, via im2col.
        C = h3.shape[2]
        pad = (KT - 1) // 2
        zp = jnp.zeros((pad, V, C), jnp.float32)
        hp = jnp.concatenate([zp, h3, zp], axis=0)                       # (T+KT-1, V, C)
        cols = jnp.concatenate([hp[dt:dt + T] for dt in range(KT)], axis=-1)   # (T, V, KT*C)
        im = cols.reshape(T * V, KT * C).astype(jnp.bfloat16)
        return (jnp.dot(im, wt_ref[...], preferred_element_type=jnp.float32)
                + bt_ref[...].astype(jnp.float32))                       # (T*V, C)

    x2 = x_ref[0].astype(jnp.bfloat16).reshape(T * V, Cin)
    cond2 = cond_ref[0].astype(jnp.float32).reshape(T * V, H)

    # ---- st_gcn layer 1 (in_dim != out_dim -> conv+BN residual; cond_res=True) ----
    res1 = (jnp.dot(x2, wr1_ref[...], preferred_element_type=jnp.float32)
            + br1_ref[...].astype(jnp.float32))                          # 1x1 conv + folded BN
    h1 = gcn(x2, at1_ref, wg1_ref, bg1_ref)                              # (T, V, H)
    y1 = tconv(h1, wt1_ref, bt1_ref)                                     # (T*V, H)
    # TODO(synk): st_gcn source not provided; cond_res=True interpreted as adding the
    # conditioning tensor as an extra residual term (cond channels == hidden_dim).
    y1 = jnp.maximum(y1 + res1 + cond2, 0.0)

    # ---- st_gcn layer 2 (identity residual, no cond) ----
    h2 = gcn(y1.astype(jnp.bfloat16), at2_ref, wg2_ref, bg2_ref)
    y2 = tconv(h2, wt2_ref, bt2_ref)
    y2 = jnp.maximum(y2 + y1, 0.0)                                       # (T*V, H)

    # ---- fcn = Conv2dZeros: 3x3 "same" conv over (T, V), output scaled by exp(logs*3)
    #      (scale folded into wf/bf in the wrapper) ----
    x3 = y2.reshape(T, V, H)
    zt = jnp.zeros((1, V, H), jnp.float32)
    zv = jnp.zeros((T + 2, 1, H), jnp.float32)
    xp = jnp.concatenate([zt, x3, zt], axis=0)                           # pad time
    xp = jnp.concatenate([zv, xp, zv], axis=1)                           # pad joints
    cols = [xp[dt:dt + T, dv:dv + V, :] for dt in range(3) for dv in range(3)]
    im = jnp.concatenate(cols, axis=-1).reshape(T * V, 9 * H).astype(jnp.bfloat16)
    out = (jnp.dot(im, wf_ref[...], preferred_element_type=jnp.float32)
           + bf_ref[...].astype(jnp.float32))                            # (T*V, Dout)
    o_ref[0] = out.astype(o_ref.dtype)


def stgcn_fused_call(x_ntvc, cond_ntvh, fp):
    N, T, V, _ = x_ntvc.shape
    K = fp['l1']['at'].shape[0]
    Dout = fp['fcn']['wf'].shape[1]
    args = (x_ntvc, cond_ntvh,
            fp['l1']['at'], fp['l1']['wg'], fp['l1']['bg'], fp['l1']['wt'], fp['l1']['bt'],
            fp['l1']['wr'], fp['l1']['br'],
            fp['l2']['at'], fp['l2']['wg'], fp['l2']['bg'], fp['l2']['wt'], fp['l2']['bt'],
            fp['fcn']['wf'], fp['fcn']['bf'])
    in_specs = ([_data_spec(x_ntvc.shape), _data_spec(cond_ntvh.shape)]
                + [_param_spec(a.shape) for a in args[2:]])
    out_shape = jax.ShapeDtypeStruct((N, T * V, Dout), jnp.float32)
    return pl.pallas_call(
        functools.partial(_stgcn_fused_kernel, K=K, KT=TEMPORAL_K, T=T, V=V),
        out_shape=out_shape,
        grid=(N,),
        in_specs=in_specs,
        out_specs=_data_spec(out_shape.shape),
        compiler_params=pltpu.CompilerParams(dimension_semantics=("parallel",)),
    )(*args)


# --------------------------------------------------------------------------
# Wrapper-side parameter folding (eval-mode BN -> conv, A^T, im2col weight flattening,
# Conv2dZeros logscale).  All tiny XLA ops, done once inside the jitted forward.
# --------------------------------------------------------------------------
def _fold_bn(bn):
    s = bn['gamma'] * lax.rsqrt(bn['var'] + EPS)        # (1, C)
    t = bn['beta'] - bn['mean'] * s
    return s, t


def _fold_layer(p, A, first):
    A_w = A * p['importance']                           # edge-importance weighting, (K, V, V)
    at = jnp.transpose(A_w, (0, 2, 1))                  # at[k] = A_w[k]^T
    s1, t1 = _fold_bn(p['bn1'])
    wg = (p['wg'] * s1[None]).astype(jnp.bfloat16)      # (K, Cin, Cout), BN1 scale folded
    rowsum = A_w.sum(axis=1)                            # (K, V): sum_v A_w[k, v, w]
    bg = jnp.einsum('kw,kc->wc', rowsum, p['bg']) * s1 + t1   # folded conv bias + BN1, (V, Cout)
    s2, t2 = _fold_bn(p['bn2'])
    KT, C, C2 = p['wt'].shape
    wt = (p['wt'] * s2[None]).reshape(KT * C, C2).astype(jnp.bfloat16)  # im2col layout (KT*C, C)
    bt = p['bt'] * s2 + t2                              # (1, Cout)
    out = dict(at=at.astype(jnp.bfloat16), wg=wg, bg=bg, wt=wt, bt=bt)
    if first:
        sr, tr = _fold_bn(p['bn_r'])
        out['wr'] = (p['wr'] * sr).astype(jnp.bfloat16)
        out['br'] = p['br'] * sr + tr
    return out


def fold_params(params):
    A = params['A']
    l1 = _fold_layer(params['layers'][0], A, first=True)
    l2 = _fold_layer(params['layers'][1], A, first=False)
    f = params['fcn']
    scale = jnp.exp(f['logs'] * LOGSCALE_FACTOR)        # (1, Dout)
    # fcn weight flat layout: wf[(dt*3 + dv)*Cin + ci, co]  (H axis = time, W axis = joint).
    # For a real PyTorch checkpoint (Cout, Cin, kh, kw): wf[(kh*3+kw)*Cin+ci, co] = w[co, ci, kh, kw].
    wf = (f['w'].reshape(-1, f['w'].shape[-1]) * scale).astype(jnp.bfloat16)   # (9*H, Dout)
    bf = f['b'] * scale                                 # (1, Dout)
    return dict(l1=l1, l2=l2, fcn=dict(wf=wf, bf=bf))


@jax.jit
def stgcn_forward(params, x_ncvt, cond_ncTv):
    # x:    (N, input_dim, V, T)   - same layout as the PyTorch forward input
    # cond: (N, hidden_dim, T, V)  - conditioning, already in the permuted NCHW layout
    fp = fold_params(params)
    x = jnp.transpose(x_ncvt, (0, 3, 2, 1))             # -> (N, T, V, C)
    cond = jnp.transpose(cond_ncTv, (0, 2, 3, 1))       # -> (N, T, V, H)
    N, T, V, _ = x.shape
    y = stgcn_fused_call(x, cond, fp)                   # (N, T*V, Dout)
    Dout = y.shape[-1]
    return jnp.transpose(y.reshape(N, T, V, Dout), (0, 3, 2, 1))   # (N, output_dim, V, T)


# --------------------------------------------------------------------------
# Deterministic parameter construction (PyTorch-shaped, unfolded)
# --------------------------------------------------------------------------
def make_graph_A(V):
    # TODO(synk): Graph(layout='locomotion') source not provided; deterministic chain skeleton
    # with K=2 distance partitions (self-links, 1-hop neighbours), column-normalized like ST-GCN.
    adj = np.zeros((V, V), np.float32)
    for i in range(V - 1):
        adj[i, i + 1] = 1.0
        adj[i + 1, i] = 1.0

    def normalize(a):
        d = a.sum(0)
        dinv = np.where(d > 0, 1.0 / d, 0.0).astype(np.float32)
        return (a @ np.diag(dinv)).astype(np.float32)

    A = np.stack([normalize(np.eye(V, dtype=np.float32)), normalize(adj)], axis=0)
    return jnp.asarray(A, jnp.float32)


def init_stgcn_params(key, input_dim, hidden_dim, output_dim, V):
    A = make_graph_A(V)
    K = A.shape[0]
    kit = iter(jax.random.split(key, 64))

    def rnd(shape, scale=0.1):
        return scale * jax.random.normal(next(kit), shape, jnp.float32)

    def bn(c):
        return dict(gamma=1.0 + rnd((1, c), 0.05),
                    beta=rnd((1, c), 0.05),
                    mean=rnd((1, c), 0.05),
                    var=1.0 + 0.1 * jnp.abs(jax.random.normal(next(kit), (1, c), jnp.float32)))

    def st_gcn_params(cin, cout, first):
        p = dict(wg=rnd((K, cin, cout)), bg=rnd((K, cout)), bn1=bn(cout),
                 wt=rnd((TEMPORAL_K, cout, cout)), bt=rnd((1, cout)), bn2=bn(cout),
                 importance=jnp.ones((K, V, V), jnp.float32))
        if first:  # in_channels != out_channels -> conv+BN residual path
            p.update(wr=rnd((cin, cout)), br=rnd((1, cout)), bn_r=bn(cout))
        return p

    layers = [st_gcn_params(input_dim, hidden_dim, True),
              st_gcn_params(hidden_dim, hidden_dim, False)]
    # NOTE: PyTorch's Conv2dZeros zero-initializes weight/bias/logs (output would be all zeros);
    # small deterministic random values are used so the synthetic test exercises real compute.
    fcn = dict(w=rnd((9, hidden_dim, output_dim)),      # (3*3, Cin, Cout), tap index = dt*3 + dv
               b=rnd((1, output_dim)),
               logs=rnd((1, output_dim), 0.05))
    return dict(A=A, layers=layers, fcn=fcn)


if __name__ == "__main__":
    N, input_dim, hidden_dim, output_dim = 2, 6, 32, 6
    V, T = 8, 16
    key = jax.random.PRNGKey(0)
    kx, kc, kp = jax.random.split(key, 3)

    params = init_stgcn_params(kp, input_dim, hidden_dim, output_dim, V)
    x = jax.random.normal(kx, (N, input_dim, V, T), jnp.float32)        # (N, C, V, T)
    cond = jax.random.normal(kc, (N, hidden_dim, T, V), jnp.float32)    # (N, H, T, V)

    y = stgcn_forward(params, x, cond)
    y = jax.block_until_ready(y)
    assert y.shape == (N, output_dim, V, T), y.shape
    assert bool(jnp.all(jnp.isfinite(y)))
    print("KERNEL_OK")
</pallas_src>

<mosaic_0001>
module attributes {stable_mosaic.version = 11 : i64} {
  func.func @_stgcn_fused_kernel(%arg0: i32, %arg1: memref<1x16x8x6xf32, #tpu.memory_space<vmem>>, %arg2: memref<1x16x8x32xf32, #tpu.memory_space<vmem>>, %arg3: memref<2x8x8xbf16, #tpu.memory_space<vmem>>, %arg4: memref<2x6x32xbf16, #tpu.memory_space<vmem>>, %arg5: memref<8x32xf32, #tpu.memory_space<vmem>>, %arg6: memref<288x32xbf16, #tpu.memory_space<vmem>>, %arg7: memref<1x32xf32, #tpu.memory_space<vmem>>, %arg8: memref<6x32xbf16, #tpu.memory_space<vmem>>, %arg9: memref<1x32xf32, #tpu.memory_space<vmem>>, %arg10: memref<2x8x8xbf16, #tpu.memory_space<vmem>>, %arg11: memref<2x32x32xbf16, #tpu.memory_space<vmem>>, %arg12: memref<8x32xf32, #tpu.memory_space<vmem>>, %arg13: memref<288x32xbf16, #tpu.memory_space<vmem>>, %arg14: memref<1x32xf32, #tpu.memory_space<vmem>>, %arg15: memref<288x6xbf16, #tpu.memory_space<vmem>>, %arg16: memref<1x6xf32, #tpu.memory_space<vmem>>, %arg17: memref<1x128x6xf32, #tpu.memory_space<vmem>>) attributes {dimension_semantics = [#tpu.dimension_semantics<parallel>], iteration_bounds = array<i64: 2>, scalar_prefetch = 0 : i64, scratch_operands = 0 : i64, tpu.core_type = #tpu.core_type<tc>, window_params = [{transform_indices = @transform_0, window_bounds = array<i64: 1, 16, 8, 6>}, {transform_indices = @transform_1, window_bounds = array<i64: 1, 16, 8, 32>}, {pipeline_mode = #tpu.pipeline_mode<synchronous>, transform_indices = @transform_2, window_bounds = array<i64: 2, 8, 8>}, {pipeline_mode = #tpu.pipeline_mode<synchronous>, transform_indices = @transform_3, window_bounds = array<i64: 2, 6, 32>}, {pipeline_mode = #tpu.pipeline_mode<synchronous>, transform_indices = @transform_4, window_bounds = array<i64: 8, 32>}, {pipeline_mode = #tpu.pipeline_mode<synchronous>, transform_indices = @transform_5, window_bounds = array<i64: 288, 32>}, {pipeline_mode = #tpu.pipeline_mode<synchronous>, transform_indices = @transform_6, window_bounds = array<i64: 1, 32>}, {pipeline_mode = #tpu.pipeline_mode<synchronous>, transform_indices = @transform_7, window_bounds = array<i64: 6, 32>}, {pipeline_mode = #tpu.pipeline_mode<synchronous>, transform_indices = @transform_8, window_bounds = array<i64: 1, 32>}, {pipeline_mode = #tpu.pipeline_mode<synchronous>, transform_indices = @transform_9, window_bounds = array<i64: 2, 8, 8>}, {pipeline_mode = #tpu.pipeline_mode<synchronous>, transform_indices = @transform_10, window_bounds = array<i64: 2, 32, 32>}, {pipeline_mode = #tpu.pipeline_mode<synchronous>, transform_indices = @transform_11, window_bounds = array<i64: 8, 32>}, {pipeline_mode = #tpu.pipeline_mode<synchronous>, transform_indices = @transform_12, window_bounds = array<i64: 288, 32>}, {pipeline_mode = #tpu.pipeline_mode<synchronous>, transform_indices = @transform_13, window_bounds = array<i64: 1, 32>}, {pipeline_mode = #tpu.pipeline_mode<synchronous>, transform_indices = @transform_14, window_bounds = array<i64: 288, 6>}, {pipeline_mode = #tpu.pipeline_mode<synchronous>, transform_indices = @transform_15, window_bounds = array<i64: 1, 6>}, {transform_indices = @transform_16, window_bounds = array<i64: 1, 128, 6>}]} {
    %c0 = arith.constant 0 : index
    %c0_0 = arith.constant 0 : index
    %c0_1 = arith.constant 0 : index
    %c0_2 = arith.constant 0 : index
    %0 = vector.load %arg1[%c0, %c0_0, %c0_1, %c0_2] : memref<1x16x8x6xf32, #tpu.memory_space<vmem>>, vector<1x16x8x6xf32>
    %1 = vector.shape_cast %0 : vector<1x16x8x6xf32> to vector<16x8x6xf32>
    %2 = arith.truncf %1 : vector<16x8x6xf32> to vector<16x8x6xbf16>
    %3 = vector.shape_cast %2 : vector<16x8x6xbf16> to vector<128x6xbf16>
    %c0_3 = arith.constant 0 : index
    %c0_4 = arith.constant 0 : index
    %c0_5 = arith.constant 0 : index
    %c0_6 = arith.constant 0 : index
    %4 = vector.load %arg2[%c0_3, %c0_4, %c0_5, %c0_6] : memref<1x16x8x32xf32, #tpu.memory_space<vmem>>, vector<1x16x8x32xf32>
    %5 = vector.shape_cast %4 : vector<1x16x8x32xf32> to vector<16x8x32xf32>
    %6 = vector.shape_cast %5 : vector<16x8x32xf32> to vector<128x32xf32>
    %c0_7 = arith.constant 0 : index
    %c0_8 = arith.constant 0 : index
    %7 = vector.load %arg8[%c0_7, %c0_8] : memref<6x32xbf16, #tpu.memory_space<vmem>>, vector<6x32xbf16>
    %cst = arith.constant dense<0.000000e+00> : vector<128x32xf32>
    %8 = tpu.matmul %3, %7, %cst {dimension_numbers = #tpu.dot_dimension_numbers<[1], [0], [0], [1], [0, 0, 1, 1], [], []>} : vector<128x6xbf16>, vector<6x32xbf16>, vector<128x32xf32> -> vector<128x32xf32>
    %c0_9 = arith.constant 0 : index
    %c0_10 = arith.constant 0 : index
    %9 = vector.load %arg9[%c0_9, %c0_10] : memref<1x32xf32, #tpu.memory_space<vmem>>, vector<1x32xf32>
    %10 = vector.broadcast %9 : vector<1x32xf32> to vector<128x32xf32>
    %11 = arith.addf %8, %10 : vector<128x32xf32>
    %cst_11 = arith.constant 0.000000e+00 : f32
    %12 = vector.broadcast %cst_11 : f32 to vector<16x8x32xf32>
    %c0_12 = arith.constant 0 : index
    %c0_13 = arith.constant 0 : index
    %c0_14 = arith.constant 0 : index
    %13 = vector.load %arg4[%c0_12, %c0_13, %c0_14] : memref<2x6x32xbf16, #tpu.memory_space<vmem>>, vector<1x6x32xbf16>
    %14 = vector.shape_cast %13 : vector<1x6x32xbf16> to vector<6x32xbf16>
    %cst_15 = arith.constant dense<0.000000e+00> : vector<128x32xf32>
    %15 = tpu.matmul %3, %14, %cst_15 {dimension_numbers = #tpu.dot_dimension_numbers<[1], [0], [0], [1], [0, 0, 1, 1], [], []>} : vector<128x6xbf16>, vector<6x32xbf16>, vector<128x32xf32> -> vector<128x32xf32>
    %16 = vector.shape_cast %15 : vector<128x32xf32> to vector<16x8x32xf32>
    %17 = arith.truncf %16 : vector<16x8x32xf32> to vector<16x8x32xbf16>
    %c0_16 = arith.constant 0 : index
    %c0_17 = arith.constant 0 : index
    %c0_18 = arith.constant 0 : index
    %18 = vector.load %arg3[%c0_16, %c0_17, %c0_18] : memref<2x8x8xbf16, #tpu.memory_space<vmem>>, vector<1x8x8xbf16>
    %19 = vector.shape_cast %18 : vector<1x8x8xbf16> to vector<8x8xbf16>
    %20 = vector.shape_cast %19 : vector<8x8xbf16> to vector<1x8x8xbf16>
    %21 = vector.broadcast %20 : vector<1x8x8xbf16> to vector<16x8x8xbf16>
    %cst_19 = arith.constant dense<0.000000e+00> : vector<16x8x32xf32>
    %22 = tpu.matmul %21, %17, %cst_19 {dimension_numbers = #tpu.dot_dimension_numbers<[2], [1], [1], [2], [0, 0, 0, 1, 1, 2], [0], [0]>} : vector<16x8x8xbf16>, vector<16x8x32xbf16>, vector<16x8x32xf32> -> vector<16x8x32xf32>
    %23 = arith.addf %12, %22 : vector<16x8x32xf32>
    %c1 = arith.constant 1 : index
    %c0_20 = arith.constant 0 : index
    %c0_21 = arith.constant 0 : index
    %24 = vector.load %arg4[%c1, %c0_20, %c0_21] : memref<2x6x32xbf16, #tpu.memory_space<vmem>>, vector<1x6x32xbf16>
    %25 = vector.shape_cast %24 : vector<1x6x32xbf16> to vector<6x32xbf16>
    %cst_22 = arith.constant dense<0.000000e+00> : vector<128x32xf32>
    %26 = tpu.matmul %3, %25, %cst_22 {dimension_numbers = #tpu.dot_dimension_numbers<[1], [0], [0], [1], [0, 0, 1, 1], [], []>} : vector<128x6xbf16>, vector<6x32xbf16>, vector<128x32xf32> -> vector<128x32xf32>
    %27 = vector.shape_cast %26 : vector<128x32xf32> to vector<16x8x32xf32>
    %28 = arith.truncf %27 : vector<16x8x32xf32> to vector<16x8x32xbf16>
    %c1_23 = arith.constant 1 : index
    %c0_24 = arith.constant 0 : index
    %c0_25 = arith.constant 0 : index
    %29 = vector.load %arg3[%c1_23, %c0_24, %c0_25] : memref<2x8x8xbf16, #tpu.memory_space<vmem>>, vector<1x8x8xbf16>
    %30 = vector.shape_cast %29 : vector<1x8x8xbf16> to vector<8x8xbf16>
    %31 = vector.shape_cast %30 : vector<8x8xbf16> to vector<1x8x8xbf16>
    %32 = vector.broadcast %31 : vector<1x8x8xbf16> to vector<16x8x8xbf16>
    %cst_26 = arith.constant dense<0.000000e+00> : vector<16x8x32xf32>
    %33 = tpu.matmul %32, %28, %cst_26 {dimension_numbers = #tpu.dot_dimension_numbers<[2], [1], [1], [2], [0, 0, 0, 1, 1, 2], [0], [0]>} : vector<16x8x8xbf16>, vector<16x8x32xbf16>, vector<16x8x32xf32> -> vector<16x8x32xf32>
    %34 = arith.addf %23, %33 : vector<16x8x32xf32>
    %c0_27 = arith.constant 0 : index
    %c0_28 = arith.constant 0 : index
    %35 = vector.load %arg5[%c0_27, %c0_28] : memref<8x32xf32, #tpu.memory_space<vmem>>, vector<8x32xf32>
    %36 = vector.shape_cast %35 : vector<8x32xf32> to vector<1x8x32xf32>
    %37 = vector.broadcast %36 : vector<1x8x32xf32> to vector<16x8x32xf32>
    %38 = arith.addf %34, %37 : vector<16x8x32xf32>
    %cst_29 = arith.constant 0.000000e+00 : f32
    %39 = vector.broadcast %cst_29 : f32 to vector<16x8x32xf32>
    %40 = arith.maximumf %38, %39 : vector<16x8x32xf32>
    %cst_30 = arith.constant 0.000000e+00 : f32
    %41 = vector.broadcast %cst_30 : f32 to vector<4x8x32xf32>
    %42 = tpu.concatenate %41, %40, %41 in 0 : vector<4x8x32xf32>, vector<16x8x32xf32>, vector<4x8x32xf32> -> vector<24x8x32xf32>
    %43 = vector.extract_strided_slice %42 {offsets = [0, 0, 0], sizes = [16, 8, 32], strides = [1, 1, 1]} : vector<24x8x32xf32> to vector<16x8x32xf32>
    %44 = vector.extract_strided_slice %42 {offsets = [1, 0, 0], sizes = [16, 8, 32], strides = [1, 1, 1]} : vector<24x8x32xf32> to vector<16x8x32xf32>
    %45 = vector.extract_strided_slice %42 {offsets = [2, 0, 0], sizes = [16, 8, 32], strides = [1, 1, 1]} : vector<24x8x32xf32> to vector<16x8x32xf32>
    %46 = vector.extract_strided_slice %42 {offsets = [3, 0, 0], sizes = [16, 8, 32], strides = [1, 1, 1]} : vector<24x8x32xf32> to vector<16x8x32xf32>
    %47 = vector.extract_strided_slice %42 {offsets = [4, 0, 0], sizes = [16, 8, 32], strides = [1, 1, 1]} : vector<24x8x32xf32> to vector<16x8x32xf32>
    %48 = vector.extract_strided_slice %42 {offsets = [5, 0, 0], sizes = [16, 8, 32], strides = [1, 1, 1]} : vector<24x8x32xf32> to vector<16x8x32xf32>
    %49 = vector.extract_strided_slice %42 {offsets = [6, 0, 0], sizes = [16, 8, 32], strides = [1, 1, 1]} : vector<24x8x32xf32> to vector<16x8x32xf32>
    %50 = vector.extract_strided_slice %42 {offsets = [7, 0, 0], sizes = [16, 8, 32], strides = [1, 1, 1]} : vector<24x8x32xf32> to vector<16x8x32xf32>
    %51 = vector.extract_strided_slice %42 {offsets = [8, 0, 0], sizes = [16, 8, 32], strides = [1, 1, 1]} : vector<24x8x32xf32> to vector<16x8x32xf32>
    %52 = tpu.concatenate %43, %44, %45, %46, %47, %48, %49, %50, %51 in 2 : vector<16x8x32xf32>, vector<16x8x32xf32>, vector<16x8x32xf32>, vector<16x8x32xf32>, vector<16x8x32xf32>, vector<16x8x32xf32>, vector<16x8x32xf32>, vector<16x8x32xf32>, vector<16x8x32xf32> -> vector<16x8x288xf32>
    %53 = vector.shape_cast %52 : vector<16x8x288xf32> to vector<128x288xf32>
    %54 = arith.truncf %53 : vector<128x288xf32> to vector<128x288xbf16>
    %c0_31 = arith.constant 0 : index
    %c0_32 = arith.constant 0 : index
    %55 = vector.load %arg6[%c0_31, %c0_32] : memref<288x32xbf16, #tpu.memory_space<vmem>>, vector<288x32xbf16>
    %cst_33 = arith.constant dense<0.000000e+00> : vector<128x32xf32>
    %56 = tpu.matmul %54, %55, %cst_33 {dimension_numbers = #tpu.dot_dimension_numbers<[1], [0], [0], [1], [0, 0, 1, 1], [], []>} : vector<128x288xbf16>, vector<288x32xbf16>, vector<128x32xf32> -> vector<128x32xf32>
    %c0_34 = arith.constant 0 : index
    %c0_35 = arith.constant 0 : index
    %57 = vector.load %arg7[%c0_34, %c0_35] : memref<1x32xf32, #tpu.memory_space<vmem>>, vector<1x32xf32>
    %58 = vector.broadcast %57 : vector<1x32xf32> to vector<128x32xf32>
    %59 = arith.addf %56, %58 : vector<128x32xf32>
    %60 = arith.addf %59, %11 : vector<128x32xf32>
    %61 = arith.addf %60, %6 : vector<128x32xf32>
    %cst_36 = arith.constant 0.000000e+00 : f32
    %62 = vector.broadcast %cst_36 : f32 to vector<128x32xf32>
    %63 = arith.maximumf %61, %62 : vector<128x32xf32>
    %64 = arith.truncf %63 : vector<128x32xf32> to vector<128x32xbf16>
    %cst_37 = arith.constant 0.000000e+00 : f32
    %65 = vector.broadcast %cst_37 : f32 to vector<16x8x32xf32>
    %c0_38 = arith.constant 0 : index
    %c0_39 = arith.constant 0 : index
    %c0_40 = arith.constant 0 : index
    %66 = vector.load %arg11[%c0_38, %c0_39, %c0_40] : memref<2x32x32xbf16, #tpu.memory_space<vmem>>, vector<1x32x32xbf16>
    %67 = vector.shape_cast %66 : vector<1x32x32xbf16> to vector<32x32xbf16>
    %cst_41 = arith.constant dense<0.000000e+00> : vector<128x32xf32>
    %68 = tpu.matmul %64, %67, %cst_41 {dimension_numbers = #tpu.dot_dimension_numbers<[1], [0], [0], [1], [0, 0, 1, 1], [], []>} : vector<128x32xbf16>, vector<32x32xbf16>, vector<128x32xf32> -> vector<128x32xf32>
    %69 = vector.shape_cast %68 : vector<128x32xf32> to vector<16x8x32xf32>
    %70 = arith.truncf %69 : vector<16x8x32xf32> to vector<16x8x32xbf16>
    %c0_42 = arith.constant 0 : index
    %c0_43 = arith.constant 0 : index
    %c0_44 = arith.constant 0 : index
    %71 = vector.load %arg10[%c0_42, %c0_43, %c0_44] : memref<2x8x8xbf16, #tpu.memory_space<vmem>>, vector<1x8x8xbf16>
    %72 = vector.shape_cast %71 : vector<1x8x8xbf16> to vector<8x8xbf16>
    %73 = vector.shape_cast %72 : vector<8x8xbf16> to vector<1x8x8xbf16>
    %74 = vector.broadcast %73 : vector<1x8x8xbf16> to vector<16x8x8xbf16>
    %cst_45 = arith.constant dense<0.000000e+00> : vector<16x8x32xf32>
    %75 = tpu.matmul %74, %70, %cst_45 {dimension_numbers = #tpu.dot_dimension_numbers<[2], [1], [1], [2], [0, 0, 0, 1, 1, 2], [0], [0]>} : vector<16x8x8xbf16>, vector<16x8x32xbf16>, vector<16x8x32xf32> -> vector<16x8x32xf32>
    %76 = arith.addf %65, %75 : vector<16x8x32xf32>
    %c1_46 = arith.constant 1 : index
    %c0_47 = arith.constant 0 : index
    %c0_48 = arith.constant 0 : index
    %77 = vector.load %arg11[%c1_46, %c0_47, %c0_48] : memref<2x32x32xbf16, #tpu.memory_space<vmem>>, vector<1x32x32xbf16>
    %78 = vector.shape_cast %77 : vector<1x32x32xbf16> to vector<32x32xbf16>
    %cst_49 = arith.constant dense<0.000000e+00> : vector<128x32xf32>
    %79 = tpu.matmul %64, %78, %cst_49 {dimension_numbers = #tpu.dot_dimension_numbers<[1], [0], [0], [1], [0, 0, 1, 1], [], []>} : vector<128x32xbf16>, vector<32x32xbf16>, vector<128x32xf32> -> vector<128x32xf32>
    %80 = vector.shape_cast %79 : vector<128x32xf32> to vector<16x8x32xf32>
    %81 = arith.truncf %80 : vector<16x8x32xf32> to vector<16x8x32xbf16>
    %c1_50 = arith.constant 1 : index
    %c0_51 = arith.constant 0 : index
    %c0_52 = arith.constant 0 : index
    %82 = vector.load %arg10[%c1_50, %c0_51, %c0_52] : memref<2x8x8xbf16, #tpu.memory_space<vmem>>, vector<1x8x8xbf16>
    %83 = vector.shape_cast %82 : vector<1x8x8xbf16> to vector<8x8xbf16>
    %84 = vector.shape_cast %83 : vector<8x8xbf16> to vector<1x8x8xbf16>
    %85 = vector.broadcast %84 : vector<1x8x8xbf16> to vector<16x8x8xbf16>
    %cst_53 = arith.constant dense<0.000000e+00> : vector<16x8x32xf32>
    %86 = tpu.matmul %85, %81, %cst_53 {dimension_numbers = #tpu.dot_dimension_numbers<[2], [1], [1], [2], [0, 0, 0, 1, 1, 2], [0], [0]>} : vector<16x8x8xbf16>, vector<16x8x32xbf16>, vector<16x8x32xf32> -> vector<16x8x32xf32>
    %87 = arith.addf %76, %86 : vector<16x8x32xf32>
    %c0_54 = arith.constant 0 : index
    %c0_55 = arith.constant 0 : index
    %88 = vector.load %arg12[%c0_54, %c0_55] : memref<8x32xf32, #tpu.memory_space<vmem>>, vector<8x32xf32>
    %89 = vector.shape_cast %88 : vector<8x32xf32> to vector<1x8x32xf32>
    %90 = vector.broadcast %89 : vector<1x8x32xf32> to vector<16x8x32xf32>
    %91 = arith.addf %87, %90 : vector<16x8x32xf32>
    %cst_56 = arith.constant 0.000000e+00 : f32
    %92 = vector.broadcast %cst_56 : f32 to vector<16x8x32xf32>
    %93 = arith.maximumf %91, %92 : vector<16x8x32xf32>
    %cst_57 = arith.constant 0.000000e+00 : f32
    %94 = vector.broadcast %cst_57 : f32 to vector<4x8x32xf32>
    %95 = tpu.concatenate %94, %93, %94 in 0 : vector<4x8x32xf32>, vector<16x8x32xf32>, vector<4x8x32xf32> -> vector<24x8x32xf32>
    %96 = vector.extract_strided_slice %95 {offsets = [0, 0, 0], sizes = [16, 8, 32], strides = [1, 1, 1]} : vector<24x8x32xf32> to vector<16x8x32xf32>
    %97 = vector.extract_strided_slice %95 {offsets = [1, 0, 0], sizes = [16, 8, 32], strides = [1, 1, 1]} : vector<24x8x32xf32> to vector<16x8x32xf32>
    %98 = vector.extract_strided_slice %95 {offsets = [2, 0, 0], sizes = [16, 8, 32], strides = [1, 1, 1]} : vector<24x8x32xf32> to vector<16x8x32xf32>
    %99 = vector.extract_strided_slice %95 {offsets = [3, 0, 0], sizes = [16, 8, 32], strides = [1, 1, 1]} : vector<24x8x32xf32> to vector<16x8x32xf32>
    %100 = vector.extract_strided_slice %95 {offsets = [4, 0, 0], sizes = [16, 8, 32], strides = [1, 1, 1]} : vector<24x8x32xf32> to vector<16x8x32xf32>
    %101 = vector.extract_strided_slice %95 {offsets = [5, 0, 0], sizes = [16, 8, 32], strides = [1, 1, 1]} : vector<24x8x32xf32> to vector<16x8x32xf32>
    %102 = vector.extract_strided_slice %95 {offsets = [6, 0, 0], sizes = [16, 8, 32], strides = [1, 1, 1]} : vector<24x8x32xf32> to vector<16x8x32xf32>
    %103 = vector.extract_strided_slice %95 {offsets = [7, 0, 0], sizes = [16, 8, 32], strides = [1, 1, 1]} : vector<24x8x32xf32> to vector<16x8x32xf32>
    %104 = vector.extract_strided_slice %95 {offsets = [8, 0, 0], sizes = [16, 8, 32], strides = [1, 1, 1]} : vector<24x8x32xf32> to vector<16x8x32xf32>
    %105 = tpu.concatenate %96, %97, %98, %99, %100, %101, %102, %103, %104 in 2 : vector<16x8x32xf32>, vector<16x8x32xf32>, vector<16x8x32xf32>, vector<16x8x32xf32>, vector<16x8x32xf32>, vector<16x8x32xf32>, vector<16x8x32xf32>, vector<16x8x32xf32>, vector<16x8x32xf32> -> vector<16x8x288xf32>
    %106 = vector.shape_cast %105 : vector<16x8x288xf32> to vector<128x288xf32>
    %107 = arith.truncf %106 : vector<128x288xf32> to vector<128x288xbf16>
    %c0_58 = arith.constant 0 : index
    %c0_59 = arith.constant 0 : index
    %108 = vector.load %arg13[%c0_58, %c0_59] : memref<288x32xbf16, #tpu.memory_space<vmem>>, vector<288x32xbf16>
    %cst_60 = arith.constant dense<0.000000e+00> : vector<128x32xf32>
    %109 = tpu.matmul %107, %108, %cst_60 {dimension_numbers = #tpu.dot_dimension_numbers<[1], [0], [0], [1], [0, 0, 1, 1], [], []>} : vector<128x288xbf16>, vector<288x32xbf16>, vector<128x32xf32> -> vector<128x32xf32>
    %c0_61 = arith.constant 0 : index
    %c0_62 = arith.constant 0 : index
    %110 = vector.load %arg14[%c0_61, %c0_62] : memref<1x32xf32, #tpu.memory_space<vmem>>, vector<1x32xf32>
    %111 = vector.broadcast %110 : vector<1x32xf32> to vector<128x32xf32>
    %112 = arith.addf %109, %111 : vector<128x32xf32>
    %113 = arith.addf %112, %63 : vector<128x32xf32>
    %cst_63 = arith.constant 0.000000e+00 : f32
    %114 = vector.broadcast %cst_63 : f32 to vector<128x32xf32>
    %115 = arith.maximumf %113, %114 : vector<128x32xf32>
    %116 = vector.shape_cast %115 : vector<128x32xf32> to vector<16x8x32xf32>
    %cst_64 = arith.constant 0.000000e+00 : f32
    %117 = vector.broadcast %cst_64 : f32 to vector<1x8x32xf32>
    %cst_65 = arith.constant 0.000000e+00 : f32
    %118 = vector.broadcast %cst_65 : f32 to vector<18x1x32xf32>
    %119 = tpu.concatenate %117, %116, %117 in 0 : vector<1x8x32xf32>, vector<16x8x32xf32>, vector<1x8x32xf32> -> vector<18x8x32xf32>
    %120 = tpu.concatenate %118, %119, %118 in 1 : vector<18x1x32xf32>, vector<18x8x32xf32>, vector<18x1x32xf32> -> vector<18x10x32xf32>
    %121 = vector.extract_strided_slice %120 {offsets = [0, 0, 0], sizes = [16, 8, 32], strides = [1, 1, 1]} : vector<18x10x32xf32> to vector<16x8x32xf32>
    %122 = vector.extract_strided_slice %120 {offsets = [0, 1, 0], sizes = [16, 8, 32], strides = [1, 1, 1]} : vector<18x10x32xf32> to vector<16x8x32xf32>
    %123 = vector.extract_strided_slice %120 {offsets = [0, 2, 0], sizes = [16, 8, 32], strides = [1, 1, 1]} : vector<18x10x32xf32> to vector<16x8x32xf32>
    %124 = vector.extract_strided_slice %120 {offsets = [1, 0, 0], sizes = [16, 8, 32], strides = [1, 1, 1]} : vector<18x10x32xf32> to vector<16x8x32xf32>
    %125 = vector.extract_strided_slice %120 {offsets = [1, 1, 0], sizes = [16, 8, 32], strides = [1, 1, 1]} : vector<18x10x32xf32> to vector<16x8x32xf32>
    %126 = vector.extract_strided_slice %120 {offsets = [1, 2, 0], sizes = [16, 8, 32], strides = [1, 1, 1]} : vector<18x10x32xf32> to vector<16x8x32xf32>
    %127 = vector.extract_strided_slice %120 {offsets = [2, 0, 0], sizes = [16, 8, 32], strides = [1, 1, 1]} : vector<18x10x32xf32> to vector<16x8x32xf32>
    %128 = vector.extract_strided_slice %120 {offsets = [2, 1, 0], sizes = [16, 8, 32], strides = [1, 1, 1]} : vector<18x10x32xf32> to vector<16x8x32xf32>
    %129 = vector.extract_strided_slice %120 {offsets = [2, 2, 0], sizes = [16, 8, 32], strides = [1, 1, 1]} : vector<18x10x32xf32> to vector<16x8x32xf32>
    %130 = tpu.concatenate %121, %122, %123, %124, %125, %126, %127, %128, %129 in 2 : vector<16x8x32xf32>, vector<16x8x32xf32>, vector<16x8x32xf32>, vector<16x8x32xf32>, vector<16x8x32xf32>, vector<16x8x32xf32>, vector<16x8x32xf32>, vector<16x8x32xf32>, vector<16x8x32xf32> -> vector<16x8x288xf32>
    %131 = vector.shape_cast %130 : vector<16x8x288xf32> to vector<128x288xf32>
    %132 = arith.truncf %131 : vector<128x288xf32> to vector<128x288xbf16>
    %c0_66 = arith.constant 0 : index
    %c0_67 = arith.constant 0 : index
    %133 = vector.load %arg15[%c0_66, %c0_67] : memref<288x6xbf16, #tpu.memory_space<vmem>>, vector<288x6xbf16>
    %cst_68 = arith.constant dense<0.000000e+00> : vector<128x6xf32>
    %134 = tpu.matmul %132, %133, %cst_68 {dimension_numbers = #tpu.dot_dimension_numbers<[1], [0], [0], [1], [0, 0, 1, 1], [], []>} : vector<128x288xbf16>, vector<288x6xbf16>, vector<128x6xf32> -> vector<128x6xf32>
    %c0_69 = arith.constant 0 : index
    %c0_70 = arith.constant 0 : index
    %135 = vector.load %arg16[%c0_69, %c0_70] : memref<1x6xf32, #tpu.memory_space<vmem>>, vector<1x6xf32>
    %136 = vector.broadcast %135 : vector<1x6xf32> to vector<128x6xf32>
    %137 = arith.addf %134, %136 : vector<128x6xf32>
    %c0_71 = arith.constant 0 : index
    %c0_72 = arith.constant 0 : index
    %c0_73 = arith.constant 0 : index
    %138 = vector.load %arg17[%c0_71, %c0_72, %c0_73] : memref<1x128x6xf32, #tpu.memory_space<vmem>>, vector<1x128x6xf32>
    %139 = vector.shape_cast %138 : vector<1x128x6xf32> to vector<128x6xf32>
    %140 = vector.shape_cast %137 : vector<128x6xf32> to vector<1x128x6xf32>
    tpu.vector_store %arg17[%c0_71, %c0_72, %c0_73], %140 {strides = array<i32>} : memref<1x128x6xf32, #tpu.memory_space<vmem>>, vector<1x128x6xf32>,
    return
  }
  func.func @transform_0(%arg0: i32) -> (i32, i32, i32, i32) {
    %c0_i32 = arith.constant 0 : i32
    %c0_i32_0 = arith.constant 0 : i32
    %c0_i32_1 = arith.constant 0 : i32
    %c0_i32_2 = arith.constant 0 : i32
    return %arg0, %c0_i32, %c0_i32_0, %c0_i32_1 : i32, i32, i32, i32
  }
  func.func @transform_1(%arg0: i32) -> (i32, i32, i32, i32) {
    %c0_i32 = arith.constant 0 : i32
    %c0_i32_0 = arith.constant 0 : i32
    %c0_i32_1 = arith.constant 0 : i32
    %c0_i32_2 = arith.constant 0 : i32
    return %arg0, %c0_i32, %c0_i32_0, %c0_i32_1 : i32, i32, i32, i32
  }
  func.func @transform_2(%arg0: i32) -> (i32, i32, i32) {
    %c0_i32 = arith.constant 0 : i32
    %c0_i32_0 = arith.constant 0 : i32
    %c0_i32_1 = arith.constant 0 : i32
    %c0_i32_2 = arith.constant 0 : i32
    return %c0_i32, %c0_i32_0, %c0_i32_1 : i32, i32, i32
  }
  func.func @transform_3(%arg0: i32) -> (i32, i32, i32) {
    %c0_i32 = arith.constant 0 : i32
    %c0_i32_0 = arith.constant 0 : i32
    %c0_i32_1 = arith.constant 0 : i32
    %c0_i32_2 = arith.constant 0 : i32
    return %c0_i32, %c0_i32_0, %c0_i32_1 : i32, i32, i32
  }
  func.func @transform_4(%arg0: i32) -> (i32, i32) {
    %c0_i32 = arith.constant 0 : i32
    %c0_i32_0 = arith.constant 0 : i32
    %c0_i32_1 = arith.constant 0 : i32
    return %c0_i32, %c0_i32_0 : i32, i32
  }
  func.func @transform_5(%arg0: i32) -> (i32, i32) {
    %c0_i32 = arith.constant 0 : i32
    %c0_i32_0 = arith.constant 0 : i32
    %c0_i32_1 = arith.constant 0 : i32
    return %c0_i32, %c0_i32_0 : i32, i32
  }
  func.func @transform_6(%arg0: i32) -> (i32, i32) {
    %c0_i32 = arith.constant 0 : i32
    %c0_i32_0 = arith.constant 0 : i32
    %c0_i32_1 = arith.constant 0 : i32
    return %c0_i32, %c0_i32_0 : i32, i32
  }
  func.func @transform_7(%arg0: i32) -> (i32, i32) {
    %c0_i32 = arith.constant 0 : i32
    %c0_i32_0 = arith.constant 0 : i32
    %c0_i32_1 = arith.constant 0 : i32
    return %c0_i32, %c0_i32_0 : i32, i32
  }
  func.func @transform_8(%arg0: i32) -> (i32, i32) {
    %c0_i32 = arith.constant 0 : i32
    %c0_i32_0 = arith.constant 0 : i32
    %c0_i32_1 = arith.constant 0 : i32
    return %c0_i32, %c0_i32_0 : i32, i32
  }
  func.func @transform_9(%arg0: i32) -> (i32, i32, i32) {
    %c0_i32 = arith.constant 0 : i32
    %c0_i32_0 = arith.constant 0 : i32
    %c0_i32_1 = arith.constant 0 : i32
    %c0_i32_2 = arith.constant 0 : i32
    return %c0_i32, %c0_i32_0, %c0_i32_1 : i32, i32, i32
  }
  func.func @transform_10(%arg0: i32) -> (i32, i32, i32) {
    %c0_i32 = arith.constant 0 : i32
    %c0_i32_0 = arith.constant 0 : i32
    %c0_i32_1 = arith.constant 0 : i32
    %c0_i32_2 = arith.constant 0 : i32
    return %c0_i32, %c0_i32_0, %c0_i32_1 : i32, i32, i32
  }
  func.func @transform_11(%arg0: i32) -> (i32, i32) {
    %c0_i32 = arith.constant 0 : i32
    %c0_i32_0 = arith.constant 0 : i32
    %c0_i32_1 = arith.constant 0 : i32
    return %c0_i32, %c0_i32_0 : i32, i32
  }
  func.func @transform_12(%arg0: i32) -> (i32, i32) {
    %c0_i32 = arith.constant 0 : i32
    %c0_i32_0 = arith.constant 0 : i32
    %c0_i32_1 = arith.constant 0 : i32
    return %c0_i32, %c0_i32_0 : i32, i32
  }
  func.func @transform_13(%arg0: i32) -> (i32, i32) {
    %c0_i32 = arith.constant 0 : i32
    %c0_i32_0 = arith.constant 0 : i32
    %c0_i32_1 = arith.constant 0 : i32
    return %c0_i32, %c0_i32_0 : i32, i32
  }
  func.func @transform_14(%arg0: i32) -> (i32, i32) {
    %c0_i32 = arith.constant 0 : i32
    %c0_i32_0 = arith.constant 0 : i32
    %c0_i32_1 = arith.constant 0 : i32
    return %c0_i32, %c0_i32_0 : i32, i32
  }
  func.func @transform_15(%arg0: i32) -> (i32, i32) {
    %c0_i32 = arith.constant 0 : i32
    %c0_i32_0 = arith.constant 0 : i32
    %c0_i32_1 = arith.constant 0 : i32
    return %c0_i32, %c0_i32_0 : i32, i32
  }
  func.func @transform_16(%arg0: i32) -> (i32, i32, i32) {
    %c0_i32 = arith.constant 0 : i32
    %c0_i32_0 = arith.constant 0 : i32
    %c0_i32_1 = arith.constant 0 : i32
    return %arg0, %c0_i32, %c0_i32_0 : i32, i32, i32
  }
}

</mosaic_0001>

<bundles_post_ra>
// kernel: stgcn_forward.1
= control target key start
LH: loop header
LB: loop body
LE: loop exit
PB: predicated region body
PF: predicated region fallthrough
CT: control target
= control target key end

     0   :  { %s8337_s21 = smov 0   ;;  %s10485_s0 = inlined_call_operand.vmem [shape: f32[2,16,8,6], index: 0, kind: input, shape index: {}]   ;;  %s10486_s1 = inlined_call_operand.vmem [shape: f32[2,16,8,32], index: 1, kind: input, shape index: {}]   ;;  %s10487_s2 = inlined_call_operand.vmem [shape: bf16[2,8,8], index: 2, kind: input, shape index: {}]   ;;  %s10488_s3 = inlined_call_operand.vmem [shape: bf16[2,6,32], index: 3, kind: input, shape index: {}]   ;;  %s10489_s4 = inlined_call_operand.vmem [shape: f32[8,32], index: 4, kind: input, shape index: {}]   ;;  %s10490_s5 = inlined_call_operand.vmem [shape: bf16[288,32], index: 5, kind: input, shape index: {}]   ;;  %s10491_s6 = inlined_call_operand.vmem [shape: f32[1,32], index: 6, kind: input, shape index: {}]   ;;  %s10492_s7 = inlined_call_operand.vmem [shape: bf16[6,32], index: 7, kind: input, shape index: {}]   ;;  %s10493_s8 = inlined_call_operand.vmem [shape: f32[1,32], index: 8, kind: input, shape index: {}]   ;;  %s10494_s9 = inlined_call_operand.vmem [shape: bf16[2,8,8], index: 9, kind: input, shape index: {}]   ;;  %s10495_s10 = inlined_call_operand.vmem [shape: bf16[2,32,32], index: 10, kind: input, shape index: {}]   ;;  %s10496_s11 = inlined_call_operand.vmem [shape: f32[8,32], index: 11, kind: input, shape index: {}]   ;;  %s10497_s12 = inlined_call_operand.vmem [shape: bf16[288,32], index: 12, kind: input, shape index: {}]   ;;  %s10498_s13 = inlined_call_operand.vmem [shape: f32[1,32], index: 13, kind: input, shape index: {}]   ;;  %s10499_s14 = inlined_call_operand.vmem [shape: bf16[288,6], index: 14, kind: input, shape index: {}]   ;;  %s10500_s15 = inlined_call_operand.vmem [shape: f32[1,6], index: 15, kind: input, shape index: {}]   ;;  %s10501_s16 = inlined_call_operand.vmem [shape: f32[2,128,6], index: 16, kind: output, shape index: {}]  }
   0x1   :  { %10513 = sst [smem:[#allocation2_spill]] %s10485_s0 }
   0x2 LB: > { %s6530_s22 = sadd.s32 4294967295, %s8244_s21   ;;  %p6534_p0 = scmp.ge.s32.totalorder %s8244_s21, 1  ;;  %s8244_s21 = sphi %s8337_s21, %s26_s21  }
   0x3   : > { %p472_p1 = scmp.lt.s32.totalorder %s8244_s21, 3 }
   0x5   : > { %p473_p2 = pnand %p6534_p0, %p472_p1 }
   0x6   : > { %p527_p3 = scmp.lt.s32.totalorder (!%p473_p2), %s6530_s22, 1  ;;  %s10514_s30 = sld [smem:[#allocation2_spill]] (!%p473_p2) }
   0x7   : > { %476 = sbr.rel (%p473_p2) target bundleno = 2202 (0x89a), region = 84  ;;  %s8248_s29 = smov (!%p473_p2), 64  }
   0x8   : > { %s8249_s19 = smov (!%p473_p2), 32   ;;  %s8250_s25 = smov (!%p473_p2), 96  }
   0xc   : > { %v591_v0 = vld [vmem:[%s10492_s7] sm:$0x7]  ;;  %vm664_vm0 = vcmask 1042432   ;;  %s10527_s22 = smov (!%p527_p3, %s6530_s22), 1  ;;  %vm639_vm1 = vcmask 48128   ;;  %v8246_v30 = vmov 0.0  }
   0xd   : > { %7692 = vmatprep.subr.msk.bf16.mxu0 %vm664_vm0, %v591_v0  ;;  %v666_v1 = vsel %vm664_vm0, %v591_v0, 0  ;;  %v765_v2 = vld [vmem:[%s10488_s3] sm:$0x7]  ;;  %s8356_s27 = sshll.u32 %s10527_s22, 7  ;;  %v6566_v7 = vld [vmem:[%s10488_s3 + $0x4] sm:$0x7] }
   0xe   : > { %7153 = vmatpush3.bf16.msra.mxu0 %v666_v1  ;;  %v767_v3 = vsel %vm664_vm0, %v765_v2, 0  ;;  %7694 = vmatprep.subr.msk.bf16.mxu1 %vm664_vm0, %v765_v2  ;;  %s8362_s0 = scalar_lea.vmem %s10514_s30, %s8356_s27  ;;  %v886_v20 = vsel %vm664_vm0, %v6566_v7, 0  ;;  %vm8247_vm2 = vmmov 0   ;;  %vm1007_vm3 = vcmask 1043456   ;;  %v8459_v57 = vld [vmem:[%s10487_s2 + $0x4] sm:$0xf]  ;;  %s9037_s30 = scalar_lea.vmem %s10486_s1, %s8356_s27 }
   0xf   : > { %7693 = vmatprep.subr.msk.bf16.mxu0 %vm664_vm0, %v765_v2  ;;  %7691 = vmatpush3.bf16.msra.mxu1 %v767_v3  ;;  %v543_v4 = vld [vmem:[%s8362_s0] sm:$0xff]  ;;  %v544_v5 = vld [vmem:[%s8362_s0 + $0x8] sm:$0xff]  ;;  %v545_v6 = vld [vmem:[%s8362_s0 + $0x10] sm:$0xff]  ;;  %vm1003_vm4 = vcmask 64512   ;;  %vm2590_vm5 = vcmask 261120   ;;  %vm2605_vm6 = vcmask 523264   ;;  %s10433_s20 = scalar_lea.vmem %s10501_s16, %s8356_s27 }
  0x10   : > { %v6747_v8 = vpack.c.bf16 %v544_v5, %v543_v4  ;;  %v546_v9 = vld [vmem:[%s8362_s0 + $0x18] sm:$0xff]  ;;  %v547_v10 = vld [vmem:[%s8362_s0 + $0x20] sm:$0xff]  ;;  %v548_v11 = vld [vmem:[%s8362_s0 + $0x28] sm:$0xff]  ;;  %7206 = vmatprep.subr.bf16.mxu1 %v8246_v30  ;;  %vm2621_vm7 = vcmask 785408   ;;  %vm5465_vm8 = vcmask 1040384   ;;  %vm5532_vm9 = vcmask 1046528  }
  0x11   : > { %v6748_v12 = vpack.c.bf16 %v546_v9, %v545_v6  ;;  %v6749_v13 = vpack.c.bf16 %v548_v11, %v547_v10  ;;  %v549_v14 = vld [vmem:[%s8362_s0 + $0x30] sm:$0xff]  ;;  %v550_v15 = vld [vmem:[%s8362_s0 + $0x38] sm:$0xff]  ;;  %v551_v16 = vld [vmem:[%s8362_s0 + $0x40] sm:$0xff]  ;;  %vm5629_vm10 = vcmask 1045504  }
  0x12   : > { %7154 = vmatprep.mubr.msk.bf16.mxu0 %vm639_vm1, %v6747_v8  ;;  %v552_v17 = vld [vmem:[%s8362_s0 + $0x48] sm:$0xff]  ;;  %v6750_v18 = vpack.c.bf16 %v550_v15, %v549_v14  ;;  %v553_v21 = vld [vmem:[%s8362_s0 + $0x50] sm:$0xff]  ;;  %v554_v22 = vld [vmem:[%s8362_s0 + $0x58] sm:$0xff] }
  0x13   : > { %7155 = vmatmul.mubr.msk.bf16.vlgmr.msra.gmra.mxu0 %vm639_vm1, %v6748_v12  ;;  %7176 = vmatprep.mubr.msk.bf16.mxu1 %vm639_vm1, %v6749_v13  ;;  %v6751_v19 = vpack.c.bf16 %v552_v17, %v551_v16  ;;  %v555_v23 = vld [vmem:[%s8362_s0 + $0x60] sm:$0xff]  ;;  %v556_v24 = vld [vmem:[%s8362_s0 + $0x68] sm:$0xff]  ;;  %v6752_v25 = vpack.c.bf16 %v554_v22, %v553_v21  ;;  %v557_v27 = vld [vmem:[%s8362_s0 + $0x70] sm:$0xff] }
  0x14   : > { %7158 = vmatprep.mubr.msk.bf16.mxu0 %vm639_vm1, %v6749_v13  ;;  %7171 = vmatpush3.bf16.msra.mxu0 %v767_v3  ;;  %v6753_v26 = vpack.c.bf16 %v556_v24, %v555_v23  ;;  %v558_v28 = vld [vmem:[%s8362_s0 + $0x78] sm:$0xff] }
  0x15   : > { %7695 = vmatprep.subr.msk.bf16.mxu0 %vm664_vm0, %v6566_v7  ;;  %7177 = vmatmul.mubr.msk.bf16.vlgmr.msra.gmra.mxu1 %vm639_vm1, %v6750_v18  ;;  %v6754_v29 = vpack.c.bf16 %v558_v28, %v557_v27 }
  0x16   : > { %7180 = vmatprep.mubr.msk.bf16.mxu1 %vm639_vm1, %v6751_v19 }
  0x1b   : > { %7159 = vmatmul.mubr.msk.bf16.gmra.mxu0 %vm639_vm1, %v6750_v18 }
  0x1c   : > { %7162 = vmatprep.mubr.msk.bf16.mxu0 %vm639_vm1, %v6751_v19 }
  0x1d   : > { %7181 = vmatmul.mubr.msk.bf16.gmra.mxu1 %vm639_vm1, %v6752_v25 }
  0x1e   : > { %7184 = vmatprep.mubr.msk.bf16.mxu1 %vm639_vm1, %v6753_v26 }
  0x23   : > { %7163 = vmatmul.mubr.msk.bf16.gmra.mxu0 %vm639_vm1, %v6752_v25 }
  0x24   : > { %7166 = vmatprep.mubr.msk.bf16.mxu0 %vm639_vm1, %v6753_v26 }
  0x25   : > { %7185 = vmatmul.mubr.msk.bf16.gmra.mxu1 %vm639_vm1, %v6754_v29 }
  0x26   : > { %7208 = vmatprep.mubr.msk.bf16.mxu1 %vm8247_vm2, %v8246_v30 }
  0x2b   : > { %7167 = vmatmul.mubr.msk.bf16.gmra.mxu0 %vm639_vm1, %v6754_v29 }
  0x2c   : > { %7172 = vmatprep.mubr.msk.bf16.mxu0 %vm639_vm1, %v6747_v8 }
  0x33   : > { %7173 = vmatmul.mubr.msk.bf16.vlgmr.msra.gmra.mxu0 %vm639_vm1, %v6748_v12 }
  0x34   : > { %7189 = vmatpush3.bf16.msra.mxu0 %v886_v20  ;;  %7190 = vmatprep.mubr.msk.bf16.mxu0 %vm639_vm1, %v6747_v8 }
  0x35   : > { %7230 = vmatprep.subr.bf16.mxu0 %v8246_v30 }
  0x3b   : > { %7191 = vmatmul.mubr.msk.bf16.vlgmr.msra.gmra.mxu0 %vm639_vm1, %v6748_v12 }
  0x3c   : > { %7194 = vmatprep.mubr.msk.bf16.mxu0 %vm639_vm1, %v6749_v13 }
  0x43   : > { %7195 = vmatmul.mubr.msk.bf16.gmra.mxu0 %vm639_vm1, %v6750_v18 }
  0x44   : > { %7198 = vmatprep.mubr.msk.bf16.mxu0 %vm639_vm1, %v6751_v19 }
  0x4b   : > { %7199 = vmatmul.mubr.msk.bf16.gmra.mxu0 %vm639_vm1, %v6752_v25 }
  0x4c   : > { %7202 = vmatprep.mubr.msk.bf16.mxu0 %vm639_vm1, %v6753_v26 }
  0x53   : > { %7203 = vmatmul.mubr.msk.bf16.gmra.mxu0 %vm639_vm1, %v6754_v29 }
  0x54   : > { %7232 = vmatprep.mubr.msk.bf16.mxu0 %vm8247_vm2, %v8246_v30 }
  0xd3   : > { %v8415_v31 = vpop.f32.mrf.mxu0 }
  0xd5   : > { %v8417_v32 = vpop.f32.mrf.mxu0 }
  0xd7   : > { %v8419_v33 = vpop.f32.mrf.mxu0 }
  0xd9   : > { %v8421_v34 = vpop.f32.mrf.mxu0 }
  0xdb   : > { %v8423_v35 = vpop.f32.mrf.mxu0 }
  0xdd   : > { %v8425_v36 = vpop.f32.mrf.mxu0 }
  0xdf   : > { %v8427_v37 = vpop.f32.mrf.mxu0 }
  0xe1   : > { %v8429_v38 = vpop.f32.mrf.mxu0 }
  0xe3   : > { %v8431_v39 = vpop.f32.mrf.mxu0 }
  0xe5   : > { %v8433_v40 = vpop.f32.mrf.mxu0 }
  0xe7   : > { %v8435_v41 = vpop.f32.mrf.mxu0 }
  0xe9   : > { %v8437_v42 = vpop.f32.mrf.mxu0 }
  0xeb   : > { %v8439_v43 = vpop.f32.mrf.mxu0 }
  0xed   : > { %v8441_v44 = vpop.f32.mrf.mxu0 }
  0xef   : > { %v8443_v45 = vpop.f32.mrf.mxu0 }
  0xf1   : > { %v8445_v46 = vpop.f32.mrf.mxu0 }
  0xf3   : > { %v8447_v47 = vpop.f32.mrf.mxu0 }
  0xf5   : > { %v8449_v48 = vpop.f32.mrf.mxu0 }
  0xf6   : > { %v866_v28 = vpack.c.bf16 %v8449_v48, %v8449_v48  ;;  %v7178_v48 = vpop.f32.mrf.mxu1 }
  0xf7   : > { %v8451_v49 = vpop.f32.mrf.mxu0 }
  0xf9   : > { %v8453_v50 = vpop.f32.mrf.mxu0 }
  0xfb   : > { %v7192_v51 = vpop.f32.mrf.mxu0 }
  0xfc   : > { %v987_v1 = vpack.c.bf16 %v7192_v51, %v7192_v51 }
  0xfd   : > { %v922_v52 = vpop.f32.mrf.mxu0 }
  0xfe   : > { %v985_v53 = vpack.c.bf16 %v922_v52, %v922_v52  ;;  %v1095_v6 = vsel %vm1007_vm3, %v987_v1, 0  ;;  %v1700_v52 = vsel %vm1007_vm3, %v866_v28, 0 }
  0xff   : > { %v7193_v54 = vpop.f32.mrf.mxu0 }
 0x100   : > { %v1009_v55 = vsel %vm1007_vm3, %v985_v53, 0  ;;  %v988_v10 = vpack.c.bf16 %v7193_v54, %v7193_v54 }
 0x101   : > { %v925_v56 = vpop.f32.mrf.mxu0  ;;  %7207 = vmatpush3.bf16.msra.mxu1 %v1009_v55  ;;  %v868_v55 = vpack.c.bf16 %v8447_v47, %v8447_v47 }
 0x102   : > { %v986_v58 = vpack.c.bf16 %v925_v56, %v925_v56  ;;  %7212 = vmatprep.subr.bf16.mxu1 %v8246_v30  ;;  %v1138_v13 = vsel %vm1007_vm3, %v988_v10, 0 }
 0x103   : > { %v7196_v59 = vpop.f32.mrf.mxu0 }
 0x104   : > { %7209 = vmatmul.mubr.msk.bf16.vlgmr.msra.gmra.mxu1 %vm1003_vm4, %v8459_v57  ;;  %v1052_v60 = vsel %vm1007_vm3, %v986_v58, 0  ;;  %v991_v62 = vpack.c.bf16 %v7196_v59, %v7196_v59  ;;  %v8549_v58 = vld [vmem:[%s10487_s2] sm:$0xf]  ;;  %v819_v59 = vpop.f32.mrf.mxu1 }
 0x105   : > { %v938_v61 = vpop.f32.mrf.mxu0  ;;  %7213 = vmatpush3.bf16.msra.mxu1 %v1052_v60  ;;  %7214 = vmatprep.mubr.msk.bf16.mxu1 %vm8247_vm2, %v8246_v30  ;;  %v1786_v60 = vsel %vm1007_vm3, %v868_v55, 0  ;;  %v870_v47 = vpack.c.bf16 %v819_v59, %v819_v59  ;;  %v8181_v55 = vld [vmem:[%s10490_s5 + $0x80] sm:$0xff]  }
 0x106   : > { %v989_v63 = vpack.c.bf16 %v938_v61, %v938_v61  ;;  %7218 = vmatprep.subr.bf16.mxu1 %v8246_v30  ;;  %v1267_v4 = vsel %vm1007_vm3, %v991_v62, 0  ;;  %v7179_v62 = vpop.f32.mrf.mxu1 }
 0x107   : > { %v7197_v0 = vpop.f32.mrf.mxu0 }
 0x108   : > { %v1181_v2 = vsel %vm1007_vm3, %v989_v63, 0  ;;  %v992_v21 = vpack.c.bf16 %v7197_v0, %v7197_v0  ;;  %v1872_v0 = vsel %vm1007_vm3, %v870_v47, 0  ;;  %v822_v1 = vpop.f32.mrf.mxu1 }
 0x109   : > { %7231 = vmatpush3.bf16.msra.mxu0 %v1181_v2  ;;  %v941_v3 = vpop.f32.mrf.mxu0 }
 0x10a   : > { %7242 = vmatprep.subr.bf16.mxu0 %v8246_v30  ;;  %v990_v16 = vpack.c.bf16 %v941_v3, %v941_v3  ;;  %v1310_v23 = vsel %vm1007_vm3, %v992_v21, 0  ;;  %v872_v3 = vpack.c.bf16 %v7178_v48, %v7178_v48  ;;  %v8180_v48 = vld [vmem:[%s10490_s5 + $0x88] sm:$0xff]  }
 0x10b   : > { %v7200_v5 = vpop.f32.mrf.mxu0 }
 0x10c   : > { %7215 = vmatmul.mubr.msk.bf16.vlgmr.msra.gmra.mxu1 %vm1003_vm4, %v8459_v57  ;;  %7233 = vmatmul.mubr.msk.bf16.vlgmr.msra.gmra.mxu0 %vm1003_vm4, %v8459_v57  ;;  %v995_v14 = vpack.c.bf16 %v7200_v5, %v7200_v5  ;;  %v1224_v19 = vsel %vm1007_vm3, %v990_v16, 0  ;;  %v867_v5 = vpack.c.bf16 %v8453_v50, %v8453_v50 }
 0x10d   : > { %7219 = vmatpush3.bf16.msra.mxu1 %v1095_v6  ;;  %7243 = vmatpush3.bf16.msra.mxu0 %v1267_v4  ;;  %v954_v7 = vpop.f32.mrf.mxu0  ;;  %v7182_v4 = vpop.f32.mrf.mxu1  ;;  %v1958_v6 = vsel %vm1007_vm3, %v872_v3, 0 }
 0x10e   : > { %7220 = vmatprep.mubr.msk.bf16.mxu1 %vm8247_vm2, %v8246_v30  ;;  %7224 = vmatprep.subr.bf16.mxu1 %v8246_v30  ;;  %v993_v8 = vpack.c.bf16 %v954_v7, %v954_v7  ;;  %v1439_v17 = vsel %vm1007_vm3, %v995_v14, 0  ;;  %v871_v14 = vpack.c.bf16 %v822_v1, %v822_v1 }
 0x10f   : > { %7244 = vmatprep.mubr.msk.bf16.mxu0 %vm8247_vm2, %v8246_v30  ;;  %7254 = vmatprep.subr.bf16.mxu0 %v8246_v30  ;;  %v7201_v9 = vpop.f32.mrf.mxu0  ;;  %v835_v7 = vpop.f32.mrf.mxu1 }
 0x110   : > { %v1353_v11 = vsel %vm1007_vm3, %v993_v8, 0  ;;  %v996_v29 = vpack.c.bf16 %v7201_v9, %v7201_v9  ;;  %v1743_v8 = vsel %vm1007_vm3, %v867_v5, 0  ;;  %v874_v9 = vpack.c.bf16 %v835_v7, %v835_v7 }
 0x111   : > { %v957_v12 = vpop.f32.mrf.mxu0  ;;  %v7183_v50 = vpop.f32.mrf.mxu1 }
 0x112   : > { %v994_v25 = vpack.c.bf16 %v957_v12, %v957_v12  ;;  %v1482_v53 = vsel %vm1007_vm3, %v996_v29, 0  ;;  %v2044_v10 = vsel %vm1007_vm3, %v874_v9, 0 }
 0x113   : > { %v7204_v15 = vpop.f32.mrf.mxu0 }
 0x114   : > { %7221 = vmatmul.mubr.msk.bf16.vlgmr.msra.gmra.mxu1 %vm1003_vm4, %v8459_v57  ;;  %7245 = vmatmul.mubr.msk.bf16.vlgmr.msra.gmra.mxu0 %vm1003_vm4, %v8459_v57  ;;  %v999_v24 = vpack.c.bf16 %v7204_v15, %v7204_v15  ;;  %v1396_v27 = vsel %vm1007_vm3, %v994_v25, 0 }
 0x115   : > { %7225 = vmatpush3.bf16.msra.mxu1 %v1138_v13  ;;  %7255 = vmatpush3.bf16.msra.mxu0 %v1353_v11  ;;  %v970_v18 = vpop.f32.mrf.mxu0  ;;  %v838_v11 = vpop.f32.mrf.mxu1  ;;  %v876_v13 = vpack.c.bf16 %v7182_v4, %v7182_v4 }
 0x116   : > { %7226 = vmatprep.mubr.msk.bf16.mxu1 %vm8247_vm2, %v8246_v30  ;;  %7236 = vmatprep.subr.bf16.mxu1 %v8246_v30  ;;  %v997_v20 = vpack.c.bf16 %v970_v18, %v970_v18  ;;  %v1611_v26 = vsel %vm1007_vm3, %v999_v24, 0 }
 0x117   : > { %7256 = vmatprep.mubr.msk.bf16.mxu0 %vm8247_vm2, %v8246_v30  ;;  %7266 = vmatprep.subr.bf16.mxu0 %v8246_v30  ;;  %v7205_v51 = vpop.f32.mrf.mxu0  ;;  %v2130_v15 = vsel %vm1007_vm3, %v876_v13, 0 }
 0x118   : > { %v1525_v22 = vsel %vm1007_vm3, %v997_v20, 0  ;;  %v1000_v63 = vpack.c.bf16 %v7205_v51, %v7205_v51 }
 0x119   : > { %v973_v54 = vpop.f32.mrf.mxu0 }
 0x11a   : > { %v998_v56 = vpack.c.bf16 %v973_v54, %v973_v54  ;;  %v1654_v2 = vsel %vm1007_vm3, %v1000_v63, 0 }
 0x11c   : > { %7227 = vmatmul.mubr.msk.bf16.vlgmr.msra.gmra.mxu1 %vm1003_vm4, %v8459_v57  ;;  %7257 = vmatmul.mubr.msk.bf16.vlgmr.msra.gmra.mxu0 %vm1003_vm4, %v8459_v57  ;;  %v1568_v61 = vsel %vm1007_vm3, %v998_v56, 0 }
 0x11d   : > { %7237 = vmatpush3.bf16.msra.mxu1 %v1224_v19  ;;  %7267 = vmatpush3.bf16.msra.mxu0 %v1439_v17  ;;  %v1915_v17 = vsel %vm1007_vm3, %v871_v14, 0  ;;  %v873_v19 = vpack.c.bf16 %v7179_v62, %v7179_v62  ;;  %v8185_v14 = vld [vmem:[%s10490_s5 + $0x30] sm:$0xff]  }
 0x11e   : > { %7238 = vmatprep.mubr.msk.bf16.mxu1 %vm8247_vm2, %v8246_v30  ;;  %7248 = vmatprep.subr.bf16.mxu1 %v8246_v30 }
 0x11f   : > { %7268 = vmatprep.mubr.msk.bf16.mxu0 %vm8247_vm2, %v8246_v30  ;;  %7278 = vmatprep.subr.bf16.mxu0 %v8246_v30  ;;  %v2001_v21 = vsel %vm1007_vm3, %v873_v19, 0 }
 0x124   : > { %7239 = vmatmul.mubr.msk.bf16.vlgmr.msra.gmra.mxu1 %vm1003_vm4, %v8459_v57  ;;  %7269 = vmatmul.mubr.msk.bf16.vlgmr.msra.gmra.mxu0 %vm1003_vm4, %v8459_v57 }
 0x125   : > { %7249 = vmatpush3.bf16.msra.mxu1 %v1310_v23  ;;  %7279 = vmatpush3.bf16.msra.mxu0 %v1525_v22  ;;  %v875_v22 = vpack.c.bf16 %v838_v11, %v838_v11 }
 0x126   : > { %7250 = vmatprep.mubr.msk.bf16.mxu1 %vm8247_vm2, %v8246_v30  ;;  %7260 = vmatprep.subr.bf16.mxu1 %v8246_v30 }
 0x127   : > { %7280 = vmatprep.mubr.msk.bf16.mxu0 %vm8247_vm2, %v8246_v30  ;;  %7290 = vmatprep.subr.bf16.mxu0 %v8246_v30  ;;  %v2087_v25 = vsel %vm1007_vm3, %v875_v22, 0 }
 0x12c   : > { %7251 = vmatmul.mubr.msk.bf16.vlgmr.msra.gmra.mxu1 %vm1003_vm4, %v8459_v57  ;;  %7281 = vmatmul.mubr.msk.bf16.vlgmr.msra.gmra.mxu0 %vm1003_vm4, %v8459_v57 }
 0x12d   : > { %7261 = vmatpush3.bf16.msra.mxu1 %v1396_v27  ;;  %7291 = vmatpush3.bf16.msra.mxu0 %v1611_v26  ;;  %v877_v27 = vpack.c.bf16 %v7183_v50, %v7183_v50  ;;  %v8182_v50 = vld [vmem:[%s10490_s5 + $0x78] sm:$0xff]  }
 0x12e   : > { %7262 = vmatprep.mubr.msk.bf16.mxu1 %vm8247_vm2, %v8246_v30  ;;  %7272 = vmatprep.subr.bf16.mxu1 %v8246_v30 }
 0x12f   : > { %7292 = vmatprep.mubr.msk.bf16.mxu0 %vm8247_vm2, %v8246_v30  ;;  %7302 = vmatprep.subr.bf16.mxu0 %v8246_v30  ;;  %v2173_v29 = vsel %vm1007_vm3, %v877_v27, 0 }
 0x134   : > { %7263 = vmatmul.mubr.msk.bf16.vlgmr.msra.gmra.mxu1 %vm1003_vm4, %v8459_v57  ;;  %7293 = vmatmul.mubr.msk.bf16.vlgmr.msra.gmra.mxu0 %vm1003_vm4, %v8459_v57 }
 0x135   : > { %7273 = vmatpush3.bf16.msra.mxu1 %v1482_v53  ;;  %7303 = vmatpush3.bf16.msra.mxu0 %v1700_v52 }
 0x136   : > { %7274 = vmatprep.mubr.msk.bf16.mxu1 %vm8247_vm2, %v8246_v30  ;;  %7284 = vmatprep.subr.bf16.mxu1 %v8246_v30 }
 0x137   : > { %7304 = vmatprep.mubr.msk.bf16.mxu0 %vm8247_vm2, %v8246_v30  ;;  %7314 = vmatprep.subr.bf16.mxu0 %v8246_v30 }
 0x13c   : > { %7275 = vmatmul.mubr.msk.bf16.vlgmr.msra.gmra.mxu1 %vm1003_vm4, %v8459_v57  ;;  %7305 = vmatmul.mubr.msk.bf16.vlgmr.msra.gmra.mxu0 %vm1003_vm4, %v8549_v58 }
 0x13d   : > { %7285 = vmatpush3.bf16.msra.mxu1 %v1568_v61  ;;  %7315 = vmatpush3.bf16.msra.mxu0 %v1786_v60 }
 0x13e   : > { %7286 = vmatprep.mubr.msk.bf16.mxu1 %vm8247_vm2, %v8246_v30  ;;  %7296 = vmatprep.subr.bf16.mxu1 %v8246_v30 }
 0x13f   : > { %7316 = vmatprep.mubr.msk.bf16.mxu0 %vm8247_vm2, %v8246_v30  ;;  %7326 = vmatprep.subr.bf16.mxu0 %v8246_v30 }
 0x144   : > { %7287 = vmatmul.mubr.msk.bf16.vlgmr.msra.gmra.mxu1 %vm1003_vm4, %v8459_v57  ;;  %7317 = vmatmul.mubr.msk.bf16.vlgmr.msra.gmra.mxu0 %vm1003_vm4, %v8549_v58 }
 0x145   : > { %7297 = vmatpush3.bf16.msra.mxu1 %v1654_v2  ;;  %7327 = vmatpush3.bf16.msra.mxu0 %v1872_v0 }
 0x146   : > { %7298 = vmatprep.mubr.msk.bf16.mxu1 %vm8247_vm2, %v8246_v30  ;;  %7308 = vmatprep.subr.bf16.mxu1 %v8246_v30 }
 0x147   : > { %7328 = vmatprep.mubr.msk.bf16.mxu0 %vm8247_vm2, %v8246_v30  ;;  %7338 = vmatprep.subr.bf16.mxu0 %v8246_v30 }
 0x14c   : > { %7299 = vmatmul.mubr.msk.bf16.vlgmr.msra.gmra.mxu1 %vm1003_vm4, %v8459_v57  ;;  %7329 = vmatmul.mubr.msk.bf16.vlgmr.msra.gmra.mxu0 %vm1003_vm4, %v8549_v58  ;;  %v869_v57 = vpack.c.bf16 %v8451_v49, %v8451_v49  ;;  %v7186_v49 = vpop.f32.mrf.mxu1 }
 0x14d   : > { %7309 = vmatpush3.bf16.msra.mxu1 %v1743_v8  ;;  %7339 = vmatpush3.bf16.msra.mxu0 %v1958_v6  ;;  %v880_v23 = vpack.c.bf16 %v7186_v49, %v7186_v49 }
 0x14e   : > { %7310 = vmatprep.mubr.msk.bf16.mxu1 %vm8247_vm2, %v8246_v30  ;;  %7320 = vmatprep.subr.bf16.mxu1 %v8246_v30  ;;  %v1829_v12 = vsel %vm1007_vm3, %v869_v57, 0  ;;  %v851_v16 = vpop.f32.mrf.mxu1  ;;  %v8183_v57 = vld [vmem:[%s10490_s5 + $0x38] sm:$0xff]  }
 0x14f   : > { %7340 = vmatprep.mubr.msk.bf16.mxu0 %vm8247_vm2, %v8246_v30  ;;  %7350 = vmatprep.subr.bf16.mxu0 %v8246_v30  ;;  %v878_v18 = vpack.c.bf16 %v851_v16, %v851_v16  ;;  %v2302_v24 = vsel %vm1007_vm3, %v880_v23, 0 }
 0x150   : > { %v7187_v26 = vpop.f32.mrf.mxu1 }
 0x151   : > { %v2216_v20 = vsel %vm1007_vm3, %v878_v18, 0  ;;  %v881_v53 = vpack.c.bf16 %v7187_v26, %v7187_v26 }
 0x152   : > { %v854_v28 = vpop.f32.mrf.mxu1 }
 0x153   : > { %v879_v51 = vpack.c.bf16 %v854_v28, %v854_v28  ;;  %v2345_v54 = vsel %vm1007_vm3, %v881_v53, 0 }
 0x154   : > { %7311 = vmatmul.mubr.msk.bf16.vlgmr.msra.gmra.mxu1 %vm1003_vm4, %v8549_v58  ;;  %7341 = vmatmul.mubr.msk.bf16.vlgmr.msra.gmra.mxu0 %vm1003_vm4, %v8549_v58 }
 0x155   : > { %7321 = vmatpush3.bf16.msra.mxu1 %v1829_v12  ;;  %7351 = vmatpush3.bf16.msra.mxu0 %v2044_v10  ;;  %v2259_v52 = vsel %vm1007_vm3, %v879_v51, 0  ;;  %v8184_v10 = vld [vmem:[%s10490_s5 + $0x70] sm:$0xff]  }
 0x156   : > { %7322 = vmatprep.mubr.msk.bf16.mxu1 %vm8247_vm2, %v8246_v30  ;;  %7332 = vmatprep.subr.bf16.mxu1 %v8246_v30 }
 0x157   : > { %7352 = vmatprep.mubr.msk.bf16.mxu0 %vm8247_vm2, %v8246_v30  ;;  %7362 = vmatprep.subr.bf16.mxu0 %v8246_v30 }
 0x15c   : > { %7323 = vmatmul.mubr.msk.bf16.vlgmr.msra.gmra.mxu1 %vm1003_vm4, %v8549_v58  ;;  %7353 = vmatmul.mubr.msk.bf16.vlgmr.msra.gmra.mxu0 %vm1003_vm4, %v8549_v58 }
 0x15d   : > { %7333 = vmatpush3.bf16.msra.mxu1 %v1915_v17  ;;  %7363 = vmatpush3.bf16.msra.mxu0 %v2130_v15 }
 0x15e   : > { %7334 = vmatprep.mubr.msk.bf16.mxu1 %vm8247_vm2, %v8246_v30  ;;  %7344 = vmatprep.subr.bf16.mxu1 %v8246_v30 }
 0x15f   : > { %7364 = vmatprep.mubr.msk.bf16.mxu0 %vm8247_vm2, %v8246_v30  ;;  %7374 = vmatprep.subr.bf16.mxu0 %v8246_v30 }
 0x164   : > { %7335 = vmatmul.mubr.msk.bf16.vlgmr.msra.gmra.mxu1 %vm1003_vm4, %v8549_v58  ;;  %7365 = vmatmul.mubr.msk.bf16.vlgmr.msra.gmra.mxu0 %vm1003_vm4, %v8549_v58 }
 0x165   : > { %7345 = vmatpush3.bf16.msra.mxu1 %v2001_v21  ;;  %7375 = vmatpush3.bf16.msra.mxu0 %v2216_v20 }
 0x166   : > { %7346 = vmatprep.mubr.msk.bf16.mxu1 %vm8247_vm2, %v8246_v30  ;;  %7376 = vmatprep.mubr.msk.bf16.mxu0 %vm8247_vm2, %v8246_v30 }
 0x167   : > { %7356 = vmatprep.subr.bf16.mxu1 %v8246_v30  ;;  %7386 = vmatprep.subr.bf16.mxu0 %v8246_v30 }
 0x16c   : > { %7347 = vmatmul.mubr.msk.bf16.vlgmr.msra.gmra.mxu1 %vm1003_vm4, %v8549_v58  ;;  %7377 = vmatmul.mubr.msk.bf16.vlgmr.msra.gmra.mxu0 %vm1003_vm4, %v8549_v58 }
 0x16d   : > { %7357 = vmatpush3.bf16.msra.mxu1 %v2087_v25  ;;  %7387 = vmatpush3.bf16.msra.mxu0 %v2302_v24 }
 0x16e   : > { %7358 = vmatprep.mubr.msk.bf16.mxu1 %vm8247_vm2, %v8246_v30  ;;  %7368 = vmatprep.subr.bf16.mxu1 %v8246_v30 }
 0x16f   : > { %7388 = vmatprep.mubr.msk.bf16.mxu0 %vm8247_vm2, %v8246_v30  ;;  %6846 = vmatprep.subr.bf16.mxu0 %v8182_v50 }
 0x174   : > { %7359 = vmatmul.mubr.msk.bf16.vlgmr.msra.gmra.mxu1 %vm1003_vm4, %v8549_v58  ;;  %7389 = vmatmul.mubr.msk.bf16.vlgmr.msra.gmra.mxu0 %vm1003_vm4, %v8549_v58 }
 0x175   : > { %7369 = vmatpush3.bf16.msra.mxu1 %v2173_v29  ;;  %7370 = vmatprep.mubr.msk.bf16.mxu1 %vm8247_vm2, %v8246_v30 }
 0x176   : > { %7380 = vmatprep.subr.bf16.mxu1 %v8246_v30  ;;  %6847 = vmatpush3.bf16.msra.mxu0 %v8183_v57 }
 0x177   : > { %6848 = vmatprep.subr.bf16.mxu0 %v8184_v10 }
 0x17a   : > { %6849 = vmatpush3.bf16.msra.mxu0 %v8185_v14 }
 0x17c   : > { %7371 = vmatmul.mubr.msk.bf16.vlgmr.msra.gmra.mxu1 %vm1003_vm4, %v8549_v58 }
 0x17d   : > { %7381 = vmatpush3.bf16.msra.mxu1 %v2259_v52  ;;  %7382 = vmatprep.mubr.msk.bf16.mxu1 %vm8247_vm2, %v8246_v30 }
 0x17e   : > { %7392 = vmatprep.subr.bf16.mxu1 %v8246_v30 }
 0x184   : > { %7383 = vmatmul.mubr.msk.bf16.vlgmr.msra.gmra.mxu1 %vm1003_vm4, %v8549_v58 }
 0x185   : > { %7393 = vmatpush3.bf16.msra.mxu1 %v2345_v54  ;;  %7394 = vmatprep.mubr.msk.bf16.mxu1 %vm8247_vm2, %v8246_v30 }
 0x186   : > { %7398 = vmatprep.subr.bf16.mxu1 %v8180_v48 }
 0x18c   : > { %7395 = vmatmul.mubr.msk.bf16.vlgmr.msra.gmra.mxu1 %vm1003_vm4, %v8549_v58 }
 0x18d   : > { %7399 = vmatpush3.bf16.msra.mxu1 %v8180_v48 }
 0x18e   : > { %7400 = vmatprep.subr.bf16.mxu1 %v8181_v55 }
 0x191   : > { %7401 = vmatpush3.bf16.msra.mxu1 %v8181_v55 }
 0x1c4   : > { %v8665_v56 = vpop.f32.mrf.mxu1 }
 0x1c6   : > { %v7210_v59 = vpop.f32.mrf.mxu1 }
 0x1c8   : > { %v1048_v60 = vpop.f32.mrf.mxu1 }
 0x1ca   : > { %v7211_v61 = vpop.f32.mrf.mxu1 }
 0x1cc   : > { %v8667_v47 = vpop.f32.mrf.mxu1  ;;  %v8669_v58 = vpop.f32.mrf.mxu0 }
 0x1ce   : > { %v7216_v62 = vpop.f32.mrf.mxu1  ;;  %v7234_v63 = vpop.f32.mrf.mxu0 }
 0x1d0   : > { %v1091_v0 = vpop.f32.mrf.mxu1  ;;  %v1220_v1 = vpop.f32.mrf.mxu0 }
 0x1d2   : > { %v7217_v2 = vpop.f32.mrf.mxu1  ;;  %v7235_v3 = vpop.f32.mrf.mxu0 }
 0x1d4   : > { %v8671_v4 = vpop.f32.mrf.mxu1  ;;  %v8673_v5 = vpop.f32.mrf.mxu0 }
 0x1d6   : > { %v7222_v6 = vpop.f32.mrf.mxu1  ;;  %v7246_v7 = vpop.f32.mrf.mxu0 }
 0x1d8   : > { %v1134_v8 = vpop.f32.mrf.mxu1  ;;  %v1306_v9 = vpop.f32.mrf.mxu0 }
 0x1da   : > { %v7223_v11 = vpop.f32.mrf.mxu1  ;;  %v7247_v12 = vpop.f32.mrf.mxu0 }
 0x1dc   : > { %v8684_v13 = vpop.f32.mrf.mxu1  ;;  %v8686_v49 = vpop.f32.mrf.mxu0 }
 0x1de   : > { %v7228_v15 = vpop.f32.mrf.mxu1  ;;  %v7258_v16 = vpop.f32.mrf.mxu0 }
 0x1e0   : > { %v1177_v17 = vpop.f32.mrf.mxu1  ;;  %v1392_v18 = vpop.f32.mrf.mxu0 }
 0x1e2   : > { %v7229_v19 = vpop.f32.mrf.mxu1  ;;  %v7259_v20 = vpop.f32.mrf.mxu0 }
 0x1e3   : > { %v8186_v19 = vld [vmem:[%s10490_s5 + $0x68] sm:$0xff]  }
 0x1e4   : > { %v8691_v21 = vpop.f32.mrf.mxu1  ;;  %v8693_v22 = vpop.f32.mrf.mxu0  ;;  %v8187_v20 = vld [vmem:[%s10490_s5 + $0x28] sm:$0xff]   ;;  %6850 = vmatprep.subr.bf16.mxu0 %v8186_v19 }
 0x1e5   : > { %6851 = vmatpush3.bf16.msra.mxu0 %v8187_v20 }
 0x1e6   : > { %v7240_v23 = vpop.f32.mrf.mxu1  ;;  %v7270_v24 = vpop.f32.mrf.mxu0 }
 0x1e7   : > { %v8188_v23 = vld [vmem:[%s10490_s5 + $0x60] sm:$0xff]  }
 0x1e8   : > { %v1263_v25 = vpop.f32.mrf.mxu1  ;;  %v1478_v26 = vpop.f32.mrf.mxu0  ;;  %6852 = vmatprep.subr.bf16.mxu0 %v8188_v23  ;;  %v8194_v23 = vld [vmem:[%s10490_s5 + $0x48] sm:$0xff]  }
 0x1e9   : > { %v8189_v26 = vld [vmem:[%s10490_s5 + $0x20] sm:$0xff]  }
 0x1ea   : > { %v7241_v27 = vpop.f32.mrf.mxu1  ;;  %v7271_v28 = vpop.f32.mrf.mxu0  ;;  %6853 = vmatpush3.bf16.msra.mxu0 %v8189_v26 }
 0x1ec   : > { %v8695_v29 = vpop.f32.mrf.mxu1  ;;  %v8697_v51 = vpop.f32.mrf.mxu0 }
 0x1ee   : > { %v7252_v52 = vpop.f32.mrf.mxu1  ;;  %v7282_v53 = vpop.f32.mrf.mxu0 }
 0x1ef   : > { %v8725_v53 = vld [vmem:[%s10489_s4] sm:$0xff] }
 0x1f0   : > { %v1349_v54 = vpop.f32.mrf.mxu1  ;;  %v1564_v48 = vpop.f32.mrf.mxu0 }
 0x1f2   : > { %v7253_v55 = vpop.f32.mrf.mxu1  ;;  %v7283_v59 = vpop.f32.mrf.mxu0 }
 0x1f4   : > { %v8699_v60 = vpop.f32.mrf.mxu1  ;;  %v8701_v61 = vpop.f32.mrf.mxu0 }
 0x1f6   : > { %v7264_v62 = vpop.f32.mrf.mxu1  ;;  %v7294_v63 = vpop.f32.mrf.mxu0 }
 0x1f8   : > { %v1435_v0 = vpop.f32.mrf.mxu1  ;;  %v1650_v1 = vpop.f32.mrf.mxu0 }
 0x1fa   : > { %v7265_v2 = vpop.f32.mrf.mxu1  ;;  %v7295_v3 = vpop.f32.mrf.mxu0 }
 0x1fb   : > { %v8191_v3 = vld [vmem:[%s10490_s5 + $0x18] sm:$0xff]  }
 0x1fc   : > { %v8703_v6 = vpop.f32.mrf.mxu1  ;;  %v1736_v7 = vpop.f32.mrf.mxu0 }
 0x1fd   : > { %v1737_v26 = vadd.f32 %v1736_v7, %v8665_v56  ;;  %v8197_v7 = vld [vmem:[%s10490_s5] sm:$0xff]  }
 0x1fe   : > { %v7276_v8 = vpop.f32.mrf.mxu1  ;;  %v7306_v9 = vpop.f32.mrf.mxu0 }
 0x1ff   : > { %v8192_v8 = vld [vmem:[%s10490_s5 + $0x50] sm:$0xff]  }
 0x200   : > { %v1521_v50 = vpop.f32.mrf.mxu1  ;;  %v1739_v57 = vpop.f32.mrf.mxu0 }
 0x201   : > { %v8193_v57 = vld [vmem:[%s10490_s5 + $0x10] sm:$0xff]  }
 0x202   : > { %v7277_v10 = vpop.f32.mrf.mxu1  ;;  %v7307_v11 = vpop.f32.mrf.mxu0 }
 0x204   : > { %v8705_v12 = vpop.f32.mrf.mxu1  ;;  %v1822_v14 = vpop.f32.mrf.mxu0 }
 0x205   : > { %v1823_v63 = vadd.f32 %v1822_v14, %v8671_v4 }
 0x206   : > { %v7288_v15 = vpop.f32.mrf.mxu1  ;;  %v7318_v16 = vpop.f32.mrf.mxu0 }
 0x207   : > { %v2390_v10 = vadd.f32 %v8725_v53, %v1823_v63 }
 0x208   : > { %v1607_v17 = vpop.f32.mrf.mxu1  ;;  %v1825_v18 = vpop.f32.mrf.mxu0 }
 0x209   : > { %v8749_v19 = vmax.f32 %v2390_v10, 0.0 }
 0x20a   : > { %v7289_v24 = vpop.f32.mrf.mxu1  ;;  %v7319_v25 = vpop.f32.mrf.mxu0 }
 0x20b   : > { %v8195_v25 = vld [vmem:[%s10490_s5 + $0x8] sm:$0xff]  }
 0x20c   : > { %v8719_v27 = vpop.f32.mrf.mxu1  ;;  %v1908_v28 = vpop.f32.mrf.mxu0 }
 0x20d   : > { %v1909_v52 = vadd.f32 %v1908_v28, %v8669_v58  ;;  %v8190_v58 = vld [vmem:[%s10490_s5 + $0x58] sm:$0xff]  }
 0x20e   : > { %v7300_v54 = vpop.f32.mrf.mxu1  ;;  %v7330_v48 = vpop.f32.mrf.mxu0  ;;  %6854 = vmatprep.subr.bf16.mxu0 %v8190_v58 }
 0x20f   : > { %v2392_v55 = vadd.f32 %v8725_v53, %v1909_v52  ;;  %6855 = vmatpush3.bf16.msra.mxu0 %v8191_v3 }
 0x210   : > { %v1693_v59 = vpop.f32.mrf.mxu1  ;;  %v1911_v62 = vpop.f32.mrf.mxu0  ;;  %6856 = vmatprep.subr.bf16.mxu0 %v8192_v8 }
 0x211   : > { %v8729_v0 = vmax.f32 %v2392_v55, 0.0  ;;  %v8196_v55 = vld [vmem:[%s10490_s5 + $0x40] sm:$0xff]   ;;  %v2388_v62 = vadd.f32 %v8725_v53, %v1737_v26 }
 0x212   : > { %v7301_v1 = vpop.f32.mrf.mxu1  ;;  %v7331_v2 = vpop.f32.mrf.mxu0 }
 0x213   : > { %v7710_v9 = vpack.i.bf16 %v8729_v0, %v8246_v30  ;;  %6857 = vmatpush3.bf16.msra.mxu0 %v8193_v57  ;;  %v8778_v8 = vmax.f32 %v2388_v62, 0.0 }
 0x214   : > { %v1779_v4 = vpop.f32.mrf.mxu1  ;;  %v1994_v50 = vpop.f32.mrf.mxu0  ;;  %6858 = vmatprep.subr.bf16.mxu0 %v8194_v23 }
 0x215   : > { %v1780_v11 = vadd.f32 %v1779_v4, %v8667_v47  ;;  %7711 = vrot.lane.b32.xlu1 %v7710_v9, %s8248_s29  ;;  %v1995_v9 = vadd.f32 %v1994_v50, %v8673_v5  ;;  %v7730_v50 = vpack.i.bf16 %v8778_v8, %v8246_v30 }
 0x216   : > { %v7312_v14 = vpop.f32.mrf.mxu1  ;;  %v7342_v15 = vpop.f32.mrf.mxu0 }
 0x217   : > { %v2389_v16 = vadd.f32 %v8725_v53, %v1780_v11  ;;  %6859 = vmatpush3.bf16.msra.mxu0 %v8195_v25 }
 0x218   : > { %v1782_v17 = vpop.f32.mrf.mxu1  ;;  %v1997_v18 = vpop.f32.mrf.mxu0  ;;  %6860 = vmatprep.subr.bf16.mxu0 %v8196_v55 }
 0x219   : > { %v8751_v20 = vmax.f32 %v2389_v16, 0.0  ;;  %v2394_v17 = vadd.f32 %v8725_v53, %v1995_v9 }
 0x21a   : > { %v7313_v47 = vpop.f32.mrf.mxu1  ;;  %v7343_v24 = vpop.f32.mrf.mxu0 }
 0x21b   : > { %v8762_v28 = vpack.i.bf16 %v8749_v19, %v8751_v20  ;;  %6861 = vmatpush3.bf16.msra.mxu0 %v8197_v7  ;;  %v8798_v26 = vmax.f32 %v2394_v17, 0.0 }
 0x21c   : > { %v1865_v52 = vpop.f32.mrf.mxu1  ;;  %v2080_v54 = vpop.f32.mrf.mxu0  ;;  %7458 = vmatprep.subr.bf16.mxu0 %v8246_v30 }
 0x21d   : > { %v1866_v48 = vadd.f32 %v1865_v52, %v8684_v13  ;;  %7716 = vrot.lane.b32.xlu0 %v8762_v28, %s8249_s19  ;;  %v7740_v52 = vpack.i.bf16 %v8778_v8, %v8729_v0  ;;  %v2081_v7 = vadd.f32 %v2080_v54, %v8686_v49 }
 0x21e   : > { %v7324_v59 = vpop.f32.mrf.mxu1  ;;  %v7354_v56 = vpop.f32.mrf.mxu0 }
 0x21f   : > { %v2391_v63 = vadd.f32 %v8725_v53, %v1866_v48 }
 0x220   : > { %v1868_v13 = vpop.f32.mrf.mxu1  ;;  %v2083_v58 = vpop.f32.mrf.mxu0 }
 0x221   : > { %v8775_v1 = vmax.f32 %v2391_v63, 0.0 }
 0x222   : > { %v7325_v2 = vpop.f32.mrf.mxu1  ;;  %v7355_v3 = vpop.f32.mrf.mxu0 }
 0x223   : > { %v7725_v4 = vpack.i.bf16 %v8775_v1, %v8749_v19  ;;  %v7720_v57 = vpack.i.bf16 %v8775_v1, %v8246_v30  ;;  %v7735_v18 = vpack.i.bf16 %v8729_v0, %v8775_v1  ;;  %v7745_v2 = vpack.i.bf16 %v8798_v26, %v8751_v20 }
 0x224   : > { %v1951_v10 = vpop.f32.mrf.mxu1  ;;  %v2166_v11 = vpop.f32.mrf.mxu0 }
 0x225   : > { %v1952_v14 = vadd.f32 %v1951_v10, %v8691_v21  ;;  %7726 = vrot.lane.b32.xlu1 %v7725_v4, %s8248_s29  ;;  %7721 = vrot.lane.b32.xlu0 %v7720_v57, %s8249_s19  ;;  %v2167_v54 = vadd.f32 %v2166_v11, %v8693_v22 }
 0x226   : > { %v7336_v15 = vpop.f32.mrf.mxu1  ;;  %v7366_v16 = vpop.f32.mrf.mxu0 }
 0x227   : > { %v2393_v5 = vadd.f32 %v8725_v53, %v1952_v14 }
 0x228   : > { %v1954_v23 = vpop.f32.mrf.mxu1  ;;  %v2169_v47 = vpop.f32.mrf.mxu0 }
 0x229   : > { %v8794_v24 = vmax.f32 %v2393_v5, 0.0  ;;  %7731 = vrot.lane.b32.xlu1 %v7730_v50, %s8250_s25  ;;  %7736 = vrot.lane.b32.xlu0 %v7735_v18, %s8250_s25  ;;  %v2398_v5 = vadd.f32 %v8725_v53, %v2167_v54 }
 0x22a   : > { %v7337_v21 = vpop.f32.mrf.mxu1  ;;  %v7367_v25 = vpop.f32.mrf.mxu0 }
 0x22b   : > { %v7755_v48 = vpack.i.bf16 %v8778_v8, %v8794_v24  ;;  %v2652_v55 = vpack.c.bf16 %v8794_v24, %v8729_v0  ;;  %v7760_v3 = vpack.i.bf16 %v8798_v26, %v8794_v24  ;;  %v8835_v25 = vmax.f32 %v2398_v5, 0.0 }
 0x22c   : > { %v2037_v59 = vpop.f32.mrf.mxu1  ;;  %v2252_v56 = vpop.f32.mrf.mxu0 }
 0x22d   : > { %v2038_v62 = vadd.f32 %v2037_v59, %v8695_v29  ;;  %7741 = vrot.lane.b32.xlu0 %v7740_v52, %s8249_s19  ;;  %7756 = vrot.lane.b32.xlu1 %v7755_v48, %s8248_s29  ;;  %v2396_v29 = vadd.f32 %v8725_v53, %v2081_v7 }
 0x22e   : > { %7402 = vmatprep.mubr.msk.bf16.mxu1 %vm2590_vm5, %v2652_v55  ;;  %v7348_v63 = vpop.f32.mrf.mxu1  ;;  %v7378_v13 = vpop.f32.mrf.mxu0 }
 0x22f   : > { %v2395_v58 = vadd.f32 %v8725_v53, %v2038_v62  ;;  %v8824_v17 = vmax.f32 %v2396_v29, 0.0 }
 0x230   : > { %v2040_v9 = vpop.f32.mrf.mxu1  ;;  %v2255_v49 = vpop.f32.mrf.mxu0 }
 0x231   : > { %v8818_v4 = vmax.f32 %v2395_v58, 0.0  ;;  %7746 = vrot.lane.b32.xlu0 %v7745_v2, %s8248_s29  ;;  %7761 = vrot.lane.b32.xlu1 %v7760_v3, %s8250_s25 }
 0x232   : > { %v7349_v57 = vpop.f32.mrf.mxu1  ;;  %v7379_v10 = vpop.f32.mrf.mxu0 }
 0x233   : > { %v2655_v14 = vpack.c.bf16 %v8818_v4, %v8798_v26  ;;  %v7775_v23 = vpack.i.bf16 %v8824_v17, %v8818_v4 }
 0x234   : > { %v2123_v15 = vpop.f32.mrf.mxu1  ;;  %v2338_v16 = vpop.f32.mrf.mxu0 }
 0x235   : > { %v2124_v50 = vadd.f32 %v2123_v15, %v8699_v60  ;;  %7751 = vrot.lane.b32.xlu0 %v8762_v28, %s8250_s25  ;;  %7766 = vrot.lane.b32.xlu1 %v7760_v3, %s8249_s19  ;;  %v2253_v60 = vadd.f32 %v2252_v56, %v8697_v51  ;;  %v2339_v2 = vadd.f32 %v2338_v16, %v8701_v61 }
 0x236   : > { %7403 = vmatmul.mubr.msk.bf16.vlgmr.msra.gmra.mxu1 %vm2590_vm5, %v2655_v14  ;;  %v7360_v22 = vpop.f32.mrf.mxu1  ;;  %v7390_v11 = vpop.f32.mrf.mxu0 }
 0x237   : > { %v2397_v18 = vadd.f32 %v8725_v53, %v2124_v50  ;;  %v2400_v62 = vadd.f32 %v8725_v53, %v2253_v60  ;;  %v2402_v54 = vadd.f32 %v8725_v53, %v2339_v2 }
 0x238   : > { %v2126_v47 = vpop.f32.mrf.mxu1  ;;  %v2341_v21 = vpop.f32.mrf.mxu0 }
 0x239   : > { %v8838_v52 = vmax.f32 %v2397_v18, 0.0  ;;  %7776 = vrot.lane.b32.xlu1 %v7775_v23, %s8250_s25  ;;  %7771 = vrot.lane.b32.xlu0 %v7775_v23, %s8248_s29  ;;  %v8852_v58 = vmax.f32 %v2400_v62, 0.0  ;;  %v8869_v15 = vmax.f32 %v2402_v54, 0.0 }
 0x23a   : > { %v7361_v28 = vpop.f32.mrf.mxu1  ;;  %v7391_v48 = vpop.f32.mrf.mxu0 }
 0x23b   : > { %v7785_v55 = vpack.i.bf16 %v8835_v25, %v8838_v52  ;;  %v2657_v59 = vpack.c.bf16 %v8838_v52, %v8824_v17 }
 0x23c   : > { %v2209_v7 = vpop.f32.mrf.mxu1 }
 0x23d   : > { %v2210_v63 = vadd.f32 %v2209_v7, %v8703_v6  ;;  %7781 = vrot.lane.b32.xlu0 %v7775_v23, %s8249_s19  ;;  %7786 = vrot.lane.b32.xlu1 %v7785_v55, %s8248_s29 }
 0x23e   : > { %7406 = vmatprep.mubr.msk.bf16.mxu1 %vm2590_vm5, %v2657_v59  ;;  %v7372_v51 = vpop.f32.mrf.mxu1 }
 0x23f   : > { %v2399_v56 = vadd.f32 %v8725_v53, %v2210_v63 }
 0x240   : > { %v2212_v13 = vpop.f32.mrf.mxu1 }
 0x241   : > { %v8855_v3 = vmax.f32 %v2399_v56, 0.0  ;;  %7791 = vrot.lane.b32.xlu0 %v7785_v55, %s8250_s25  ;;  %7796 = vrot.lane.b32.xlu1 %v7785_v55, %s8249_s19 }
 0x242   : > { %v7373_v6 = vpop.f32.mrf.mxu1 }
 0x243   : > { %v7805_v9 = vpack.i.bf16 %v8852_v58, %v8855_v3  ;;  %v2659_v49 = vpack.c.bf16 %v8855_v3, %v8835_v25 }
 0x244   : > { %v2295_v29 = vpop.f32.mrf.mxu1 }
 0x245   : > { %v2296_v57 = vadd.f32 %v2295_v29, %v8705_v12  ;;  %7806 = vrot.lane.b32.xlu1 %v7805_v9, %s8250_s25  ;;  %7801 = vrot.lane.b32.xlu0 %v7805_v9, %s8248_s29 }
 0x246   : > { %7407 = vmatmul.mubr.msk.bf16.gmra.mxu1 %vm2590_vm5, %v2659_v49  ;;  %v7384_v61 = vpop.f32.mrf.mxu1 }
 0x247   : > { %v2401_v10 = vadd.f32 %v8725_v53, %v2296_v57 }
 0x248   : > { %v2298_v14 = vpop.f32.mrf.mxu1 }
 0x249   : > { %v8871_v16 = vmax.f32 %v2401_v10, 0.0  ;;  %7811 = vrot.lane.b32.xlu0 %v7805_v9, %s8249_s19 }
 0x24a   : > { %v7385_v5 = vpop.f32.mrf.mxu1 }
 0x24b   : > { %2505 = vrot.lane.b32.xlu1 %v8871_v16, %s8248_s29  ;;  %v7815_v12 = vpack.i.bf16 %v8869_v15, %v8871_v16  ;;  %v2661_v50 = vpack.c.bf16 %v8871_v16, %v8852_v58 }
 0x24c   : > { %v2381_v22 = vpop.f32.mrf.mxu1 }
 0x24d   : > { %v2382_v11 = vadd.f32 %v2381_v22, %v8719_v27  ;;  %7816 = vrot.lane.b32.xlu0 %v7815_v12, %s8250_s25  ;;  %7410 = vmatprep.mubr.msk.bf16.mxu1 %vm2590_vm5, %v2661_v50 }
 0x24e   : > { %v7396_v18 = vpop.f32.mrf.mxu1 }
 0x24f   : > { %v2403_v23 = vadd.f32 %v8725_v53, %v2382_v11  ;;  %7821 = vrot.lane.b32.xlu1 %v7815_v12, %s8249_s19  ;;  %v8251_v53 = vmov 0.0|0.0  }
 0x250   : > { %v2384_v47 = vpop.f32.mrf.mxu1 }
 0x251   : > { %v8885_v21 = vmax.f32 %v2403_v23, 0.0 }
 0x252   : > { %v7397_v60 = vpop.f32.mrf.mxu1 }
 0x253   : > { %2587 = vrot.lane.b32.xlu1 %v8885_v21, %s8250_s25  ;;  %v7825_v28 = vpack.i.bf16 %v8885_v21, %v8869_v15  ;;  %v2663_v27 = vpack.c.bf16 %v8885_v21, %v8869_v15 }
 0x255   : > { %7826 = vrot.lane.b32.xlu0 %v7825_v28, %s8248_s29  ;;  %7411 = vmatmul.mubr.msk.bf16.gmra.mxu1 %vm2590_vm5, %v2663_v27 }
 0x256   : > { %7414 = vmatprep.mubr.bf16.mxu1 %v8251_v53 }
 0x259   : > { %2576 = vrot.lane.b32.xlu0 %v8885_v21, %s8249_s19 }
 0x25d   : > { %7415 = vmatmul.mubr.bf16.gmra.mxu1 %v8251_v53 }
 0x287   : > { %v7712_v48 = vpop.permute.xlu1 %7711 }
 0x288   : > { %v8905_v6 = vunpack.i.l.bf16 %v7712_v48 }
 0x28f   : > { %v7717_v55 = vpop.permute.xlu0 %7716 }
 0x290   : > { %v7719_v59 = vunpack.i.h.bf16 %v7717_v55  ;;  %v7718_v7 = vunpack.i.l.bf16 %v7717_v55 }
 0x292   : > { %v2594_v9 = vsel %vm2590_vm5, %v8751_v20, %v7719_v59  ;;  %v2593_v49 = vsel %vm2590_vm5, %v8778_v8, %v7718_v7 }
 0x297   : > { %v7727_v62 = vpop.permute.xlu1 %7726  ;;  %v7722_v63 = vpop.permute.xlu0 %7721 }
 0x298   : > { %v8899_v51 = vunpack.i.l.bf16 %v7722_v63  ;;  %v7729_v56 = vunpack.i.h.bf16 %v7727_v62  ;;  %v7728_v13 = vunpack.i.l.bf16 %v7727_v62  ;;  %v7724_v50 = vunpack.i.h.bf16 %v7722_v63 }
 0x299   : > { %v7714_v62 = vunpack.i.h.bf16 %v7712_v48 }
 0x29a   : > { %v8903_v2 = vsel %vm2590_vm5, 0.0, %v8899_v51  ;;  %v2610_v5 = vsel %vm2605_vm6, %v2594_v9, %v7729_v56  ;;  %v2609_v12 = vsel %vm2605_vm6, %v2593_v49, %v7728_v13  ;;  %v2595_v59 = vsel %vm2590_vm5, %v8749_v19, %v7724_v50 }
 0x29b   : > { %v7732_v29 = vpop.permute.xlu1 %7731  ;;  %v7737_v54 = vpop.permute.xlu0 %7736  ;;  %v8918_v20 = vsel %vm2605_vm6, %v8903_v2, %v8905_v6 }
 0x29c   : > { %v7734_v57 = vunpack.i.h.bf16 %v7732_v29  ;;  %v8911_v61 = vunpack.i.l.bf16 %v7732_v29  ;;  %v7739_v10 = vunpack.i.h.bf16 %v7737_v54  ;;  %v7738_v14 = vunpack.i.l.bf16 %v7737_v54 }
 0x29e   : > { %v8923_v8 = vsel %vm2621_vm7, %v8918_v20, %v8911_v61  ;;  %v2623_v22 = vsel %vm2621_vm7, %v8918_v20, %v7734_v57  ;;  %v2626_v11 = vsel %vm2621_vm7, %v2609_v12, %v7738_v14  ;;  %v2627_v18 = vsel %vm2621_vm7, %v2610_v5, %v7739_v10 }
 0x29f   : > { %v2650_v23 = vpack.c.bf16 %v2623_v22, %v8923_v8  ;;  %v7742_v47 = vpop.permute.xlu0 %7741  ;;  %v7757_v60 = vpop.permute.xlu1 %7756  ;;  %v8930_v28 = vpack.c.bf16 %v2627_v18, %v2626_v11  ;;  %v2611_v10 = vsel %vm2605_vm6, %v2595_v59, %v7714_v62 }
 0x2a0   : > { %v7743_v27 = vunpack.i.l.bf16 %v7742_v47  ;;  %v7758_v55 = vunpack.i.l.bf16 %v7757_v60  ;;  %v7744_v13 = vunpack.i.h.bf16 %v7742_v47  ;;  %v7759_v29 = vunpack.i.h.bf16 %v7757_v60 }
 0x2a1   : > { %2871 = vmatprep.mubr.bf16.mxu0 %v8930_v28 }
 0x2a2   : > { %v2596_v7 = vsel %vm2590_vm5, %v8775_v1, %v7743_v27  ;;  %2872 = vmatmul.mubr.bf16.vlgmr.msra.gmra.mxu0 %v2650_v23  ;;  %v2592_v48 = vsel %vm2590_vm5, 0.0, %v7744_v13  ;;  %v2607_v18 = vsel %vm2605_vm6, %v8903_v2, %v7759_v29 }
 0x2a3   : > { %v7747_v63 = vpop.permute.xlu0 %7746  ;;  %v7762_v56 = vpop.permute.xlu1 %7761  ;;  %v2612_v54 = vsel %vm2605_vm6, %v2596_v7, %v7758_v55 }
 0x2a4   : > { %v7764_v9 = vunpack.i.h.bf16 %v7762_v56  ;;  %v7763_v49 = vunpack.i.l.bf16 %v7762_v56  ;;  %v7748_v57 = vunpack.i.l.bf16 %v7747_v63  ;;  %v7749_v59 = vunpack.i.h.bf16 %v7747_v63 }
 0x2a6   : > { %v2628_v14 = vsel %vm2621_vm7, %v2611_v10, %v7763_v49  ;;  %v2629_v19 = vsel %vm2621_vm7, %v2612_v54, %v7764_v9  ;;  %v2608_v23 = vsel %vm2605_vm6, %v2592_v48, %v7748_v57 }
 0x2a7   : > { %v7752_v5 = vpop.permute.xlu0 %7751  ;;  %v7767_v12 = vpop.permute.xlu1 %7766  ;;  %v8941_v1 = vpack.c.bf16 %v2629_v19, %v2628_v14 }
 0x2a8   : > { %v7754_v50 = vunpack.i.h.bf16 %v7752_v5  ;;  %v7753_v22 = vunpack.i.l.bf16 %v7752_v5  ;;  %v7768_v11 = vunpack.i.l.bf16 %v7767_v12  ;;  %v7769_v47 = vunpack.i.h.bf16 %v7767_v12 }
 0x2a9   : > { %2879 = vmatprep.mubr.bf16.mxu0 %v8941_v1 }
 0x2aa   : > { %v2597_v60 = vsel %vm2590_vm5, %v8729_v0, %v7768_v11  ;;  %v2624_v27 = vsel %vm2621_vm7, %v2607_v18, %v7753_v22  ;;  %v2625_v55 = vsel %vm2621_vm7, %v2608_v23, %v7754_v50  ;;  %v2598_v29 = vsel %vm2590_vm5, %v8794_v24, %v7769_v47 }
 0x2ab   : > { %v7777_v7 = vpop.permute.xlu1 %7776  ;;  %v7772_v62 = vpop.permute.xlu0 %7771  ;;  %v2653_v56 = vpack.c.bf16 %v2625_v55, %v2624_v27  ;;  %v2613_v54 = vsel %vm2605_vm6, %v2597_v60, %v7749_v59 }
 0x2ac   : > { %v7779_v13 = vunpack.i.h.bf16 %v7777_v7  ;;  %v7778_v9 = vunpack.i.l.bf16 %v7777_v7  ;;  %v7773_v49 = vunpack.i.l.bf16 %v7772_v62  ;;  %v7774_v22 = vunpack.i.h.bf16 %v7772_v62 }
 0x2ad   : > { %2880 = vmatmul.mubr.bf16.gmra.mxu0 %v2653_v56 }
 0x2ae   : > { %v2614_v57 = vsel %vm2605_vm6, %v2598_v29, %v7773_v49  ;;  %v2630_v0 = vsel %vm2621_vm7, %v2613_v54, %v7778_v9 }
 0x2af   : > { %v7782_v10 = vpop.permute.xlu0 %7781  ;;  %v7787_v14 = vpop.permute.xlu1 %7786  ;;  %v2631_v63 = vsel %vm2621_vm7, %v2614_v57, %v7779_v13 }
 0x2b0   : > { %v7784_v19 = vunpack.i.h.bf16 %v7782_v10  ;;  %v7783_v5 = vunpack.i.l.bf16 %v7782_v10  ;;  %v7788_v12 = vunpack.i.l.bf16 %v7787_v14  ;;  %v2656_v48 = vpack.c.bf16 %v2631_v63, %v2630_v0 }
 0x2b1   : > { %v7789_v62 = vunpack.i.h.bf16 %v7787_v14 }
 0x2b2   : > { %v2600_v50 = vsel %vm2590_vm5, %v8818_v4, %v7784_v19  ;;  %v2599_v24 = vsel %vm2590_vm5, %v8798_v26, %v7783_v5  ;;  %2887 = vmatprep.mubr.bf16.mxu0 %v2656_v48 }
 0x2b3   : > { %v7792_v11 = vpop.permute.xlu0 %7791  ;;  %v7797_v18 = vpop.permute.xlu1 %7796  ;;  %v2616_v27 = vsel %vm2605_vm6, %v2600_v50, %v7788_v12  ;;  %v2615_v59 = vsel %vm2605_vm6, %v2599_v24, %v7774_v22 }
 0x2b4   : > { %v7794_v23 = vunpack.i.h.bf16 %v7792_v11  ;;  %v7793_v47 = vunpack.i.l.bf16 %v7792_v11  ;;  %v7798_v60 = vunpack.i.l.bf16 %v7797_v18  ;;  %v7799_v55 = vunpack.i.h.bf16 %v7797_v18 }
 0x2b5   : > { %2888 = vmatmul.mubr.bf16.gmra.mxu0 %v8930_v28 }
 0x2b6   : > { %v2601_v4 = vsel %vm2590_vm5, %v8824_v17, %v7798_v60  ;;  %v2632_v7 = vsel %vm2621_vm7, %v2615_v59, %v7793_v47  ;;  %v2633_v26 = vsel %vm2621_vm7, %v2616_v27, %v7794_v23  ;;  %v2602_v57 = vsel %vm2590_vm5, %v8838_v52, %v7799_v55 }
 0x2b7   : > { %v7807_v56 = vpop.permute.xlu1 %7806  ;;  %v7802_v13 = vpop.permute.xlu0 %7801  ;;  %v2658_v9 = vpack.c.bf16 %v2633_v26, %v2632_v7  ;;  %v2617_v28 = vsel %vm2605_vm6, %v2601_v4, %v7789_v62 }
 0x2b8   : > { %v7809_v49 = vunpack.i.h.bf16 %v7807_v56  ;;  %v7808_v29 = vunpack.i.l.bf16 %v7807_v56  ;;  %v7803_v54 = vunpack.i.l.bf16 %v7802_v13  ;;  %v7804_v24 = vunpack.i.h.bf16 %v7802_v13 }
 0x2b9   : > { %2895 = vmatprep.mubr.bf16.mxu0 %v2658_v9 }
 0x2ba   : > { %v2618_v0 = vsel %vm2605_vm6, %v2602_v57, %v7803_v54  ;;  %v2634_v17 = vsel %vm2621_vm7, %v2617_v28, %v7808_v29 }
 0x2bb   : > { %v7812_v10 = vpop.permute.xlu0 %7811  ;;  %v2635_v63 = vsel %vm2621_vm7, %v2618_v0, %v7809_v49 }
 0x2bc   : > { %v7814_v14 = vunpack.i.h.bf16 %v7812_v10  ;;  %v7813_v19 = vunpack.i.l.bf16 %v7812_v10  ;;  %v2660_v5 = vpack.c.bf16 %v2635_v63, %v2634_v17  ;;  %v9017_v63 = vld [vmem:[%s10495_s10 + $0x18] sm:$0xff]  }
 0x2bd   : > { %2896 = vmatmul.mubr.bf16.gmra.mxu0 %v8941_v1  ;;  %v2506_v12 = vpop.permute.xlu1 %2505 }
 0x2be   : > { %v2603_v50 = vsel %vm2590_vm5, %v8835_v25, %v7813_v19  ;;  %v2604_v52 = vsel %vm2590_vm5, %v8855_v3, %v7814_v14  ;;  %2903 = vmatprep.mubr.bf16.mxu0 %v2660_v5 }
 0x2bf   : > { %v7817_v22 = vpop.permute.xlu0 %7816  ;;  %v2620_v23 = vsel %vm2605_vm6, %v2604_v52, %v2506_v12  ;;  %v2619_v47 = vsel %vm2605_vm6, %v2603_v50, %v7804_v24  ;;  %v9023_v12 = vld [vmem:[%s10491_s6] ss:$0 sm:$0xff] }
 0x2c0   : > { %v7819_v11 = vunpack.i.h.bf16 %v7817_v22  ;;  %v7818_v18 = vunpack.i.l.bf16 %v7817_v22 }
 0x2c1   : > { %v7822_v60 = vpop.permute.xlu1 %7821 }
 0x2c2   : > { %v2636_v27 = vsel %vm2621_vm7, %v2619_v47, %v7818_v18  ;;  %v2637_v1 = vsel %vm2621_vm7, %v2620_v23, %v7819_v11  ;;  %v7824_v59 = vunpack.i.h.bf16 %v7822_v60  ;;  %v7823_v25 = vunpack.i.l.bf16 %v7822_v60  ;;  %v9029_v11 = vld [vmem:[%s10493_s8] ss:$0 sm:$0xff] }
 0x2c3   : > { %v2662_v55 = vpack.c.bf16 %v2637_v1, %v2636_v27  ;;  %v703_v47 = vadd.f32 %v9029_v11, %v8417_v32  ;;  %v576_v32 = vld [vmem:[%s9037_s30 + $0x8] sm:$0xff] }
 0x2c4   : > { %v2639_v26 = vsel %vm2590_vm5, %v8871_v16, %v7824_v59  ;;  %v2638_v62 = vsel %vm2590_vm5, %v8852_v58, %v7823_v25  ;;  %v2641_v58 = vsel %vm2590_vm5, %v8885_v21, %v8899_v51  ;;  %v8198_v21 = vld [vmem:[%s10495_s10 + $0x8] sm:$0xff]   ;;  %v575_v25 = vld [vmem:[%s9037_s30] sm:$0xff] }
 0x2c5   : > { %2904 = vmatmul.mubr.bf16.gmra.mxu0 %v2656_v48  ;;  %v2588_v56 = vpop.permute.xlu1 %2587  ;;  %v2645_v17 = vsel %vm2605_vm6, %v2641_v58, %v8905_v6  ;;  %7418 = vmatprep.subr.bf16.mxu1 %v8198_v21 }
 0x2c6   : > { %2911 = vmatprep.mubr.bf16.mxu0 %v2662_v55  ;;  %v2649_v10 = vsel %vm2621_vm7, %v2645_v17, %v8911_v61  ;;  %7419 = vmatpush3.bf16.msra.mxu1 %v8198_v21 }
 0x2c7   : > { %v7827_v3 = vpop.permute.xlu0 %7826 }
 0x2c8   : > { %v7829_v4 = vunpack.i.h.bf16 %v7827_v3  ;;  %v7828_v7 = vunpack.i.l.bf16 %v7827_v3  ;;  %v706_v3 = vadd.f32 %v9029_v11, %v8421_v34 }
 0x2ca   : > { %v2643_v13 = vsel %vm2605_vm6, %v2639_v26, %v7829_v4  ;;  %v2642_v49 = vsel %vm2605_vm6, %v2638_v62, %v7828_v7 }
 0x2cb   : > { %v2577_v29 = vpop.permute.xlu0 %2576  ;;  %v2646_v54 = vsel %vm2621_vm7, %v2642_v49, %v2588_v56  ;;  %v2647_v48 = vsel %vm2621_vm7, %v2643_v13, %v8911_v61 }
 0x2cc   : > { %v2640_v57 = vsel %vm2590_vm5, %v8869_v15, %v2577_v29  ;;  %v2664_v28 = vpack.c.bf16 %v2647_v48, %v2646_v54 }
 0x2cd   : > { %2912 = vmatmul.mubr.bf16.gmra.mxu0 %v2658_v9  ;;  %v2644_v16 = vsel %vm2605_vm6, %v2640_v57, %v8905_v6  ;;  %v8199_v9 = vld [vmem:[%s10495_s10] sm:$0xff]  }
 0x2ce   : > { %2919 = vmatprep.mubr.bf16.mxu0 %v2664_v28  ;;  %v2648_v0 = vsel %vm2621_vm7, %v2644_v16, %v8911_v61  ;;  %7420 = vmatprep.subr.bf16.mxu1 %v8199_v9  ;;  %v711_v16 = vadd.f32 %v8415_v31, %v9029_v11  ;;  %v714_v31 = vadd.f32 %v8419_v33, %v9029_v11 }
 0x2cf   : > { %v2666_v15 = vpack.c.bf16 %v2649_v10, %v2648_v0  ;;  %7421 = vmatpush3.bf16.msra.mxu1 %v8199_v9 }
 0x2d0   : > { %7438 = vmatprep.subr.bf16.mxu1 %v9017_v63 }
 0x2d5   : > { %2920 = vmatmul.mubr.bf16.gmra.mxu0 %v2660_v5 }
 0x2d6   : > { %2927 = vmatprep.mubr.bf16.mxu0 %v2666_v15 }
 0x2dd   : > { %2928 = vmatmul.mubr.bf16.gmra.mxu0 %v2662_v55 }
 0x2de   : > { %7460 = vmatprep.mubr.msk.bf16.mxu0 %vm8247_vm2, %v8246_v30 }
 0x2f6   : > { %v7404_v14 = vpop.f32.mrf.mxu1 }
 0x2f8   : > { %v2970_v5 = vpop.f32.mrf.mxu1 }
 0x2fa   : > { %v7405_v18 = vpop.f32.mrf.mxu1 }
 0x2fc   : > { %v2973_v59 = vpop.f32.mrf.mxu1 }
 0x306   : > { %v7408_v48 = vpop.f32.mrf.mxu1 }
 0x308   : > { %v2986_v9 = vpop.f32.mrf.mxu1 }
 0x362   : > { %v6862_v19 = vpop.f32.mrf.mxu0 }
 0x364   : > { %v6863_v50 = vpop.f32.mrf.mxu0 }
 0x365   : > { %v6864_v52 = vadd.f32 %v6863_v50, %v6862_v19  ;;  %v577_v19 = vld [vmem:[%s9037_s30 + $0x10] sm:$0xff] }
 0x366   : > { %v6865_v24 = vpop.f32.mrf.mxu0 }
 0x367   : > { %v2874_v22 = vadd.f32 %v6864_v52, %v9023_v12  ;;  %v578_v52 = vld [vmem:[%s9037_s30 + $0x18] sm:$0xff] }
 0x368   : > { %v6866_v23 = vpop.f32.mrf.mxu0 }
 0x369   : > { %v2971_v60 = vadd.f32 %v2970_v5, %v2874_v22  ;;  %v6867_v27 = vadd.f32 %v6866_v23, %v6865_v24 }
 0x36b   : > { %v3033_v1 = vadd.f32 %v2971_v60, %v703_v47  ;;  %v2877_v55 = vadd.f32 %v6867_v27, %v9023_v12  ;;  %v7409_v60 = vpop.f32.mrf.mxu1 }
 0x36d   : > { %v2974_v4 = vadd.f32 %v2973_v59, %v2877_v55  ;;  %v6868_v7 = vpop.f32.mrf.mxu0  ;;  %v9044_v26 = vadd.f32 %v3033_v1, %v575_v25  ;;  %v719_v1 = vadd.f32 %v9029_v11, %v8425_v36 }
 0x36f   : > { %v3034_v62 = vadd.f32 %v2974_v4, %v706_v3  ;;  %v6869_v56 = vpop.f32.mrf.mxu0  ;;  %v3065_v57 = vmax.f32 %v9044_v26, 0.0 }
 0x370   : > { %v6870_v13 = vadd.f32 %v6869_v56, %v6868_v7 }
 0x371   : > { %v9046_v49 = vadd.f32 %v3034_v62, %v576_v32  ;;  %v6871_v29 = vpop.f32.mrf.mxu0  ;;  %v2989_v32 = vpop.f32.mrf.mxu1  ;;  %v579_v62 = vld [vmem:[%s9037_s30 + $0x20] sm:$0xff] }
 0x372   : > { %v2882_v54 = vadd.f32 %v6870_v13, %v9023_v12  ;;  %v722_v13 = vadd.f32 %v9029_v11, %v8429_v38 }
 0x373   : > { %v6872_v28 = vpop.f32.mrf.mxu0  ;;  %v3066_v34 = vmax.f32 %v9046_v49, 0.0  ;;  %v7412_v38 = vpop.f32.mrf.mxu1 }
 0x374   : > { %v2979_v58 = vadd.f32 %v7404_v14, %v2882_v54  ;;  %v6873_v0 = vadd.f32 %v6872_v28, %v6871_v29  ;;  %v8201_v28 = vld [vmem:[%s10495_s10 + $0x10] sm:$0xff]  }
 0x375   : > { %v6874_v17 = vpop.f32.mrf.mxu0  ;;  %v9057_v10 = vpack.c.bf16 %v3066_v34, %v3065_v57 }
 0x376   : > { %v3035_v15 = vadd.f32 %v2979_v58, %v711_v16  ;;  %v2885_v21 = vadd.f32 %v6873_v0, %v9023_v12  ;;  %v580_v16 = vld [vmem:[%s9037_s30 + $0x28] sm:$0xff] }
 0x377   : > { %v6875_v5 = vpop.f32.mrf.mxu0  ;;  %7422 = vmatprep.mubr.msk.bf16.mxu1 %vm2590_vm5, %v9057_v10 }
 0x378   : > { %v2982_v14 = vadd.f32 %v7405_v18, %v2885_v21  ;;  %v6876_v50 = vadd.f32 %v6875_v5, %v6874_v17  ;;  %v9066_v22 = vadd.f32 %v3035_v15, %v577_v19 }
 0x379   : > { %v6877_v24 = vpop.f32.mrf.mxu0 }
 0x37a   : > { %v3036_v23 = vadd.f32 %v2982_v14, %v714_v31  ;;  %v2890_v47 = vadd.f32 %v6876_v50, %v9023_v12  ;;  %v3067_v25 = vmax.f32 %v9066_v22, 0.0 }
 0x37b   : > { %v6878_v27 = vpop.f32.mrf.mxu0 }
 0x37c   : > { %v9071_v55 = vadd.f32 %v3036_v23, %v578_v52  ;;  %v2987_v59 = vadd.f32 %v2986_v9, %v2890_v47  ;;  %v6879_v33 = vadd.f32 %v6878_v27, %v6877_v24  ;;  %v727_v9 = vadd.f32 %v8423_v35, %v9029_v11  ;;  %v3002_v47 = vpop.f32.mrf.mxu1  ;;  %v581_v27 = vld [vmem:[%s9037_s30 + $0x30] sm:$0xff] }
 0x37d   : > { %v6880_v18 = vpop.f32.mrf.mxu0  ;;  %v730_v35 = vadd.f32 %v8427_v37, %v9029_v11 }
 0x37e   : > { %v3068_v3 = vmax.f32 %v9071_v55, 0.0  ;;  %v3037_v4 = vadd.f32 %v2987_v59, %v719_v1  ;;  %v2893_v7 = vadd.f32 %v6879_v33, %v9023_v12  ;;  %v582_v33 = vld [vmem:[%s9037_s30 + $0x38] sm:$0xff]  ;;  %v7413_v37 = vpop.f32.mrf.mxu1  ;;  %v8237_v55 = vld [vmem:[%s10499_s14] sm:$0xff]  }
 0x37f   : > { %v6881_v56 = vpop.f32.mrf.mxu0 }
 0x380   : > { %v9083_v36 = vpack.c.bf16 %v3068_v3, %v3067_v25  ;;  %v2990_v29 = vadd.f32 %v2989_v32, %v2893_v7  ;;  %v6882_v54 = vadd.f32 %v6881_v56, %v6880_v18  ;;  %v9089_v0 = vadd.f32 %v3037_v4, %v579_v62 }
 0x381   : > { %v6883_v58 = vpop.f32.mrf.mxu0  ;;  %v735_v62 = vadd.f32 %v9029_v11, %v8433_v40 }
 0x382   : > { %v3038_v17 = vadd.f32 %v2990_v29, %v722_v13  ;;  %v2898_v15 = vadd.f32 %v6882_v54, %v9023_v12  ;;  %7423 = vmatmul.mubr.msk.bf16.vlgmr.msra.gmra.mxu1 %vm2590_vm5, %v9083_v36  ;;  %v3069_v50 = vmax.f32 %v9089_v0, 0.0 }
 0x383   : > { %v6884_v21 = vpop.f32.mrf.mxu0  ;;  %7439 = vmatpush3.bf16.msra.mxu1 %v9017_v63 }
 0x384   : > { %v9097_v19 = vadd.f32 %v3038_v17, %v580_v16  ;;  %v2995_v5 = vadd.f32 %v7408_v48, %v2898_v15  ;;  %v6885_v31 = vadd.f32 %v6884_v21, %v6883_v58  ;;  %7440 = vmatprep.subr.bf16.mxu1 %v8201_v28  ;;  %v3005_v15 = vpop.f32.mrf.mxu1  ;;  %v583_v21 = vld [vmem:[%s9037_s30 + $0x40] sm:$0xff] }
 0x385   : > { %v6886_v14 = vpop.f32.mrf.mxu0 }
 0x386   : > { %v3039_v52 = vadd.f32 %v2995_v5, %v727_v9  ;;  %v2901_v24 = vadd.f32 %v6885_v31, %v9023_v12  ;;  %v10512_v23 = vmax.f32 %v9097_v19, 0.0  ;;  %v738_v5 = vadd.f32 %v9029_v11, %v8437_v42 }
 0x387   : > { %v6887_v63 = vpop.f32.mrf.mxu0  ;;  %7441 = vmatpush3.bf16.msra.mxu1 %v8201_v28 }
 0x388   : > { %v2998_v1 = vadd.f32 %v7409_v60, %v2901_v24  ;;  %v6888_v48 = vadd.f32 %v6887_v63, %v6886_v14  ;;  %v9109_v59 = vpack.c.bf16 %v10512_v23, %v3069_v50  ;;  %7470 = vmatprep.subr.bf16.mxu1 %v8246_v30  ;;  %v9113_v4 = vadd.f32 %v3039_v52, %v581_v27  ;;  %v584_v52 = vld [vmem:[%s9037_s30 + $0x48] sm:$0xff] }
 0x389   : > { %v6889_v18 = vpop.f32.mrf.mxu0 }
 0x38a   : > { %v3040_v7 = vadd.f32 %v2998_v1, %v730_v35  ;;  %v2906_v32 = vadd.f32 %v6888_v48, %v9023_v12  ;;  %7426 = vmatprep.mubr.msk.bf16.mxu1 %vm2590_vm5, %v9109_v59  ;;  %v10511_v28 = vmax.f32 %v9113_v4, 0.0  ;;  %v743_v1 = vadd.f32 %v8431_v39, %v9029_v11 }
 0x38b   : > { %v6890_v60 = vpop.f32.mrf.mxu0 }
 0x38c   : > { %v9120_v56 = vadd.f32 %v3040_v7, %v582_v33  ;;  %v3003_v13 = vadd.f32 %v3002_v47, %v2906_v32  ;;  %v6891_v29 = vadd.f32 %v6890_v60, %v6889_v18  ;;  %v7416_v47 = vpop.f32.mrf.mxu1 }
 0x38d   : > { %v6892_v54 = vpop.f32.mrf.mxu0 }
 0x38e   : > { %v3041_v16 = vadd.f32 %v3003_v13, %v735_v62  ;;  %v2909_v58 = vadd.f32 %v6891_v29, %v9023_v12  ;;  %v10510_v17 = vmax.f32 %v9120_v56, 0.0  ;;  %v3018_v32 = vpop.f32.mrf.mxu1 }
 0x38f   : > { %v6893_v9 = vpop.f32.mrf.mxu0 }
 0x390   : > { %v3006_v40 = vadd.f32 %v3005_v15, %v2909_v58  ;;  %v6894_v31 = vadd.f32 %v6893_v9, %v6892_v54  ;;  %v9132_v14 = vpack.c.bf16 %v10510_v17, %v10511_v28  ;;  %v9135_v27 = vadd.f32 %v3041_v16, %v583_v21  ;;  %v585_v54 = vld [vmem:[%s9037_s30 + $0x50] sm:$0xff]  ;;  %v586_v21 = vld [vmem:[%s9037_s30 + $0x58] sm:$0xff] }
 0x391   : > { %v6895_v24 = vpop.f32.mrf.mxu0  ;;  %v746_v58 = vadd.f32 %v8435_v41, %v9029_v11  ;;  %v751_v41 = vadd.f32 %v9029_v11, %v8441_v44 }
 0x392   : > { %v3042_v63 = vadd.f32 %v3006_v40, %v738_v5  ;;  %v2914_v35 = vadd.f32 %v6894_v31, %v9023_v12  ;;  %7427 = vmatmul.mubr.msk.bf16.gmra.mxu1 %vm2590_vm5, %v9132_v14  ;;  %v10509_v60 = vmax.f32 %v9135_v27, 0.0  ;;  %v7417_v5 = vpop.f32.mrf.mxu1 }
 0x393   : > { %v6896_v42 = vpop.f32.mrf.mxu0 }
 0x394   : > { %v9142_v48 = vadd.f32 %v3042_v63, %v584_v52  ;;  %v3011_v33 = vadd.f32 %v7412_v38, %v2914_v35  ;;  %v6897_v18 = vadd.f32 %v6896_v42, %v6895_v24 }
 0x395   : > { %v6898_v7 = vpop.f32.mrf.mxu0 }
 0x396   : > { %v3043_v62 = vadd.f32 %v3011_v33, %v743_v1  ;;  %v2917_v13 = vadd.f32 %v6897_v18, %v9023_v12  ;;  %v10508_v29 = vmax.f32 %v9142_v48, 0.0  ;;  %v3021_v1 = vpop.f32.mrf.mxu1 }
 0x397   : > { %v6899_v16 = vpop.f32.mrf.mxu0 }
 0x398   : > { %v3014_v39 = vadd.f32 %v7413_v37, %v2917_v13  ;;  %v6900_v15 = vadd.f32 %v6899_v16, %v6898_v7  ;;  %v3085_v38 = vpack.c.bf16 %v10508_v29, %v10509_v60  ;;  %v9155_v40 = vadd.f32 %v3043_v62, %v585_v54  ;;  %v587_v13 = vld [vmem:[%s9037_s30 + $0x60] sm:$0xff] }
 0x399   : > { %v6901_v9 = vpop.f32.mrf.mxu0  ;;  %v754_v16 = vadd.f32 %v9029_v11, %v8445_v46  ;;  %v759_v46 = vadd.f32 %v8439_v43, %v9029_v11 }
 0x39a   : > { %v3044_v31 = vadd.f32 %v3014_v39, %v746_v58  ;;  %7430 = vmatprep.mubr.msk.bf16.mxu1 %vm2590_vm5, %v3085_v38  ;;  %v2922_v52 = vadd.f32 %v6900_v15, %v9023_v12  ;;  %v10507_v33 = vmax.f32 %v9155_v40, 0.0  ;;  %v588_v39 = vld [vmem:[%s9037_s30 + $0x68] sm:$0xff] }
 0x39b   : > { %v6902_v24 = vpop.f32.mrf.mxu0 }
 0x39c   : > { %v9161_v37 = vadd.f32 %v3044_v31, %v586_v21  ;;  %v6903_v63 = vadd.f32 %v6902_v24, %v6901_v9  ;;  %v3019_v35 = vadd.f32 %v3018_v32, %v2922_v52 }
 0x39d   : > { %v6904_v42 = vpop.f32.mrf.mxu0 }
 0x39e   : > { %v3045_v18 = vadd.f32 %v3019_v35, %v751_v41  ;;  %v2925_v7 = vadd.f32 %v6903_v63, %v9023_v12  ;;  %v10506_v62 = vmax.f32 %v9161_v37, 0.0 }
 0x39f   : > { %v6905_v54 = vpop.f32.mrf.mxu0 }
 0x3a0   : > { %v6906_v44 = vadd.f32 %v6905_v54, %v6904_v42  ;;  %v3022_v58 = vadd.f32 %v3021_v1, %v2925_v7  ;;  %v3086_v32 = vpack.c.bf16 %v10506_v62, %v10507_v33  ;;  %v9174_v21 = vadd.f32 %v3045_v18, %v587_v13  ;;  %v589_v7 = vld [vmem:[%s9037_s30 + $0x70] sm:$0xff] }
 0x3a1   : > { %v6907_v15 = vpop.f32.mrf.mxu0  ;;  %v762_v13 = vadd.f32 %v8443_v45, %v9029_v11 }
 0x3a2   : > { %v2930_v9 = vadd.f32 %v6906_v44, %v9023_v12  ;;  %v3046_v31 = vadd.f32 %v3022_v58, %v754_v16  ;;  %7431 = vmatmul.mubr.msk.bf16.gmra.mxu1 %vm2590_vm5, %v3086_v32  ;;  %v10505_v35 = vmax.f32 %v9174_v21, 0.0 }
 0x3a3   : > { %v6908_v52 = vpop.f32.mrf.mxu0 }
 0x3a4   : > { %v3027_v24 = vadd.f32 %v7416_v47, %v2930_v9  ;;  %v9180_v41 = vadd.f32 %v3046_v31, %v588_v39  ;;  %v6909_v63 = vadd.f32 %v6908_v52, %v6907_v15  ;;  %v590_v47 = vld [vmem:[%s9037_s30 + $0x78] sm:$0xff] }
 0x3a6   : > { %v3047_v42 = vadd.f32 %v3027_v24, %v759_v46  ;;  %v10504_v1 = vmax.f32 %v9180_v41, 0.0  ;;  %v2933_v18 = vadd.f32 %v6909_v63, %v9023_v12 }
 0x3a8   : > { %v3030_v54 = vadd.f32 %v7417_v5, %v2933_v18  ;;  %v3087_v43 = vpack.c.bf16 %v10504_v1, %v10505_v35  ;;  %v9193_v16 = vadd.f32 %v3047_v42, %v589_v7 }
 0x3aa   : > { %v3048_v44 = vadd.f32 %v3030_v54, %v762_v13  ;;  %7434 = vmatprep.mubr.msk.bf16.mxu1 %vm2590_vm5, %v3087_v43  ;;  %v10503_v12 = vmax.f32 %v9193_v16, 0.0 }
 0x3ac   : > { %v9196_v58 = vadd.f32 %v3048_v44, %v590_v47  ;;  %v9255_v44 = vld [vmem:[%s10494_s9 + $0x4] sm:$0xf] }
 0x3ae   : > { %v10502_v39 = vmax.f32 %v9196_v58, 0.0 }
 0x3b0   : > { %v3088_v45 = vpack.c.bf16 %v10502_v39, %v10503_v12 }
 0x3b2   : > { %7435 = vmatmul.mubr.msk.bf16.gmra.mxu1 %vm2590_vm5, %v3088_v45 }
 0x3b3   : > { %7442 = vmatprep.mubr.msk.bf16.mxu1 %vm2590_vm5, %v9057_v10 }
 0x3ba   : > { %7443 = vmatmul.mubr.msk.bf16.vlgmr.msra.gmra.mxu1 %vm2590_vm5, %v9083_v36 }
 0x3bb   : > { %7446 = vmatprep.mubr.msk.bf16.mxu1 %vm2590_vm5, %v9109_v59 }
 0x3c2   : > { %7447 = vmatmul.mubr.msk.bf16.gmra.mxu1 %vm2590_vm5, %v9132_v14 }
 0x3c3   : > { %7450 = vmatprep.mubr.msk.bf16.mxu1 %vm2590_vm5, %v3085_v38 }
 0x3ca   : > { %7451 = vmatmul.mubr.msk.bf16.gmra.mxu1 %vm2590_vm5, %v3086_v32 }
 0x3cb   : > { %7454 = vmatprep.mubr.msk.bf16.mxu1 %vm2590_vm5, %v3087_v43 }
 0x3d2   : > { %7455 = vmatmul.mubr.msk.bf16.gmra.mxu1 %vm2590_vm5, %v3088_v45 }
 0x3d3   : > { %7472 = vmatprep.mubr.msk.bf16.mxu1 %vm8247_vm2, %v8246_v30 }
 0x442   : > { %v9219_v11 = vpop.f32.mrf.mxu1 }
 0x444   : > { %v9221_v10 = vpop.f32.mrf.mxu1 }
 0x446   : > { %v9223_v36 = vpop.f32.mrf.mxu1 }
 0x448   : > { %v9225_v59 = vpop.f32.mrf.mxu1 }
 0x452   : > { %v9227_v14 = vpop.f32.mrf.mxu1 }
 0x454   : > { %v9229_v38 = vpop.f32.mrf.mxu1 }
 0x456   : > { %v9231_v5 = vpop.f32.mrf.mxu1 }
 0x458   : > { %v9233_v32 = vpop.f32.mrf.mxu1 }
 0x462   : > { %v9235_v15 = vpop.f32.mrf.mxu1 }
 0x464   : > { %v9237_v9 = vpop.f32.mrf.mxu1 }
 0x466   : > { %v9239_v31 = vpop.f32.mrf.mxu1 }
 0x468   : > { %v9241_v52 = vpop.f32.mrf.mxu1 }
 0x472   : > { %v9243_v46 = vpop.f32.mrf.mxu1 }
 0x474   : > { %v9245_v24 = vpop.f32.mrf.mxu1 }
 0x476   : > { %v9247_v63 = vpop.f32.mrf.mxu1 }
 0x478   : > { %v9249_v42 = vpop.f32.mrf.mxu1 }
 0x47a   : > { %v7444_v18 = vpop.f32.mrf.mxu1 }
 0x47b   : > { %v3359_v7 = vpack.c.bf16 %v7444_v18, %v7444_v18 }
 0x47c   : > { %v3294_v13 = vpop.f32.mrf.mxu1 }
 0x47d   : > { %v3465_v54 = vsel %vm1007_vm3, %v3359_v7, 0  ;;  %v3357_v43 = vpack.c.bf16 %v3294_v13, %v3294_v13 }
 0x47e   : > { %v7445_v47 = vpop.f32.mrf.mxu1  ;;  %7471 = vmatpush3.bf16.msra.mxu1 %v3465_v54 }
 0x47f   : > { %v3379_v45 = vsel %vm1007_vm3, %v3357_v43, 0  ;;  %7482 = vmatprep.subr.bf16.mxu1 %v8246_v30  ;;  %v3360_v43 = vpack.c.bf16 %v7445_v47, %v7445_v47 }
 0x480   : > { %v3297_v39 = vpop.f32.mrf.mxu1  ;;  %7459 = vmatpush3.bf16.msra.mxu0 %v3379_v45 }
 0x481   : > { %v3358_v12 = vpack.c.bf16 %v3297_v39, %v3297_v39  ;;  %7464 = vmatprep.subr.bf16.mxu0 %v8246_v30  ;;  %7473 = vmatmul.mubr.msk.bf16.vlgmr.msra.gmra.mxu1 %vm1003_vm4, %v9255_v44 }
 0x482   : > { %v7448_v18 = vpop.f32.mrf.mxu1  ;;  %7484 = vmatprep.mubr.msk.bf16.mxu1 %vm8247_vm2, %v8246_v30 }
 0x483   : > { %7461 = vmatmul.mubr.msk.bf16.vlgmr.msra.gmra.mxu0 %vm1003_vm4, %v9255_v44  ;;  %v3422_v7 = vsel %vm1007_vm3, %v3358_v12, 0  ;;  %v3363_v45 = vpack.c.bf16 %v7448_v18, %v7448_v18  ;;  %v3508_v12 = vsel %vm1007_vm3, %v3360_v43, 0 }
 0x484   : > { %v3310_v13 = vpop.f32.mrf.mxu1  ;;  %7465 = vmatpush3.bf16.msra.mxu0 %v3422_v7  ;;  %7466 = vmatprep.mubr.msk.bf16.mxu0 %vm8247_vm2, %v8246_v30 }
 0x485   : > { %v3361_v39 = vpack.c.bf16 %v3310_v13, %v3310_v13  ;;  %7476 = vmatprep.subr.bf16.mxu0 %v8246_v30  ;;  %v3637_v7 = vsel %vm1007_vm3, %v3363_v45, 0 }
 0x486   : > { %v7449_v54 = vpop.f32.mrf.mxu1 }
 0x487   : > { %v3551_v1 = vsel %vm1007_vm3, %v3361_v39, 0 }
 0x488   : > { %v3313_v35 = vpop.f32.mrf.mxu1  ;;  %7483 = vmatpush3.bf16.msra.mxu1 %v3551_v1 }
 0x489   : > { %7494 = vmatprep.subr.bf16.mxu1 %v8246_v30  ;;  %v3362_v1 = vpack.c.bf16 %v3313_v35, %v3313_v35  ;;  %v3364_v35 = vpack.c.bf16 %v7449_v54, %v7449_v54 }
 0x48a   : > { %v7452_v62 = vpop.f32.mrf.mxu1 }
 0x48b   : > { %7467 = vmatmul.mubr.msk.bf16.vlgmr.msra.gmra.mxu0 %vm1003_vm4, %v9255_v44  ;;  %7485 = vmatmul.mubr.msk.bf16.vlgmr.msra.gmra.mxu1 %vm1003_vm4, %v9255_v44  ;;  %v3594_v43 = vsel %vm1007_vm3, %v3362_v1, 0 }
 0x48c   : > { %7477 = vmatpush3.bf16.msra.mxu0 %v3508_v12  ;;  %v3326_v47 = vpop.f32.mrf.mxu1  ;;  %7495 = vmatpush3.bf16.msra.mxu1 %v3637_v7  ;;  %v3367_v12 = vpack.c.bf16 %v7452_v62, %v7452_v62 }
 0x48d   : > { %7478 = vmatprep.mubr.msk.bf16.mxu0 %vm8247_vm2, %v8246_v30  ;;  %7488 = vmatprep.subr.bf16.mxu0 %v8246_v30  ;;  %v3365_v18 = vpack.c.bf16 %v3326_v47, %v3326_v47  ;;  %v3680_v47 = vsel %vm1007_vm3, %v3364_v35, 0 }
 0x48e   : > { %7496 = vmatprep.mubr.msk.bf16.mxu1 %vm8247_vm2, %v8246_v30  ;;  %7506 = vmatprep.subr.bf16.mxu1 %v8246_v30  ;;  %v7453_v13 = vpop.f32.mrf.mxu1  ;;  %v3809_v1 = vsel %vm1007_vm3, %v3367_v12, 0 }
 0x48f   : > { %v3723_v39 = vsel %vm1007_vm3, %v3365_v18, 0 }
 0x490   : > { %v3329_v45 = vpop.f32.mrf.mxu1 }
 0x491   : > { %v3366_v62 = vpack.c.bf16 %v3329_v45, %v3329_v45  ;;  %v3368_v45 = vpack.c.bf16 %v7453_v13, %v7453_v13  ;;  %v3226_v13 = vpack.c.bf16 %v9221_v10, %v9221_v10  ;;  %v3228_v10 = vpack.c.bf16 %v9219_v11, %v9219_v11 }
 0x492   : > { %v7456_v7 = vpop.f32.mrf.mxu1  ;;  %v3227_v11 = vpack.c.bf16 %v9225_v59, %v9225_v59  ;;  %v3229_v59 = vpack.c.bf16 %v9223_v36, %v9223_v36  ;;  %v3231_v36 = vpack.c.bf16 %v9233_v32, %v9233_v32  ;;  %v3233_v32 = vpack.c.bf16 %v9231_v5, %v9231_v5 }
 0x493   : > { %7479 = vmatmul.mubr.msk.bf16.vlgmr.msra.gmra.mxu0 %vm1003_vm4, %v9255_v44  ;;  %7497 = vmatmul.mubr.msk.bf16.vlgmr.msra.gmra.mxu1 %vm1003_vm4, %v9255_v44  ;;  %v3371_v35 = vpack.c.bf16 %v7456_v7, %v7456_v7  ;;  %v3235_v5 = vpack.c.bf16 %v9241_v52, %v9241_v52  ;;  %v3237_v52 = vpack.c.bf16 %v9239_v31, %v9239_v31 }
 0x494   : > { %7489 = vmatpush3.bf16.msra.mxu0 %v3594_v43  ;;  %7507 = vmatpush3.bf16.msra.mxu1 %v3723_v39  ;;  %v3342_v18 = vpop.f32.mrf.mxu1  ;;  %v3766_v43 = vsel %vm1007_vm3, %v3366_v62, 0  ;;  %v4070_v62 = vsel %vm1007_vm3, %v3226_v13, 0  ;;  %v3239_v31 = vpack.c.bf16 %v9249_v42, %v9249_v42  ;;  %v8202_v42 = vld [vmem:[%s10497_s12 + $0x88] sm:$0xff]  }
 0x495   : > { %7490 = vmatprep.mubr.msk.bf16.mxu0 %vm8247_vm2, %v8246_v30  ;;  %7500 = vmatprep.subr.bf16.mxu0 %v8246_v30  ;;  %v3369_v54 = vpack.c.bf16 %v3342_v18, %v3342_v18 }
 0x496   : > { %7508 = vmatprep.mubr.msk.bf16.mxu1 %vm8247_vm2, %v8246_v30  ;;  %7518 = vmatprep.subr.bf16.mxu1 %v8246_v30  ;;  %v7457_v12 = vpop.f32.mrf.mxu1 }
 0x497   : > { %v3895_v39 = vsel %vm1007_vm3, %v3369_v54, 0 }
 0x498   : > { %v3345_v18 = vpop.f32.mrf.mxu1 }
 0x499   : > { %v3370_v7 = vpack.c.bf16 %v3345_v18, %v3345_v18 }
 0x49b   : > { %7491 = vmatmul.mubr.msk.bf16.vlgmr.msra.gmra.mxu0 %vm1003_vm4, %v9255_v44  ;;  %7509 = vmatmul.mubr.msk.bf16.vlgmr.msra.gmra.mxu1 %vm1003_vm4, %v9255_v44  ;;  %v3938_v54 = vsel %vm1007_vm3, %v3370_v7, 0  ;;  %v4285_v7 = vsel %vm1007_vm3, %v3231_v36, 0 }
 0x49c   : > { %7501 = vmatpush3.bf16.msra.mxu0 %v3680_v47  ;;  %7519 = vmatpush3.bf16.msra.mxu1 %v3809_v1  ;;  %v3852_v47 = vsel %vm1007_vm3, %v3368_v45, 0  ;;  %v3981_v1 = vsel %vm1007_vm3, %v3371_v35, 0  ;;  %v4156_v45 = vsel %vm1007_vm3, %v3228_v10, 0 }
 0x49d   : > { %7502 = vmatprep.mubr.msk.bf16.mxu0 %vm8247_vm2, %v8246_v30  ;;  %7512 = vmatprep.subr.bf16.mxu0 %v8246_v30 }
 0x49e   : > { %7520 = vmatprep.mubr.msk.bf16.mxu1 %vm8247_vm2, %v8246_v30  ;;  %7530 = vmatprep.subr.bf16.mxu1 %v8246_v30 }
 0x4a3   : > { %7503 = vmatmul.mubr.msk.bf16.vlgmr.msra.gmra.mxu0 %vm1003_vm4, %v9255_v44  ;;  %7521 = vmatmul.mubr.msk.bf16.vlgmr.msra.gmra.mxu1 %vm1003_vm4, %v9255_v44 }
 0x4a4   : > { %7513 = vmatpush3.bf16.msra.mxu0 %v3766_v43  ;;  %7531 = vmatpush3.bf16.msra.mxu1 %v3895_v39  ;;  %v3372_v39 = vpack.c.bf16 %v7457_v12, %v7457_v12  ;;  %v9351_v43 = vld [vmem:[%s10494_s9] sm:$0xf]  ;;  %v3230_v12 = vpack.c.bf16 %v9229_v38, %v9229_v38  ;;  %v3232_v38 = vpack.c.bf16 %v9227_v14, %v9227_v14 }
 0x4a5   : > { %7514 = vmatprep.mubr.msk.bf16.mxu0 %vm8247_vm2, %v8246_v30  ;;  %7524 = vmatprep.subr.bf16.mxu0 %v8246_v30  ;;  %v3234_v14 = vpack.c.bf16 %v9237_v9, %v9237_v9  ;;  %v3236_v9 = vpack.c.bf16 %v9235_v15, %v9235_v15  ;;  %v3238_v15 = vpack.c.bf16 %v9245_v24, %v9245_v24 }
 0x4a6   : > { %7532 = vmatprep.mubr.msk.bf16.mxu1 %vm8247_vm2, %v8246_v30  ;;  %7542 = vmatprep.subr.bf16.mxu1 %v8246_v30  ;;  %v4024_v35 = vsel %vm1007_vm3, %v3372_v39, 0  ;;  %v4328_v18 = vsel %vm1007_vm3, %v3232_v38, 0  ;;  %v4457_v39 = vsel %vm1007_vm3, %v3235_v5, 0  ;;  %v3240_v24 = vpack.c.bf16 %v9243_v46, %v9243_v46  ;;  %v8205_v5 = vld [vmem:[%s10497_s12 + $0x38] sm:$0xff]  }
 0x4a7   : > { %v4414_v13 = vsel %vm1007_vm3, %v3234_v14, 0  ;;  %v4586_v10 = vsel %vm1007_vm3, %v3238_v15, 0  ;;  %v4629_v46 = vsel %vm1007_vm3, %v3239_v31, 0  ;;  %v8206_v15 = vld [vmem:[%s10497_s12 + $0x70] sm:$0xff]  }
 0x4ab   : > { %7515 = vmatmul.mubr.msk.bf16.vlgmr.msra.gmra.mxu0 %vm1003_vm4, %v9255_v44  ;;  %7533 = vmatmul.mubr.msk.bf16.vlgmr.msra.gmra.mxu1 %vm1003_vm4, %v9255_v44 }
 0x4ac   : > { %7525 = vmatpush3.bf16.msra.mxu0 %v3852_v47  ;;  %7543 = vmatpush3.bf16.msra.mxu1 %v3981_v1  ;;  %v4242_v47 = vsel %vm1007_vm3, %v3230_v12, 0  ;;  %v4113_v1 = vsel %vm1007_vm3, %v3227_v11, 0  ;;  %v3241_v11 = vpack.c.bf16 %v9247_v63, %v9247_v63  ;;  %v8203_v63 = vld [vmem:[%s10497_s12 + $0x80] sm:$0xff]  }
 0x4ad   : > { %7526 = vmatprep.mubr.msk.bf16.mxu0 %vm8247_vm2, %v8246_v30  ;;  %7536 = vmatprep.subr.bf16.mxu0 %v8246_v30 }
 0x4ae   : > { %7544 = vmatprep.mubr.msk.bf16.mxu1 %vm8247_vm2, %v8246_v30  ;;  %7554 = vmatprep.subr.bf16.mxu1 %v8246_v30  ;;  %v4715_v12 = vsel %vm1007_vm3, %v3241_v11, 0 }
 0x4b3   : > { %7527 = vmatmul.mubr.msk.bf16.vlgmr.msra.gmra.mxu0 %vm1003_vm4, %v9255_v44  ;;  %7545 = vmatmul.mubr.msk.bf16.vlgmr.msra.gmra.mxu1 %vm1003_vm4, %v9255_v44 }
 0x4b4   : > { %7537 = vmatpush3.bf16.msra.mxu0 %v3938_v54  ;;  %7555 = vmatpush3.bf16.msra.mxu1 %v4070_v62  ;;  %v4371_v62 = vsel %vm1007_vm3, %v3233_v32, 0  ;;  %v4500_v54 = vsel %vm1007_vm3, %v3236_v9, 0 }
 0x4b5   : > { %7538 = vmatprep.mubr.msk.bf16.mxu0 %vm8247_vm2, %v8246_v30  ;;  %7548 = vmatprep.subr.bf16.mxu0 %v8246_v30 }
 0x4b6   : > { %7556 = vmatprep.mubr.msk.bf16.mxu1 %vm8247_vm2, %v8246_v30  ;;  %7566 = vmatprep.subr.bf16.mxu1 %v8246_v30 }
 0x4bb   : > { %7539 = vmatmul.mubr.msk.bf16.vlgmr.msra.gmra.mxu0 %vm1003_vm4, %v9255_v44  ;;  %7557 = vmatmul.mubr.msk.bf16.vlgmr.msra.gmra.mxu1 %vm1003_vm4, %v9351_v43 }
 0x4bc   : > { %7549 = vmatpush3.bf16.msra.mxu0 %v4024_v35  ;;  %7567 = vmatpush3.bf16.msra.mxu1 %v4156_v45  ;;  %v4543_v45 = vsel %vm1007_vm3, %v3237_v52, 0  ;;  %v4672_v35 = vsel %vm1007_vm3, %v3240_v24, 0 }
 0x4bd   : > { %7550 = vmatprep.mubr.msk.bf16.mxu0 %vm8247_vm2, %v8246_v30  ;;  %7560 = vmatprep.subr.bf16.mxu0 %v8246_v30 }
 0x4be   : > { %7568 = vmatprep.mubr.msk.bf16.mxu1 %vm8247_vm2, %v8246_v30  ;;  %7578 = vmatprep.subr.bf16.mxu1 %v8246_v30 }
 0x4c3   : > { %7551 = vmatmul.mubr.msk.bf16.vlgmr.msra.gmra.mxu0 %vm1003_vm4, %v9255_v44  ;;  %7569 = vmatmul.mubr.msk.bf16.vlgmr.msra.gmra.mxu1 %vm1003_vm4, %v9351_v43  ;;  %v4199_v44 = vsel %vm1007_vm3, %v3229_v59, 0 }
 0x4c4   : > { %7561 = vmatpush3.bf16.msra.mxu0 %v4113_v1  ;;  %7579 = vmatpush3.bf16.msra.mxu1 %v4242_v47 }
 0x4c5   : > { %7562 = vmatprep.mubr.msk.bf16.mxu0 %vm8247_vm2, %v8246_v30  ;;  %7572 = vmatprep.subr.bf16.mxu0 %v8246_v30 }
 0x4c6   : > { %7580 = vmatprep.mubr.msk.bf16.mxu1 %vm8247_vm2, %v8246_v30  ;;  %7590 = vmatprep.subr.bf16.mxu1 %v8246_v30 }
 0x4cb   : > { %7563 = vmatmul.mubr.msk.bf16.vlgmr.msra.gmra.mxu0 %vm1003_vm4, %v9351_v43  ;;  %7581 = vmatmul.mubr.msk.bf16.vlgmr.msra.gmra.mxu1 %vm1003_vm4, %v9351_v43 }
 0x4cc   : > { %7573 = vmatpush3.bf16.msra.mxu0 %v4199_v44  ;;  %7591 = vmatpush3.bf16.msra.mxu1 %v4328_v18 }
 0x4cd   : > { %7574 = vmatprep.mubr.msk.bf16.mxu0 %vm8247_vm2, %v8246_v30  ;;  %7584 = vmatprep.subr.bf16.mxu0 %v8246_v30 }
 0x4ce   : > { %7592 = vmatprep.mubr.msk.bf16.mxu1 %vm8247_vm2, %v8246_v30  ;;  %7602 = vmatprep.subr.bf16.mxu1 %v8246_v30 }
 0x4d3   : > { %7575 = vmatmul.mubr.msk.bf16.vlgmr.msra.gmra.mxu0 %vm1003_vm4, %v9351_v43  ;;  %7593 = vmatmul.mubr.msk.bf16.vlgmr.msra.gmra.mxu1 %vm1003_vm4, %v9351_v43 }
 0x4d4   : > { %7585 = vmatpush3.bf16.msra.mxu0 %v4285_v7  ;;  %7603 = vmatpush3.bf16.msra.mxu1 %v4414_v13 }
 0x4d5   : > { %7586 = vmatprep.mubr.msk.bf16.mxu0 %vm8247_vm2, %v8246_v30  ;;  %7596 = vmatprep.subr.bf16.mxu0 %v8246_v30 }
 0x4d6   : > { %7604 = vmatprep.mubr.msk.bf16.mxu1 %vm8247_vm2, %v8246_v30  ;;  %7614 = vmatprep.subr.bf16.mxu1 %v8246_v30 }
 0x4db   : > { %7587 = vmatmul.mubr.msk.bf16.vlgmr.msra.gmra.mxu0 %vm1003_vm4, %v9351_v43  ;;  %7605 = vmatmul.mubr.msk.bf16.vlgmr.msra.gmra.mxu1 %vm1003_vm4, %v9351_v43 }
 0x4dc   : > { %7597 = vmatpush3.bf16.msra.mxu0 %v4371_v62  ;;  %7615 = vmatpush3.bf16.msra.mxu1 %v4500_v54  ;;  %v8204_v54 = vld [vmem:[%s10497_s12 + $0x78] sm:$0xff]  }
 0x4dd   : > { %7598 = vmatprep.mubr.msk.bf16.mxu0 %vm8247_vm2, %v8246_v30  ;;  %7608 = vmatprep.subr.bf16.mxu0 %v8246_v30 }
 0x4de   : > { %7616 = vmatprep.mubr.msk.bf16.mxu1 %vm8247_vm2, %v8246_v30  ;;  %7626 = vmatprep.subr.bf16.mxu1 %v8246_v30 }
 0x4e3   : > { %7599 = vmatmul.mubr.msk.bf16.vlgmr.msra.gmra.mxu0 %vm1003_vm4, %v9351_v43  ;;  %7617 = vmatmul.mubr.msk.bf16.vlgmr.msra.gmra.mxu1 %vm1003_vm4, %v9351_v43 }
 0x4e4   : > { %7609 = vmatpush3.bf16.msra.mxu0 %v4457_v39  ;;  %7627 = vmatpush3.bf16.msra.mxu1 %v4586_v10 }
 0x4e5   : > { %7610 = vmatprep.mubr.msk.bf16.mxu0 %vm8247_vm2, %v8246_v30  ;;  %7620 = vmatprep.subr.bf16.mxu0 %v8246_v30 }
 0x4e6   : > { %7628 = vmatprep.mubr.msk.bf16.mxu1 %vm8247_vm2, %v8246_v30  ;;  %7638 = vmatprep.subr.bf16.mxu1 %v8246_v30 }
 0x4eb   : > { %7611 = vmatmul.mubr.msk.bf16.vlgmr.msra.gmra.mxu0 %vm1003_vm4, %v9351_v43  ;;  %7629 = vmatmul.mubr.msk.bf16.vlgmr.msra.gmra.mxu1 %vm1003_vm4, %v9351_v43 }
 0x4ec   : > { %7621 = vmatpush3.bf16.msra.mxu0 %v4543_v45  ;;  %7639 = vmatpush3.bf16.msra.mxu1 %v4672_v35  ;;  %v8207_v45 = vld [vmem:[%s10497_s12 + $0x30] sm:$0xff]   ;;  %v8208_v35 = vld [vmem:[%s10497_s12 + $0x68] sm:$0xff]  }
 0x4ed   : > { %7622 = vmatprep.mubr.msk.bf16.mxu0 %vm8247_vm2, %v8246_v30  ;;  %7632 = vmatprep.subr.bf16.mxu0 %v8246_v30 }
 0x4ee   : > { %7640 = vmatprep.mubr.msk.bf16.mxu1 %vm8247_vm2, %v8246_v30  ;;  %7004 = vmatprep.subr.bf16.mxu1 %v8204_v54 }
 0x4f3   : > { %7623 = vmatmul.mubr.msk.bf16.vlgmr.msra.gmra.mxu0 %vm1003_vm4, %v9351_v43  ;;  %7641 = vmatmul.mubr.msk.bf16.vlgmr.msra.gmra.mxu1 %vm1003_vm4, %v9351_v43 }
 0x4f4   : > { %7633 = vmatpush3.bf16.msra.mxu0 %v4629_v46  ;;  %7634 = vmatprep.mubr.msk.bf16.mxu0 %vm8247_vm2, %v8246_v30 }
 0x4f5   : > { %7644 = vmatprep.subr.bf16.mxu0 %v8246_v30  ;;  %7005 = vmatpush3.bf16.msra.mxu1 %v8205_v5 }
 0x4f6   : > { %7006 = vmatprep.subr.bf16.mxu1 %v8206_v15 }
 0x4f9   : > { %7007 = vmatpush3.bf16.msra.mxu1 %v8207_v45 }
 0x4fa   : > { %7008 = vmatprep.subr.bf16.mxu1 %v8208_v35 }
 0x4fb   : > { %7635 = vmatmul.mubr.msk.bf16.vlgmr.msra.gmra.mxu0 %vm1003_vm4, %v9351_v43 }
 0x4fc   : > { %7645 = vmatpush3.bf16.msra.mxu0 %v4715_v12  ;;  %7646 = vmatprep.mubr.msk.bf16.mxu0 %vm8247_vm2, %v8246_v30 }
 0x4fd   : > { %7650 = vmatprep.subr.bf16.mxu0 %v8202_v42 }
 0x503   : > { %7647 = vmatmul.mubr.msk.bf16.vlgmr.msra.gmra.mxu0 %vm1003_vm4, %v9351_v43 }
 0x504   : > { %7651 = vmatpush3.bf16.msra.mxu0 %v8202_v42  ;;  %v8209_v42 = vld [vmem:[%s10497_s12 + $0x28] sm:$0xff]  }
 0x505   : > { %7652 = vmatprep.subr.bf16.mxu0 %v8203_v63  ;;  %7009 = vmatpush3.bf16.msra.mxu1 %v8209_v42 }
 0x508   : > { %7653 = vmatpush3.bf16.msra.mxu0 %v8203_v63 }
 0x541   : > { %v9485_v47 = vpop.f32.mrf.mxu1 }
 0x543   : > { %v9487_v1 = vpop.f32.mrf.mxu0  ;;  %v7474_v59 = vpop.f32.mrf.mxu1 }
 0x545   : > { %v7462_v38 = vpop.f32.mrf.mxu0  ;;  %v3504_v44 = vpop.f32.mrf.mxu1 }
 0x547   : > { %v3418_v43 = vpop.f32.mrf.mxu0  ;;  %v7475_v18 = vpop.f32.mrf.mxu1 }
 0x549   : > { %v7463_v36 = vpop.f32.mrf.mxu0 }
 0x54b   : > { %v9489_v14 = vpop.f32.mrf.mxu0  ;;  %v9491_v13 = vpop.f32.mrf.mxu1 }
 0x54d   : > { %v7468_v7 = vpop.f32.mrf.mxu0  ;;  %v7486_v32 = vpop.f32.mrf.mxu1 }
 0x54f   : > { %v3461_v9 = vpop.f32.mrf.mxu0  ;;  %v3590_v62 = vpop.f32.mrf.mxu1 }
 0x551   : > { %v7469_v10 = vpop.f32.mrf.mxu0  ;;  %v7487_v39 = vpop.f32.mrf.mxu1 }
 0x553   : > { %v9502_v52 = vpop.f32.mrf.mxu0  ;;  %v9504_v24 = vpop.f32.mrf.mxu1 }
 0x555   : > { %v7480_v31 = vpop.f32.mrf.mxu0  ;;  %v7498_v46 = vpop.f32.mrf.mxu1 }
 0x557   : > { %v3547_v11 = vpop.f32.mrf.mxu0  ;;  %v3676_v12 = vpop.f32.mrf.mxu1 }
 0x559   : > { %v7481_v63 = vpop.f32.mrf.mxu0  ;;  %v7499_v59 = vpop.f32.mrf.mxu1 }
 0x55b   : > { %v9515_v38 = vpop.f32.mrf.mxu0  ;;  %v9517_v44 = vpop.f32.mrf.mxu1 }
 0x55d   : > { %v7492_v43 = vpop.f32.mrf.mxu0  ;;  %v7510_v18 = vpop.f32.mrf.mxu1 }
 0x55f   : > { %v3633_v36 = vpop.f32.mrf.mxu0  ;;  %v3762_v7 = vpop.f32.mrf.mxu1 }
 0x561   : > { %v7493_v32 = vpop.f32.mrf.mxu0  ;;  %v7511_v9 = vpop.f32.mrf.mxu1 }
 0x563   : > { %v9519_v62 = vpop.f32.mrf.mxu0  ;;  %v9521_v54 = vpop.f32.mrf.mxu1 }
 0x565   : > { %v7504_v5 = vpop.f32.mrf.mxu0  ;;  %v7522_v15 = vpop.f32.mrf.mxu1 }
 0x567   : > { %v3719_v10 = vpop.f32.mrf.mxu0  ;;  %v3848_v39 = vpop.f32.mrf.mxu1 }
 0x569   : > { %v7505_v45 = vpop.f32.mrf.mxu0  ;;  %v7523_v35 = vpop.f32.mrf.mxu1 }
 0x56b   : > { %v9523_v31 = vpop.f32.mrf.mxu0  ;;  %v9525_v46 = vpop.f32.mrf.mxu1 }
 0x56d   : > { %v7516_v11 = vpop.f32.mrf.mxu0  ;;  %v7534_v12 = vpop.f32.mrf.mxu1 }
 0x56f   : > { %v3805_v42 = vpop.f32.mrf.mxu0  ;;  %v3934_v63 = vpop.f32.mrf.mxu1 }
 0x571   : > { %v7517_v59 = vpop.f32.mrf.mxu0  ;;  %v7535_v43 = vpop.f32.mrf.mxu1 }
 0x573   : > { %v9527_v18 = vpop.f32.mrf.mxu0  ;;  %v9529_v36 = vpop.f32.mrf.mxu1 }
 0x575   : > { %v7528_v7 = vpop.f32.mrf.mxu0  ;;  %v7546_v32 = vpop.f32.mrf.mxu1 }
 0x577   : > { %v3891_v9 = vpop.f32.mrf.mxu0  ;;  %v4020_v5 = vpop.f32.mrf.mxu1 }
 0x579   : > { %v7529_v15 = vpop.f32.mrf.mxu0  ;;  %v7547_v10 = vpop.f32.mrf.mxu1 }
 0x57a   : > { %v8210_v15 = vld [vmem:[%s10497_s12 + $0x60] sm:$0xff]  }
 0x57b   : > { %v9531_v39 = vpop.f32.mrf.mxu0  ;;  %v4106_v45 = vpop.f32.mrf.mxu1  ;;  %v9543_v10 = vld [vmem:[%s10496_s11] sm:$0xff]  ;;  %7010 = vmatprep.subr.bf16.mxu1 %v8210_v15 }
 0x57c   : > { %v4107_v9 = vadd.f32 %v4106_v45, %v9487_v1  ;;  %v8213_v1 = vld [vmem:[%s10497_s12 + $0x18] sm:$0xff]  }
 0x57d   : > { %v7540_v35 = vpop.f32.mrf.mxu0  ;;  %v7558_v11 = vpop.f32.mrf.mxu1 }
 0x57e   : > { %v4758_v45 = vadd.f32 %v9543_v10, %v4107_v9 }
 0x57f   : > { %v3977_v12 = vpop.f32.mrf.mxu0  ;;  %v4109_v42 = vpop.f32.mrf.mxu1 }
 0x581   : > { %v7541_v63 = vpop.f32.mrf.mxu0  ;;  %v7559_v59 = vpop.f32.mrf.mxu1 }
 0x583   : > { %v9533_v43 = vpop.f32.mrf.mxu0  ;;  %v4192_v33 = vpop.f32.mrf.mxu1 }
 0x584   : > { %v4193_v5 = vadd.f32 %v4192_v33, %v9485_v47 }
 0x585   : > { %v7552_v29 = vpop.f32.mrf.mxu0  ;;  %v7570_v60 = vpop.f32.mrf.mxu1 }
 0x586   : > { %v8211_v60 = vld [vmem:[%s10497_s12 + $0x20] sm:$0xff]   ;;  %v8212_v29 = vld [vmem:[%s10497_s12 + $0x58] sm:$0xff]   ;;  %v4760_v12 = vadd.f32 %v9543_v10, %v4193_v5 }
 0x587   : > { %v4063_v7 = vpop.f32.mrf.mxu0  ;;  %v4195_v32 = vpop.f32.mrf.mxu1  ;;  %7011 = vmatpush3.bf16.msra.mxu1 %v8211_v60 }
 0x588   : > { %7012 = vmatprep.subr.bf16.mxu1 %v8212_v29 }
 0x589   : > { %v7553_v35 = vpop.f32.mrf.mxu0  ;;  %v7571_v11 = vpop.f32.mrf.mxu1 }
 0x58a   : > { %v9558_v35 = vmax.f32 %v4758_v45, 0.0  ;;  %v9560_v11 = vmax.f32 %v4760_v12, 0.0 }
 0x58b   : > { %v4149_v33 = vpop.f32.mrf.mxu0  ;;  %v4278_v47 = vpop.f32.mrf.mxu1  ;;  %7013 = vmatpush3.bf16.msra.mxu1 %v8213_v1 }
 0x58c   : > { %v4150_v42 = vadd.f32 %v4149_v33, %v9489_v14  ;;  %v4279_v9 = vadd.f32 %v4278_v47, %v9491_v13  ;;  %v8214_v14 = vld [vmem:[%s10497_s12 + $0x50] sm:$0xff]  }
 0x58d   : > { %v7564_v63 = vpop.f32.mrf.mxu0  ;;  %v7582_v59 = vpop.f32.mrf.mxu1  ;;  %v8215_v33 = vld [vmem:[%s10497_s12 + $0x10] sm:$0xff]   ;;  %7014 = vmatprep.subr.bf16.mxu1 %v8214_v14 }
 0x58e   : > { %v4759_v7 = vadd.f32 %v9543_v10, %v4150_v42  ;;  %v4762_v13 = vadd.f32 %v9543_v10, %v4279_v9  ;;  %v8216_v63 = vld [vmem:[%s10497_s12 + $0x48] sm:$0xff]  }
 0x58f   : > { %v4152_v32 = vpop.f32.mrf.mxu0  ;;  %v4281_v15 = vpop.f32.mrf.mxu1  ;;  %7015 = vmatpush3.bf16.msra.mxu1 %v8215_v33 }
 0x590   : > { %v9562_v60 = vmax.f32 %v4759_v7, 0.0  ;;  %v8217_v32 = vld [vmem:[%s10497_s12 + $0x8] sm:$0xff]   ;;  %7016 = vmatprep.subr.bf16.mxu1 %v8216_v63 }
 0x591   : > { %v7565_v5 = vpop.f32.mrf.mxu0  ;;  %v7583_v29 = vpop.f32.mrf.mxu1 }
 0x592   : > { %v7835_v1 = vpack.i.bf16 %v9562_v60, %v9558_v35  ;;  %v7830_v45 = vpack.i.bf16 %v9560_v11, %v9562_v60  ;;  %v8218_v29 = vld [vmem:[%s10497_s12 + $0x40] sm:$0xff]  }
 0x593   : > { %v4235_v12 = vpop.f32.mrf.mxu0  ;;  %v4364_v42 = vpop.f32.mrf.mxu1  ;;  %7017 = vmatpush3.bf16.msra.mxu1 %v8217_v32 }
 0x594   : > { %v4236_v47 = vadd.f32 %v4235_v12, %v9502_v52  ;;  %7836 = vrot.lane.b32.xlu0 %v7835_v1, %s8248_s29  ;;  %7831 = vrot.lane.b32.xlu1 %v7830_v45, %s8249_s19  ;;  %v9586_v52 = vmax.f32 %v4762_v13, 0.0  ;;  %v8219_v45 = vld [vmem:[%s10497_s12] sm:$0xff]   ;;  %v4365_v12 = vadd.f32 %v4364_v42, %v9504_v24 }
 0x595   : > { %v7576_v59 = vpop.f32.mrf.mxu0  ;;  %v7594_v7 = vpop.f32.mrf.mxu1  ;;  %7018 = vmatprep.subr.bf16.mxu1 %v8218_v29 }
 0x596   : > { %v4761_v15 = vadd.f32 %v9543_v10, %v4236_v47  ;;  %v4764_v24 = vadd.f32 %v9543_v10, %v4365_v12 }
 0x597   : > { %v4238_v9 = vpop.f32.mrf.mxu0  ;;  %v4367_v14 = vpop.f32.mrf.mxu1  ;;  %7019 = vmatpush3.bf16.msra.mxu1 %v8219_v45 }
 0x598   : > { %v9588_v5 = vmax.f32 %v4761_v15, 0.0  ;;  %v9609_v45 = vmax.f32 %v4764_v24, 0.0 }
 0x599   : > { %v7577_v33 = vpop.f32.mrf.mxu0  ;;  %v7595_v1 = vpop.f32.mrf.mxu1 }
 0x59a   : > { %v7845_v47 = vpack.i.bf16 %v9586_v52, %v9588_v5  ;;  %v7840_v13 = vpack.i.bf16 %v9588_v5, %v9560_v11 }
 0x59b   : > { %v4321_v63 = vpop.f32.mrf.mxu0  ;;  %v4450_v59 = vpop.f32.mrf.mxu1 }
 0x59c   : > { %v4322_v7 = vadd.f32 %v4321_v63, %v9515_v38  ;;  %7846 = vrot.lane.b32.xlu1 %v7845_v47, %s8250_s25  ;;  %7841 = vrot.lane.b32.xlu0 %v7840_v13, %s8248_s29 }
 0x59d   : > { %v7588_v32 = vpop.f32.mrf.mxu0  ;;  %v7606_v15 = vpop.f32.mrf.mxu1 }
 0x59e   : > { %v4763_v42 = vadd.f32 %v9543_v10, %v4322_v7 }
 0x59f   : > { %v4324_v9 = vpop.f32.mrf.mxu0  ;;  %v4453_v14 = vpop.f32.mrf.mxu1 }
 0x5a0   : > { %v9606_v33 = vmax.f32 %v4763_v42, 0.0  ;;  %7851 = vrot.lane.b32.xlu1 %v7845_v47, %s8249_s19  ;;  %v7870_v42 = vpack.i.bf16 %v9562_v60, %v9609_v45 }
 0x5a1   : > { %v7589_v29 = vpop.f32.mrf.mxu0  ;;  %v7607_v1 = vpop.f32.mrf.mxu1 }
 0x5a2   : > { %v7865_v38 = vpack.i.bf16 %v9606_v33, %v9586_v52  ;;  %v7855_v13 = vpack.i.bf16 %v9606_v33, %v9558_v35  ;;  %v5006_v12 = vpack.c.bf16 %v9606_v33, %v9586_v52  ;;  %v4451_v1 = vadd.f32 %v4450_v59, %v9517_v44 }
 0x5a3   : > { %v4407_v63 = vpop.f32.mrf.mxu0  ;;  %v4536_v7 = vpop.f32.mrf.mxu1 }
 0x5a4   : > { %v4408_v32 = vadd.f32 %v4407_v63, %v9519_v62  ;;  %7866 = vrot.lane.b32.xlu1 %v7865_v38, %s8248_s29  ;;  %7856 = vrot.lane.b32.xlu0 %v7855_v13, %s8250_s25 }
 0x5a5   : > { %7654 = vmatprep.mubr.msk.bf16.mxu0 %vm2590_vm5, %v5006_v12  ;;  %v7600_v47 = vpop.f32.mrf.mxu0  ;;  %v7618_v15 = vpop.f32.mrf.mxu1 }
 0x5a6   : > { %v4765_v24 = vadd.f32 %v9543_v10, %v4408_v32 }
 0x5a7   : > { %v4410_v9 = vpop.f32.mrf.mxu0  ;;  %v4539_v14 = vpop.f32.mrf.mxu1 }
 0x5a8   : > { %v9624_v29 = vmax.f32 %v4765_v24, 0.0  ;;  %7871 = vrot.lane.b32.xlu1 %v7870_v42, %s8250_s25  ;;  %7861 = vrot.lane.b32.xlu0 %v7855_v13, %s8249_s19  ;;  %v4766_v24 = vadd.f32 %v9543_v10, %v4451_v1  ;;  %v4537_v1 = vadd.f32 %v4536_v7, %v9521_v54 }
 0x5a9   : > { %v7601_v62 = vpop.f32.mrf.mxu0  ;;  %v7619_v38 = vpop.f32.mrf.mxu1 }
 0x5aa   : > { %v5009_v12 = vpack.c.bf16 %v9624_v29, %v9609_v45  ;;  %v7880_v63 = vpack.i.bf16 %v9624_v29, %v9609_v45  ;;  %v7875_v32 = vpack.i.bf16 %v9624_v29, %v9560_v11  ;;  %v9641_v62 = vmax.f32 %v4766_v24, 0.0 }
 0x5ab   : > { %v4493_v47 = vpop.f32.mrf.mxu0  ;;  %v4622_v15 = vpop.f32.mrf.mxu1 }
 0x5ac   : > { %v4494_v44 = vadd.f32 %v4493_v47, %v9523_v31  ;;  %7881 = vrot.lane.b32.xlu1 %v7880_v63, %s8249_s19  ;;  %7876 = vrot.lane.b32.xlu0 %v7875_v32, %s8250_s25 }
 0x5ad   : > { %7655 = vmatmul.mubr.msk.bf16.vlgmr.msra.gmra.mxu0 %vm2590_vm5, %v5009_v12  ;;  %v7612_v59 = vpop.f32.mrf.mxu0  ;;  %v7630_v13 = vpop.f32.mrf.mxu1 }
 0x5ae   : > { %v4767_v42 = vadd.f32 %v9543_v10, %v4494_v44  ;;  %v4768_v13 = vadd.f32 %v9543_v10, %v4537_v1 }
 0x5af   : > { %v4496_v9 = vpop.f32.mrf.mxu0  ;;  %v4625_v14 = vpop.f32.mrf.mxu1 }
 0x5b0   : > { %v9643_v38 = vmax.f32 %v4767_v42, 0.0  ;;  %7886 = vrot.lane.b32.xlu0 %v7880_v63, %s8248_s29  ;;  %v4623_v42 = vadd.f32 %v4622_v15, %v9525_v46 }
 0x5b1   : > { %v7613_v31 = vpop.f32.mrf.mxu0  ;;  %v7631_v47 = vpop.f32.mrf.mxu1 }
 0x5b2   : > { %v7895_v32 = vpack.i.bf16 %v9643_v38, %v9641_v62  ;;  %v5011_v12 = vpack.c.bf16 %v9643_v38, %v9641_v62  ;;  %v9658_v31 = vmax.f32 %v4768_v13, 0.0 }
 0x5b3   : > { %v4579_v59 = vpop.f32.mrf.mxu0  ;;  %v4708_v44 = vpop.f32.mrf.mxu1 }
 0x5b4   : > { %v4580_v24 = vadd.f32 %v4579_v59, %v9527_v18  ;;  %7896 = vrot.lane.b32.xlu0 %v7895_v32, %s8249_s19  ;;  %7891 = vrot.lane.b32.xlu1 %v7895_v32, %s8250_s25  ;;  %v4770_v59 = vadd.f32 %v9543_v10, %v4623_v42  ;;  %v4709_v15 = vadd.f32 %v4708_v44, %v9529_v36 }
 0x5b5   : > { %7658 = vmatprep.mubr.msk.bf16.mxu0 %vm2590_vm5, %v5011_v12  ;;  %v7624_v54 = vpop.f32.mrf.mxu0  ;;  %v7642_v7 = vpop.f32.mrf.mxu1 }
 0x5b6   : > { %v4769_v63 = vadd.f32 %v9543_v10, %v4580_v24  ;;  %v9673_v13 = vmax.f32 %v4770_v59, 0.0 }
 0x5b7   : > { %v4582_v9 = vpop.f32.mrf.mxu0  ;;  %v4711_v14 = vpop.f32.mrf.mxu1 }
 0x5b8   : > { %v9660_v47 = vmax.f32 %v4769_v63, 0.0  ;;  %7901 = vrot.lane.b32.xlu1 %v7895_v32, %s8248_s29  ;;  %v4772_v9 = vadd.f32 %v9543_v10, %v4709_v15 }
 0x5b9   : > { %v7625_v18 = vpop.f32.mrf.mxu0  ;;  %v7643_v1 = vpop.f32.mrf.mxu1 }
 0x5ba   : > { %v7910_v12 = vpack.i.bf16 %v9660_v47, %v9658_v31  ;;  %v5013_v24 = vpack.c.bf16 %v9660_v47, %v9658_v31  ;;  %v9686_v18 = vmax.f32 %v4772_v9, 0.0 }
 0x5bb   : > { %v4665_v54 = vpop.f32.mrf.mxu0 }
 0x5bc   : > { %v4666_v46 = vadd.f32 %v4665_v54, %v9531_v39  ;;  %7911 = vrot.lane.b32.xlu1 %v7910_v12, %s8249_s19  ;;  %7906 = vrot.lane.b32.xlu0 %v7910_v12, %s8250_s25 }
 0x5bd   : > { %7659 = vmatmul.mubr.msk.bf16.gmra.mxu0 %vm2590_vm5, %v5013_v24  ;;  %v7636_v32 = vpop.f32.mrf.mxu0 }
 0x5be   : > { %v4771_v7 = vadd.f32 %v9543_v10, %v4666_v46 }
 0x5bf   : > { %v4668_v63 = vpop.f32.mrf.mxu0 }
 0x5c0   : > { %v9676_v42 = vmax.f32 %v4771_v7, 0.0  ;;  %4910 = vrot.lane.b32.xlu1 %v9673_v13, %s8250_s25  ;;  %7916 = vrot.lane.b32.xlu0 %v7910_v12, %s8248_s29 }
 0x5c1   : > { %v7637_v36 = vpop.f32.mrf.mxu0 }
 0x5c2   : > { %v7920_v39 = vpack.i.bf16 %v9676_v42, %v9673_v13  ;;  %v5015_v44 = vpack.c.bf16 %v9676_v42, %v9673_v13  ;;  %v7925_v24 = vpack.i.bf16 %v9686_v18, %v9676_v42 }
 0x5c3   : > { %v4751_v14 = vpop.f32.mrf.mxu0 }
 0x5c4   : > { %v4752_v1 = vadd.f32 %v4751_v14, %v9533_v43  ;;  %4827 = vrot.lane.b32.xlu0 %v9673_v13, %s8249_s19  ;;  %7921 = vrot.lane.b32.xlu1 %v7920_v39, %s8248_s29 }
 0x5c5   : > { %7662 = vmatprep.mubr.msk.bf16.mxu0 %vm2590_vm5, %v5015_v44  ;;  %v7648_v59 = vpop.f32.mrf.mxu0 }
 0x5c6   : > { %v4773_v12 = vadd.f32 %v9543_v10, %v4752_v1 }
 0x5c7   : > { %v4754_v54 = vpop.f32.mrf.mxu0 }
 0x5c8   : > { %v9696_v46 = vmax.f32 %v4773_v12, 0.0  ;;  %7926 = vrot.lane.b32.xlu0 %v7925_v24, %s8250_s25  ;;  %7931 = vrot.lane.b32.xlu1 %v7925_v24, %s8249_s19 }
 0x5c9   : > { %v7649_v43 = vpop.f32.mrf.mxu0 }
 0x5ca   : > { %v7935_v15 = vpack.i.bf16 %v9696_v46, %v9686_v18  ;;  %v5017_v32 = vpack.c.bf16 %v9696_v46, %v9686_v18 }
 0x5cc   : > { %4947 = vrot.lane.b32.xlu1 %v9696_v46, %s8250_s25  ;;  %7936 = vrot.lane.b32.xlu0 %v7935_v15, %s8248_s29 }
 0x5cd   : > { %7663 = vmatmul.mubr.msk.bf16.gmra.mxu0 %vm2590_vm5, %v5017_v32 }
 0x5ce   : > { %7666 = vmatprep.mubr.bf16.mxu0 %v8251_v53 }
 0x5d0   : > { %4936 = vrot.lane.b32.xlu0 %v9696_v46, %s8249_s19 }
 0x5d5   : > { %7667 = vmatmul.mubr.bf16.gmra.mxu0 %v8251_v53 }
 0x606   : > { %v7832_v10 = vpop.permute.xlu1 %7831  ;;  %v7837_v7 = vpop.permute.xlu0 %7836 }
 0x607   : > { %v7834_v63 = vunpack.i.h.bf16 %v7832_v10  ;;  %v7833_v9 = vunpack.i.l.bf16 %v7832_v10 }
 0x609   : > { %v4952_v12 = vsel %vm2590_vm5, %v9562_v60, %v7834_v63  ;;  %v4951_v24 = vsel %vm2590_vm5, %v9558_v35, %v7833_v9 }
 0x60e   : > { %v7847_v36 = vpop.permute.xlu1 %7846  ;;  %v7842_v39 = vpop.permute.xlu0 %7841 }
 0x60f   : > { %v7849_v44 = vunpack.i.h.bf16 %v7847_v36  ;;  %v7848_v14 = vunpack.i.l.bf16 %v7847_v36  ;;  %v7844_v1 = vunpack.i.h.bf16 %v7842_v39  ;;  %v7843_v59 = vunpack.i.l.bf16 %v7842_v39 }
 0x611   : > { %v4966_v54 = vsel %vm2605_vm6, %v4952_v12, %v7844_v1  ;;  %v4965_v53 = vsel %vm2605_vm6, %v4951_v24, %v7843_v59 }
 0x612   : > { %v7852_v43 = vpop.permute.xlu1 %7851  ;;  %v4980_v15 = vsel %vm2621_vm7, %v4965_v53, %v7848_v14  ;;  %v4981_v32 = vsel %vm2621_vm7, %v4966_v54, %v7849_v44 }
 0x613   : > { %v5005_v10 = vpack.c.bf16 %v4981_v32, %v4980_v15  ;;  %v7853_v17 = vunpack.i.l.bf16 %v7852_v43  ;;  %v7854_v28 = vunpack.i.h.bf16 %v7852_v43  ;;  %v7838_v43 = vunpack.i.l.bf16 %v7837_v7 }
 0x614   : > { %v7839_v32 = vunpack.i.h.bf16 %v7837_v7 }
 0x615   : > { %5221 = vmatprep.mubr.bf16.mxu1 %v5005_v10  ;;  %v4953_v35 = vsel %vm2590_vm5, %v9560_v11, %v7853_v17  ;;  %v4954_v24 = vsel %vm2590_vm5, %v9588_v5, %v7854_v28  ;;  %v4963_v28 = vsel %vm2605_vm6, %v8903_v2, %v7838_v43 }
 0x616   : > { %v7867_v36 = vpop.permute.xlu1 %7866  ;;  %v7857_v39 = vpop.permute.xlu0 %7856 }
 0x617   : > { %v7868_v23 = vunpack.i.l.bf16 %v7867_v36  ;;  %v7858_v60 = vunpack.i.l.bf16 %v7857_v39  ;;  %v7869_v63 = vunpack.i.h.bf16 %v7867_v36  ;;  %v7859_v9 = vunpack.i.h.bf16 %v7857_v39 }
 0x619   : > { %v4977_v1 = vsel %vm2621_vm7, %v8918_v20, %v7858_v60  ;;  %v4967_v14 = vsel %vm2605_vm6, %v4953_v35, %v7868_v23  ;;  %v4968_v15 = vsel %vm2605_vm6, %v4954_v24, %v7869_v63 }
 0x61a   : > { %v5004_v44 = vpack.c.bf16 %v4977_v1, %v8923_v8  ;;  %v7872_v59 = vpop.permute.xlu1 %7871  ;;  %v7862_v12 = vpop.permute.xlu0 %7861  ;;  %v4982_v20 = vsel %vm2621_vm7, %v4967_v14, %v7859_v9 }
 0x61b   : > { %v7873_v54 = vunpack.i.l.bf16 %v7872_v59  ;;  %v7863_v53 = vunpack.i.l.bf16 %v7862_v12  ;;  %v7874_v17 = vunpack.i.h.bf16 %v7872_v59  ;;  %v7864_v35 = vunpack.i.h.bf16 %v7862_v12 }
 0x61c   : > { %5222 = vmatmul.mubr.bf16.vlgmr.msra.gmra.mxu1 %v5004_v44 }
 0x61d   : > { %v4950_v11 = vsel %vm2590_vm5, 0.0, %v7863_v53  ;;  %v4983_v23 = vsel %vm2621_vm7, %v4968_v15, %v7873_v54  ;;  %v4978_v63 = vsel %vm2621_vm7, %v4963_v28, %v7874_v17  ;;  %v4955_v24 = vsel %vm2590_vm5, %v9586_v52, %v7864_v35 }
 0x61e   : > { %v7877_v8 = vpop.permute.xlu0 %7876  ;;  %v5008_v36 = vpack.c.bf16 %v4983_v23, %v4982_v20  ;;  %v4964_v5 = vsel %vm2605_vm6, %v4950_v11, %v7839_v32  ;;  %v7882_v60 = vpop.permute.xlu1 %7881 }
 0x61f   : > { %v7878_v39 = vunpack.i.l.bf16 %v7877_v8  ;;  %v7883_v14 = vunpack.i.l.bf16 %v7882_v60  ;;  %v7879_v43 = vunpack.i.h.bf16 %v7877_v8  ;;  %v7884_v11 = vunpack.i.h.bf16 %v7882_v60 }
 0x620   : > { %5229 = vmatprep.mubr.bf16.mxu1 %v5008_v36 }
 0x621   : > { %v4979_v1 = vsel %vm2621_vm7, %v4964_v5, %v7878_v39  ;;  %v4956_v53 = vsel %vm2590_vm5, %v9606_v33, %v7883_v14 }
 0x622   : > { %v5007_v44 = vpack.c.bf16 %v4979_v1, %v4978_v63  ;;  %v7887_v9 = vpop.permute.xlu0 %7886  ;;  %v4957_v63 = vsel %vm2590_vm5, %v9609_v45, %v7884_v11 }
 0x623   : > { %v7888_v59 = vunpack.i.l.bf16 %v7887_v9  ;;  %v7889_v7 = vunpack.i.h.bf16 %v7887_v9 }
 0x624   : > { %5230 = vmatmul.mubr.bf16.gmra.mxu1 %v5007_v44 }
 0x625   : > { %v4969_v2 = vsel %vm2605_vm6, %v4955_v24, %v7888_v59  ;;  %v4970_v12 = vsel %vm2605_vm6, %v4956_v53, %v7889_v7 }
 0x626   : > { %v7892_v54 = vpop.permute.xlu1 %7891  ;;  %v7897_v17 = vpop.permute.xlu0 %7896  ;;  %v4984_v20 = vsel %vm2621_vm7, %v4969_v2, %v7879_v43 }
 0x627   : > { %v7893_v15 = vunpack.i.l.bf16 %v7892_v54  ;;  %v7898_v28 = vunpack.i.l.bf16 %v7897_v17  ;;  %v7894_v1 = vunpack.i.h.bf16 %v7892_v54  ;;  %v7899_v9 = vunpack.i.h.bf16 %v7897_v17 }
 0x629   : > { %v4985_v23 = vsel %vm2621_vm7, %v4970_v12, %v7893_v15  ;;  %v4958_v60 = vsel %vm2590_vm5, %v9624_v29, %v7898_v28  ;;  %v4959_v15 = vsel %vm2590_vm5, %v9641_v62, %v7899_v9 }
 0x62a   : > { %v7902_v32 = vpop.permute.xlu1 %7901  ;;  %v5010_v39 = vpack.c.bf16 %v4985_v23, %v4984_v20 }
 0x62b   : > { %v7903_v52 = vunpack.i.l.bf16 %v7902_v32  ;;  %v7904_v5 = vunpack.i.h.bf16 %v7902_v32 }
 0x62c   : > { %5237 = vmatprep.mubr.bf16.mxu1 %v5010_v39 }
 0x62d   : > { %5238 = vmatmul.mubr.bf16.gmra.mxu1 %v5005_v10  ;;  %v4971_v33 = vsel %vm2605_vm6, %v4957_v63, %v7903_v52  ;;  %v4972_v14 = vsel %vm2605_vm6, %v4958_v60, %v7904_v5 }
 0x62e   : > { %v7912_v8 = vpop.permute.xlu1 %7911  ;;  %v7907_v35 = vpop.permute.xlu0 %7906  ;;  %v4986_v7 = vsel %vm2621_vm7, %v4971_v33, %v7894_v1 }
 0x62f   : > { %v7908_v44 = vunpack.i.l.bf16 %v7907_v35  ;;  %v7913_v59 = vunpack.i.l.bf16 %v7912_v8  ;;  %v7909_v54 = vunpack.i.h.bf16 %v7907_v35  ;;  %v7914_v28 = vunpack.i.h.bf16 %v7912_v8 }
 0x631   : > { %v4987_v24 = vsel %vm2621_vm7, %v4972_v14, %v7908_v44  ;;  %v4960_v29 = vsel %vm2590_vm5, %v9643_v38, %v7913_v59  ;;  %v4961_v35 = vsel %vm2590_vm5, %v9658_v31, %v7914_v28  ;;  %v8226_v28 = vld [vmem:[%s10499_s14 + $0x68] sm:$0xff]  }
 0x632   : > { %v4911_v2 = vpop.permute.xlu1 %4910  ;;  %v7917_v45 = vpop.permute.xlu0 %7916  ;;  %v5012_v10 = vpack.c.bf16 %v4987_v24, %v4986_v7 }
 0x633   : > { %v7919_v53 = vunpack.i.h.bf16 %v7917_v45  ;;  %v7918_v43 = vunpack.i.l.bf16 %v7917_v45 }
 0x634   : > { %5245 = vmatprep.mubr.bf16.mxu1 %v5012_v10 }
 0x635   : > { %v4974_v12 = vsel %vm2605_vm6, %v4960_v29, %v7919_v53  ;;  %v4973_v17 = vsel %vm2605_vm6, %v4959_v15, %v7918_v43  ;;  %5246 = vmatmul.mubr.bf16.gmra.mxu1 %v5008_v36 }
 0x636   : > { %v4828_v11 = vpop.permute.xlu0 %4827  ;;  %v7922_v20 = vpop.permute.xlu1 %7921  ;;  %v4988_v23 = vsel %vm2621_vm7, %v4973_v17, %v7909_v54  ;;  %v4989_v32 = vsel %vm2621_vm7, %v4974_v12, %v4911_v2 }
 0x637   : > { %v5014_v52 = vpack.c.bf16 %v4989_v32, %v4988_v23  ;;  %v7924_v5 = vunpack.i.h.bf16 %v7922_v20  ;;  %v7923_v62 = vunpack.i.l.bf16 %v7922_v20  ;;  %v4962_v38 = vsel %vm2590_vm5, %v9660_v47, %v4828_v11  ;;  %v8225_v32 = vld [vmem:[%s10499_s14 + $0x30] sm:$0xff]  }
 0x639   : > { %5253 = vmatprep.mubr.bf16.mxu1 %v5014_v52  ;;  %v4976_v1 = vsel %vm2605_vm6, %v4962_v38, %v7924_v5  ;;  %v4975_v44 = vsel %vm2605_vm6, %v4961_v35, %v7923_v62  ;;  %v8227_v5 = vld [vmem:[%s10499_s14 + $0x28] sm:$0xff]   ;;  %v8228_v62 = vld [vmem:[%s10499_s14 + $0x60] sm:$0xff]  }
 0x63a   : > { %v7927_v63 = vpop.permute.xlu0 %7926  ;;  %v7932_v33 = vpop.permute.xlu1 %7931 }
 0x63b   : > { %v7929_v36 = vunpack.i.h.bf16 %v7927_v63  ;;  %v7928_v60 = vunpack.i.l.bf16 %v7927_v63  ;;  %v7934_v9 = vunpack.i.h.bf16 %v7932_v33  ;;  %v7933_v8 = vunpack.i.l.bf16 %v7932_v33  ;;  %v9821_v33 = vld [vmem:[%s10498_s13] ss:$0 sm:$0xff] }
 0x63d   : > { %5254 = vmatmul.mubr.bf16.gmra.mxu1 %v5010_v39  ;;  %v4990_v14 = vsel %vm2621_vm7, %v4975_v44, %v7928_v60  ;;  %v4991_v59 = vsel %vm2621_vm7, %v4976_v1, %v7929_v36  ;;  %v4993_v31 = vsel %vm2590_vm5, %v9676_v42, %v7934_v9  ;;  %v4992_v45 = vsel %vm2590_vm5, %v9673_v13, %v7933_v8  ;;  %v8229_v36 = vld [vmem:[%s10499_s14 + $0x20] sm:$0xff]  }
 0x63e   : > { %v7937_v47 = vpop.permute.xlu0 %7936  ;;  %v5016_v7 = vpack.c.bf16 %v4991_v59, %v4990_v14  ;;  %v4948_v53 = vpop.permute.xlu1 %4947  ;;  %v4995_v13 = vsel %vm2590_vm5, %v9696_v46, %v8899_v51  ;;  %v8220_v51 = vld [vmem:[%s10499_s14 + $0x88] sm:$0xff]   ;;  %v8223_v46 = vld [vmem:[%s10499_s14 + $0x38] sm:$0xff]   ;;  %v5431_v9 = vrot.slane %v8246_v30, 7 }
 0x63f   : > { %v7939_v24 = vunpack.i.h.bf16 %v7937_v47  ;;  %v7938_v2 = vunpack.i.l.bf16 %v7937_v47  ;;  %v4999_v11 = vsel %vm2605_vm6, %v4995_v13, %v8905_v6  ;;  %7670 = vmatprep.subr.bf16.mxu1 %v8220_v51  ;;  %v8230_v30 = vld [vmem:[%s10499_s14 + $0x58] sm:$0xff]  }
 0x640   : > { %5261 = vmatprep.mubr.bf16.mxu1 %v5016_v7  ;;  %v5003_v23 = vsel %vm2621_vm7, %v4999_v11, %v8911_v61  ;;  %7671 = vmatpush3.bf16.msra.mxu1 %v8220_v51 }
 0x641   : > { %v4997_v43 = vsel %vm2605_vm6, %v4993_v31, %v7939_v24  ;;  %v4996_v39 = vsel %vm2605_vm6, %v4992_v45, %v7938_v2  ;;  %v9832_v31 = vsel %vm5465_vm8, 0.0, %v5431_v9  ;;  %v5483_v45 = vsel %vm5465_vm8, %v5431_v9, 0.0 }
 0x642   : > { %v4937_v15 = vpop.permute.xlu0 %4936  ;;  %v5000_v29 = vsel %vm2621_vm7, %v4996_v39, %v4948_v53  ;;  %v5001_v54 = vsel %vm2621_vm7, %v4997_v43, %v8911_v61  ;;  %v8231_v39 = vld [vmem:[%s10499_s14 + $0x18] sm:$0xff]  }
 0x643   : > { %v4994_v12 = vsel %vm2590_vm5, %v9686_v18, %v4937_v15  ;;  %v5018_v17 = vpack.c.bf16 %v5001_v54, %v5000_v29  ;;  %v5533_v54 = vrot.slane %v9832_v31, 1 }
 0x644   : > { %v4998_v42 = vsel %vm2605_vm6, %v4994_v12, %v8905_v6  ;;  %v8221_v6 = vld [vmem:[%s10499_s14 + $0x80] sm:$0xff]   ;;  %v5534_v12 = vrot.slane %v5483_v45, 1 }
 0x645   : > { %5262 = vmatmul.mubr.bf16.gmra.mxu1 %v5012_v10  ;;  %v5002_v20 = vsel %vm2621_vm7, %v4998_v42, %v8911_v61  ;;  %7672 = vmatprep.subr.bf16.mxu1 %v8221_v6  ;;  %v8222_v61 = vld [vmem:[%s10499_s14 + $0x78] sm:$0xff]   ;;  %v8224_v10 = vld [vmem:[%s10499_s14 + $0x70] sm:$0xff]  }
 0x646   : > { %5269 = vmatprep.mubr.bf16.mxu1 %v5018_v17  ;;  %v5019_v18 = vpack.c.bf16 %v5003_v23, %v5002_v20  ;;  %7673 = vmatpush3.bf16.msra.mxu1 %v8221_v6  ;;  %v5630_v20 = vrot.slane %v9832_v31, 2  ;;  %v5631_v23 = vrot.slane %v5483_v45, 2  ;;  %v8235_v45 = vld [vmem:[%s10499_s14 + $0x8] sm:$0xff]  }
 0x647   : > { %7078 = vmatprep.subr.bf16.mxu0 %v8222_v61 }
 0x648   : > { %7079 = vmatpush3.bf16.msra.mxu0 %v8223_v46 }
 0x649   : > { %7080 = vmatprep.subr.bf16.mxu0 %v8224_v10 }
 0x64c   : > { %7081 = vmatpush3.bf16.msra.mxu0 %v8225_v32 }
 0x64d   : > { %5270 = vmatmul.mubr.bf16.gmra.mxu1 %v5014_v52  ;;  %7082 = vmatprep.subr.bf16.mxu0 %v8226_v28  ;;  %v8232_v28 = vld [vmem:[%s10499_s14 + $0x50] sm:$0xff]  }
 0x64e   : > { %5277 = vmatprep.mubr.bf16.mxu1 %v5019_v18 }
 0x650   : > { %7083 = vmatpush3.bf16.msra.mxu0 %v8227_v5  ;;  %v8233_v5 = vld [vmem:[%s10499_s14 + $0x10] sm:$0xff]  }
 0x651   : > { %7084 = vmatprep.subr.bf16.mxu0 %v8228_v62 }
 0x654   : > { %7085 = vmatpush3.bf16.msra.mxu0 %v8229_v36 }
 0x655   : > { %5278 = vmatmul.mubr.bf16.gmra.mxu1 %v5016_v7  ;;  %7086 = vmatprep.subr.bf16.mxu0 %v8230_v30 }
 0x658   : > { %7087 = vmatpush3.bf16.msra.mxu0 %v8231_v39 }
 0x659   : > { %7088 = vmatprep.subr.bf16.mxu0 %v8232_v28 }
 0x65c   : > { %7089 = vmatpush3.bf16.msra.mxu0 %v8233_v5 }
 0x66d   : > { %v7656_v52 = vpop.f32.mrf.mxu0 }
 0x66f   : > { %v5320_v63 = vpop.f32.mrf.mxu0 }
 0x671   : > { %v7657_v8 = vpop.f32.mrf.mxu0 }
 0x673   : > { %v5323_v53 = vpop.f32.mrf.mxu0 }
 0x67d   : > { %v9850_v46 = vpop.f32.mrf.mxu0 }
 0x6dc   : > { %v7020_v38 = vpop.f32.mrf.mxu1 }
 0x6de   : > { %v7021_v35 = vpop.f32.mrf.mxu1 }
 0x6df   : > { %v7022_v60 = vadd.f32 %v7021_v35, %v7020_v38 }
 0x6e0   : > { %v7023_v1 = vpop.f32.mrf.mxu1 }
 0x6e1   : > { %v5224_v44 = vadd.f32 %v7022_v60, %v9821_v33 }
 0x6e2   : > { %v7024_v14 = vpop.f32.mrf.mxu1 }
 0x6e3   : > { %v5321_v59 = vadd.f32 %v5320_v63, %v5224_v44  ;;  %v7025_v47 = vadd.f32 %v7024_v14, %v7023_v1 }
 0x6e4   : > { %v7026_v7 = vpop.f32.mrf.mxu1 }
 0x6e5   : > { %v5383_v24 = vadd.f32 %v5321_v59, %v3065_v57  ;;  %v5227_v2 = vadd.f32 %v7025_v47, %v9821_v33 }
 0x6e6   : > { %v7027_v43 = vpop.f32.mrf.mxu1 }
 0x6e7   : > { %v5399_v15 = vmax.f32 %v5383_v24, 0.0  ;;  %v5324_v26 = vadd.f32 %v5323_v53, %v5227_v2  ;;  %v7028_v57 = vadd.f32 %v7027_v43, %v7026_v7  ;;  %v9879_v24 = vsel %vm5629_vm10, %v5630_v20, %v5631_v23  ;;  %v8234_v2 = vld [vmem:[%s10499_s14 + $0x48] sm:$0xff]  }
 0x6e8   : > { %v7029_v29 = vpop.f32.mrf.mxu1  ;;  %7090 = vmatprep.subr.bf16.mxu0 %v8234_v2 }
 0x6e9   : > { %v5432_v17 = vrot.slane %v5399_v15, 7  ;;  %v5384_v13 = vadd.f32 %v5324_v26, %v3066_v34  ;;  %v5232_v42 = vadd.f32 %v7028_v57, %v9821_v33  ;;  %v9853_v34 = vsel %vm5532_vm9, %v5533_v54, %v5534_v12  ;;  %v8236_v57 = vld [vmem:[%s10499_s14 + $0x40] sm:$0xff]   ;;  %7091 = vmatpush3.bf16.msra.mxu0 %v8235_v45 }
 0x6ea   : > { %v7030_v11 = vpop.f32.mrf.mxu1  ;;  %7092 = vmatprep.subr.bf16.mxu0 %v8236_v57 }
 0x6eb   : > { %v9847_v18 = vsel %vm5465_vm8, 0.0, %v5432_v17  ;;  %v5484_v51 = vsel %vm5465_vm8, %v5432_v17, 0.0  ;;  %v5400_v6 = vmax.f32 %v5384_v13, 0.0  ;;  %v5329_v61 = vadd.f32 %v7656_v52, %v5232_v42 }
 0x6ec   : > { %v7031_v49 = vadd.f32 %v7030_v11, %v7029_v29  ;;  %v5536_v10 = vrot.slane %v9847_v18, 1  ;;  %v5537_v32 = vrot.slane %v5484_v51, 1  ;;  %v5633_v63 = vrot.slane %v9847_v18, 2 }
 0x6ed   : > { %v5433_v62 = vrot.slane %v5400_v6, 7  ;;  %v5385_v52 = vadd.f32 %v5329_v61, %v3067_v25  ;;  %v7032_v38 = vpop.f32.mrf.mxu1  ;;  %v5634_v35 = vrot.slane %v5484_v51, 2  ;;  %v5336_v25 = vpop.f32.mrf.mxu0  ;;  %7093 = vmatpush3.bf16.msra.mxu0 %v8237_v55 }
 0x6ee   : > { %v5235_v36 = vadd.f32 %v7031_v49, %v9821_v33  ;;  %v9867_v60 = vsel %vm5532_vm9, %v5536_v10, %v5537_v32 }
 0x6ef   : > { %v9870_v1 = vsel %vm5465_vm8, 0.0, %v5433_v62  ;;  %v9873_v44 = vsel %vm5465_vm8, %v5433_v62, 0.0  ;;  %v5401_v9 = vmax.f32 %v5385_v52, 0.0  ;;  %v7033_v14 = vpop.f32.mrf.mxu1  ;;  %v7940_v22 = vpack.i.bf16 %v9867_v60, %v9853_v34 }
 0x6f0   : > { %v5637_v59 = vrot.slane %v9873_v44, 2  ;;  %v5332_v47 = vadd.f32 %v7657_v8, %v5235_v36  ;;  %v7034_v7 = vadd.f32 %v7033_v14, %v7032_v38  ;;  %v5635_v30 = vsel %vm5629_vm10, %v5633_v63, %v5634_v35 }
 0x6f1   : > { %v5434_v53 = vrot.slane %v5401_v9, 7  ;;  %v7035_v43 = vpop.f32.mrf.mxu1  ;;  %7941 = vrot.lane.b32.xlu0 %v7940_v22, %s8249_s19  ;;  %v5636_v8 = vrot.slane %v9870_v1, 2  ;;  %v5540_v39 = vrot.slane %v9873_v44, 1  ;;  %v7945_v13 = vpack.i.bf16 %v5635_v30, %v9879_v24 }
 0x6f2   : > { %v5386_v15 = vadd.f32 %v5332_v47, %v3068_v3  ;;  %v5240_v26 = vadd.f32 %v7034_v7, %v9821_v33  ;;  %v7661_v3 = vpop.f32.mrf.mxu0  ;;  %v7950_v23 = vpack.i.bf16 %v9870_v1, %v9847_v18  ;;  %v5539_v10 = vrot.slane %v9870_v1, 1 }
 0x6f3   : > { %v9898_v29 = vsel %vm5465_vm8, 0.0, %v5434_v53  ;;  %v5486_v54 = vsel %vm5465_vm8, %v5434_v53, 0.0  ;;  %v7036_v12 = vpop.f32.mrf.mxu1  ;;  %v9902_v17 = vsel %vm5629_vm10, %v5636_v8, %v5637_v59 }
 0x6f4   : > { %v5640_v42 = vrot.slane %v5486_v54, 2  ;;  %v5402_v11 = vmax.f32 %v5386_v15, 0.0  ;;  %v5337_v20 = vadd.f32 %v5336_v25, %v5240_v26  ;;  %v7037_v51 = vadd.f32 %v7036_v12, %v7035_v43  ;;  %v5339_v36 = vpop.f32.mrf.mxu0 }
 0x6f5   : > { %v7038_v6 = vpop.f32.mrf.mxu1  ;;  %v7955_v61 = vpack.i.bf16 %v9902_v17, %v5635_v30  ;;  %7946 = vrot.lane.b32.xlu0 %v7945_v13, %s8248_s29  ;;  %v5639_v49 = vrot.slane %v9898_v29, 2  ;;  %v5543_v32 = vrot.slane %v5486_v54, 1  ;;  %v5542_v62 = vrot.slane %v9898_v29, 1 }
 0x6f6   : > { %v5435_v28 = vrot.slane %v5402_v11, 7  ;;  %v5387_v5 = vadd.f32 %v5337_v20, %v3069_v50  ;;  %v5243_v52 = vadd.f32 %v7037_v51, %v9821_v33  ;;  %v7960_v35 = vpack.i.bf16 %v9898_v29, %v9870_v1  ;;  %v9939_v43 = vpop.f32.mrf.mxu0 }
 0x6f7   : > { %7956 = vrot.lane.b32.xlu1 %v7955_v61, %s8249_s19  ;;  %v7039_v38 = vpop.f32.mrf.mxu1  ;;  %v5641_v63 = vsel %vm5629_vm10, %v5639_v49, %v5640_v42  ;;  %v9932_v47 = vsel %vm5532_vm9, %v5539_v10, %v5540_v39  ;;  %v9936_v45 = vsel %vm5532_vm9, %v5542_v62, %v5543_v32  ;;  %v10515_v30 = vmax.f32 %v9097_v19, 0.0 }
 0x6f8   : > { %v9923_v44 = vsel %vm5465_vm8, 0.0, %v5435_v28  ;;  %v9926_v0 = vsel %vm5465_vm8, %v5435_v28, 0.0  ;;  %v5403_v50 = vmax.f32 %v5387_v5, 0.0  ;;  %v7040_v9 = vadd.f32 %v7039_v38, %v7038_v6  ;;  %v5352_v6 = vpop.f32.mrf.mxu0 }
 0x6f9   : > { %v5643_v14 = vrot.slane %v9926_v0, 2  ;;  %v5340_v22 = vadd.f32 %v5339_v36, %v5243_v52  ;;  %v7041_v25 = vpop.f32.mrf.mxu1  ;;  %v6056_v59 = vpack.c.bf16 %v5641_v63, %v9902_v17  ;;  %7951 = vrot.lane.b32.xlu0 %v7950_v23, %s8250_s25  ;;  %v5642_v53 = vrot.slane %v9923_v44, 2 }
 0x6fa   : > { %v5436_v7 = vrot.slane %v5403_v50, 7  ;;  %v5248_v2 = vadd.f32 %v7040_v9, %v9821_v33  ;;  %v7970_v39 = vpack.i.bf16 %v9936_v45, %v9932_v47  ;;  %v10516_v42 = vmax.f32 %v9113_v4, 0.0 }
 0x6fb   : > { %v5388_v8 = vadd.f32 %v5340_v22, %v10515_v30  ;;  %7674 = vmatprep.mubr.msk.bf16.mxu1 %vm2590_vm5, %v6056_v59  ;;  %7961 = vrot.lane.b32.xlu1 %v7960_v35, %s8248_s29  ;;  %v7042_v15 = vpop.f32.mrf.mxu1  ;;  %v9957_v23 = vsel %vm5629_vm10, %v5642_v53, %v5643_v14  ;;  %v5546_v61 = vrot.slane %v9926_v0, 1  ;;  %v7975_v10 = vpack.i.bf16 %v5641_v63, %v9902_v17  ;;  %v9978_v14 = vpop.f32.mrf.mxu0 }
 0x6fc   : > { %v9948_v26 = vsel %vm5465_vm8, 0.0, %v5436_v7  ;;  %v5488_v57 = vsel %vm5465_vm8, %v5436_v7, 0.0  ;;  %v5345_v54 = vadd.f32 %v9850_v46, %v5248_v2  ;;  %v7043_v12 = vadd.f32 %v7042_v15, %v7041_v25 }
 0x6fd   : > { %v5646_v13 = vrot.slane %v5488_v57, 2  ;;  %v5404_v55 = vmax.f32 %v5388_v8, 0.0  ;;  %v7044_v19 = vpop.f32.mrf.mxu1  ;;  %7971 = vrot.lane.b32.xlu0 %v7970_v39, %s8249_s19  ;;  %v5645_v51 = vrot.slane %v9948_v26, 2  ;;  %v5549_v62 = vrot.slane %v5488_v57, 1 }
 0x6fe   : > { %v5389_v11 = vadd.f32 %v5345_v54, %v10516_v42  ;;  %v5251_v20 = vadd.f32 %v7043_v12, %v9821_v33  ;;  %v7985_v38 = vpack.i.bf16 %v9957_v23, %v5641_v63  ;;  %v5545_v36 = vrot.slane %v9923_v44, 1  ;;  %v5355_v42 = vpop.f32.mrf.mxu0 }
 0x6ff   : > { %v5437_v46 = vrot.slane %v5404_v55, 7  ;;  %7966 = vrot.lane.b32.xlu1 %v7970_v39, %s8250_s25  ;;  %v7045_v49 = vpop.f32.mrf.mxu1  ;;  %v9964_v5 = vsel %vm5629_vm10, %v5645_v51, %v5646_v13  ;;  %v7990_v9 = vpack.i.bf16 %v9948_v26, %v9923_v44  ;;  %v7980_v59 = vpack.i.bf16 %v9923_v44, %v9898_v29 }
 0x700   : > { %v5405_v32 = vmax.f32 %v5389_v11, 0.0  ;;  %v5348_v28 = vadd.f32 %v7661_v3, %v5251_v20  ;;  %v7046_v4 = vadd.f32 %v7045_v49, %v7044_v19  ;;  %v6059_v35 = vpack.c.bf16 %v9964_v5, %v9957_v23 }
 0x701   : > { %v7047_v52 = vpop.f32.mrf.mxu1  ;;  %7976 = vrot.lane.b32.xlu0 %v7975_v10, %s8248_s29  ;;  %v9972_v0 = vsel %vm5465_vm8, %v5437_v46, 0.0  ;;  %v10517_v3 = vmax.f32 %v9120_v56, 0.0  ;;  %v9981_v63 = vsel %vm5465_vm8, 0.0, %v5437_v46  ;;  %v5548_v56 = vrot.slane %v9948_v26, 1 }
 0x702   : > { %v5438_v17 = vrot.slane %v5405_v32, 7  ;;  %v5256_v22 = vadd.f32 %v7046_v4, %v9821_v33  ;;  %7675 = vmatmul.mubr.msk.bf16.vlgmr.msra.gmra.mxu1 %vm2590_vm5, %v6059_v35  ;;  %v5649_v8 = vrot.slane %v9972_v0, 2  ;;  %v9998_v57 = vsel %vm5532_vm9, %v5545_v36, %v5546_v61 }
 0x703   : > { %v5390_v50 = vadd.f32 %v5348_v28, %v10517_v3  ;;  %7986 = vrot.lane.b32.xlu1 %v7985_v38, %s8249_s19  ;;  %v7048_v25 = vpop.f32.mrf.mxu1  ;;  %v10001_v54 = vsel %vm5532_vm9, %v5548_v56, %v5549_v62  ;;  %v5648_v19 = vrot.slane %v9981_v63, 2  ;;  %v10518_v11 = vmax.f32 %v9135_v27, 0.0 }
 0x704   : > { %v9990_v7 = vsel %vm5465_vm8, 0.0, %v5438_v17  ;;  %v9993_v2 = vsel %vm5465_vm8, %v5438_v17, 0.0  ;;  %v7049_v30 = vadd.f32 %v7048_v25, %v7047_v52  ;;  %v5353_v15 = vadd.f32 %v5352_v6, %v5256_v22  ;;  %v10022_v52 = vpop.f32.mrf.mxu0 }
 0x705   : > { %v5406_v53 = vmax.f32 %v5390_v50, 0.0  ;;  %v7050_v39 = vpop.f32.mrf.mxu1  ;;  %7981 = vrot.lane.b32.xlu0 %v7980_v59, %s8250_s25  ;;  %v5652_v12 = vrot.slane %v9993_v2, 2  ;;  %v8000_v6 = vpack.i.bf16 %v10001_v54, %v9998_v57  ;;  %v5651_v61 = vrot.slane %v9990_v7, 2 }
 0x706   : > { %v5259_v55 = vadd.f32 %v7049_v30, %v9821_v33  ;;  %v5391_v20 = vadd.f32 %v5353_v15, %v10518_v11  ;;  %v5552_v46 = vrot.slane %v9972_v0, 1  ;;  %v8005_v62 = vpack.i.bf16 %v9964_v5, %v9957_v23  ;;  %v5368_v15 = vpop.f32.mrf.mxu0 }
 0x707   : > { %v5439_v13 = vrot.slane %v5406_v53, 7  ;;  %7991 = vrot.lane.b32.xlu1 %v7990_v9, %s8248_s29  ;;  %v7051_v51 = vpop.f32.mrf.mxu1  ;;  %v10519_v38 = vmax.f32 %v9142_v48, 0.0  ;;  %v10028_v0 = vsel %vm5629_vm10, %v5648_v19, %v5649_v8  ;;  %v10031_v17 = vsel %vm5629_vm10, %v5651_v61, %v5652_v12 }
 0x708   : > { %v5356_v10 = vadd.f32 %v5355_v42, %v5259_v55  ;;  %v7052_v32 = vadd.f32 %v7051_v51, %v7050_v39  ;;  %v5407_v27 = vmax.f32 %v5391_v20, 0.0  ;;  %v5555_v3 = vrot.slane %v9993_v2, 1 }
 0x709   : > { %v10014_v49 = vsel %vm5465_vm8, 0.0, %v5439_v13  ;;  %v10017_v28 = vsel %vm5465_vm8, %v5439_v13, 0.0  ;;  %v7053_v4 = vpop.f32.mrf.mxu1  ;;  %8001 = vrot.lane.b32.xlu0 %v8000_v6, %s8249_s19  ;;  %v6062_v23 = vpack.c.bf16 %v10031_v17, %v10028_v0  ;;  %v8015_v8 = vpack.i.bf16 %v10028_v0, %v9964_v5 }
 0x70a   : > { %v5392_v35 = vadd.f32 %v5356_v10, %v10519_v38  ;;  %v5264_v36 = vadd.f32 %v7052_v32, %v9821_v33  ;;  %v5654_v50 = vrot.slane %v10014_v49, 2  ;;  %v5440_v9 = vrot.slane %v5407_v27, 7  ;;  %v10076_v38 = vpop.f32.mrf.mxu0 }
 0x70b   : > { %7996 = vrot.lane.b32.xlu1 %v8000_v6, %s8250_s25  ;;  %v7054_v48 = vpop.f32.mrf.mxu1  ;;  %v5655_v22 = vrot.slane %v10017_v28, 2  ;;  %7678 = vmatprep.mubr.msk.bf16.mxu1 %vm2590_vm5, %v6062_v23  ;;  %v5554_v39 = vrot.slane %v9990_v7, 1  ;;  %v5551_v55 = vrot.slane %v9981_v63, 1  ;;  %v10520_v19 = vmax.f32 %v9155_v40, 0.0 }
 0x70c   : > { %v5408_v25 = vmax.f32 %v5392_v35, 0.0  ;;  %v5361_v59 = vadd.f32 %v9939_v43, %v5264_v36  ;;  %v7055_v56 = vadd.f32 %v7054_v48, %v7053_v4  ;;  %v10041_v53 = vsel %vm5465_vm8, 0.0, %v5440_v9 }
 0x70d   : > { %v10044_v2 = vsel %vm5465_vm8, %v5440_v9, 0.0  ;;  %v7056_v30 = vpop.f32.mrf.mxu1  ;;  %8006 = vrot.lane.b32.xlu0 %v8005_v62, %s8248_s29  ;;  %v5657_v43 = vrot.slane %v10041_v53, 2  ;;  %v8010_v20 = vpack.i.bf16 %v9981_v63, %v9948_v26  ;;  %v8020_v6 = vpack.i.bf16 %v9990_v7, %v9981_v63 }
 0x70e   : > { %v5658_v12 = vrot.slane %v10044_v2, 2  ;;  %v5441_v13 = vrot.slane %v5408_v25, 7  ;;  %v5393_v42 = vadd.f32 %v5361_v59, %v10520_v19  ;;  %v5267_v11 = vadd.f32 %v7055_v56, %v9821_v33 }
 0x70f   : > { %8016 = vrot.lane.b32.xlu1 %v8015_v8, %s8249_s19  ;;  %v7057_v5 = vpop.f32.mrf.mxu1  ;;  %v10066_v10 = vsel %vm5532_vm9, %v5554_v39, %v5555_v3  ;;  %v10074_v62 = vsel %vm5629_vm10, %v5654_v50, %v5655_v22  ;;  %v5558_v35 = vrot.slane %v10017_v28, 1  ;;  %v10083_v9 = vsel %vm5532_vm9, %v5551_v55, %v5552_v46 }
 0x710   : > { %v7058_v51 = vadd.f32 %v7057_v5, %v7056_v30  ;;  %v10063_v61 = vsel %vm5629_vm10, %v5657_v43, %v5658_v12  ;;  %v10069_v40 = vsel %vm5465_vm8, %v5441_v13, 0.0  ;;  %v5409_v32 = vmax.f32 %v5393_v42, 0.0  ;;  %v5371_v12 = vpop.f32.mrf.mxu0 }
 0x711   : > { %v5364_v27 = vadd.f32 %v9978_v14, %v5267_v11  ;;  %v7059_v4 = vpop.f32.mrf.mxu1  ;;  %8011 = vrot.lane.b32.xlu0 %v8010_v20, %s8250_s25  ;;  %v6065_v36 = vpack.c.bf16 %v10063_v61, %v10074_v62  ;;  %v10086_v14 = vsel %vm5465_vm8, 0.0, %v5441_v13  ;;  %v10521_v48 = vmax.f32 %v9161_v37, 0.0 }
 0x712   : > { %v5272_v3 = vadd.f32 %v7058_v51, %v9821_v33  ;;  %v5442_v23 = vrot.slane %v5409_v32, 7  ;;  %v8030_v25 = vpack.i.bf16 %v10066_v10, %v10083_v9  ;;  %v5661_v59 = vrot.slane %v10069_v40, 2 }
 0x713   : > { %v5394_v50 = vadd.f32 %v5364_v27, %v10521_v48  ;;  %8021 = vrot.lane.b32.xlu1 %v8020_v6, %s8248_s29  ;;  %v7060_v22 = vpop.f32.mrf.mxu1  ;;  %7679 = vmatmul.mubr.msk.bf16.gmra.mxu1 %vm2590_vm5, %v6065_v36  ;;  %v8045_v30 = vpack.i.bf16 %v10074_v62, %v10031_v17  ;;  %v10522_v55 = vmax.f32 %v9174_v21, 0.0  ;;  %v5660_v42 = vrot.slane %v10086_v14, 2 }
 0x714   : > { %v7061_v56 = vadd.f32 %v7060_v22, %v7059_v4  ;;  %v5369_v46 = vadd.f32 %v5368_v15, %v5272_v3  ;;  %v10098_v8 = vsel %vm5465_vm8, 0.0, %v5442_v23  ;;  %v10101_v37 = vsel %vm5465_vm8, %v5442_v23, 0.0 }
 0x715   : > { %v5410_v39 = vmax.f32 %v5394_v50, 0.0  ;;  %v7062_v43 = vpop.f32.mrf.mxu1  ;;  %8031 = vrot.lane.b32.xlu0 %v8030_v25, %s8249_s19  ;;  %v5664_v13 = vrot.slane %v10101_v37, 2  ;;  %v5561_v11 = vrot.slane %v10044_v2, 1  ;;  %v8035_v51 = vpack.i.bf16 %v10031_v17, %v10028_v0 }
 0x716   : > { %v5395_v19 = vadd.f32 %v5369_v46, %v10522_v55  ;;  %v5275_v15 = vadd.f32 %v7061_v56, %v9821_v33  ;;  %v5663_v6 = vrot.slane %v10098_v8, 2  ;;  %v5560_v21 = vrot.slane %v10041_v53, 1 }
 0x717   : > { %v5443_v5 = vrot.slane %v5410_v39, 7  ;;  %8026 = vrot.lane.b32.xlu1 %v8030_v25, %s8250_s25  ;;  %v7063_v20 = vpop.f32.mrf.mxu1  ;;  %v8040_v0 = vpack.i.bf16 %v10014_v49, %v9990_v7  ;;  %v10129_v50 = vsel %vm5629_vm10, %v5660_v42, %v5661_v59  ;;  %v5557_v22 = vrot.slane %v10014_v49, 1 }
 0x718   : > { %v5411_v32 = vmax.f32 %v5395_v19, 0.0  ;;  %v7064_v27 = vadd.f32 %v7063_v20, %v7062_v43  ;;  %v5372_v4 = vadd.f32 %v5371_v12, %v5275_v15  ;;  %v10123_v23 = vsel %vm5629_vm10, %v5663_v6, %v5664_v13 }
 0x719   : > { %v10116_v36 = vsel %vm5465_vm8, 0.0, %v5443_v5  ;;  %v10119_v3 = vsel %vm5465_vm8, %v5443_v5, 0.0  ;;  %v7065_v2 = vpop.f32.mrf.mxu1  ;;  %8036 = vrot.lane.b32.xlu0 %v8035_v51, %s8248_s29  ;;  %v10523_v46 = vmax.f32 %v9180_v41, 0.0  ;;  %v6068_v43 = vpack.c.bf16 %v10123_v23, %v10129_v50 }
 0x71a   : > { %v5666_v17 = vrot.slane %v10116_v36, 2  ;;  %v5444_v48 = vrot.slane %v5411_v32, 7  ;;  %v5667_v25 = vrot.slane %v10119_v3, 2  ;;  %v5280_v56 = vadd.f32 %v7064_v27, %v9821_v33 }
 0x71b   : > { %v5396_v39 = vadd.f32 %v5372_v4, %v10523_v46  ;;  %8046 = vrot.lane.b32.xlu1 %v8045_v30, %s8249_s19  ;;  %v7066_v12 = vpop.f32.mrf.mxu1  ;;  %v10146_v19 = vsel %vm5532_vm9, %v5560_v21, %v5561_v11  ;;  %7682 = vmatprep.mubr.msk.bf16.mxu1 %vm2590_vm5, %v6068_v43  ;;  %v8050_v42 = vpack.i.bf16 %v10041_v53, %v10014_v49 }
 0x71c   : > { %v10140_v13 = vsel %vm5465_vm8, 0.0, %v5444_v48  ;;  %v10143_v59 = vsel %vm5465_vm8, %v5444_v48, 0.0  ;;  %v7067_v55 = vadd.f32 %v7066_v12, %v7065_v2  ;;  %v5377_v30 = vadd.f32 %v10022_v52, %v5280_v56 }
 0x71d   : > { %v5669_v15 = vrot.slane %v10140_v13, 2  ;;  %v5670_v41 = vrot.slane %v10143_v59, 2  ;;  %8041 = vrot.lane.b32.xlu0 %v8040_v0, %s8250_s25  ;;  %v5412_v5 = vmax.f32 %v5396_v39, 0.0  ;;  %v10159_v11 = vsel %vm5532_vm9, %v5557_v22, %v5558_v35 }
 0x71e   : > { %v5283_v20 = vadd.f32 %v7067_v55, %v9821_v33  ;;  %v10524_v52 = vmax.f32 %v9193_v16, 0.0  ;;  %v8060_v32 = vpack.i.bf16 %v10146_v19, %v10159_v11  ;;  %v10170_v27 = vsel %vm5629_vm10, %v5666_v17, %v5667_v25 }
 0x71f   : > { %v10162_v51 = vsel %vm5629_vm10, %v5669_v15, %v5670_v41  ;;  %8051 = vrot.lane.b32.xlu1 %v8050_v42, %s8248_s29  ;;  %v5445_v33 = vrot.slane %v5412_v5, 7  ;;  %v10525_v2 = vmax.f32 %v9196_v58, 0.0  ;;  %v5567_v17 = vrot.slane %v10101_v37, 1 }
 0x720   : > { %v5397_v6 = vadd.f32 %v5377_v30, %v10524_v52  ;;  %v5380_v28 = vadd.f32 %v10076_v38, %v5283_v20  ;;  %v6071_v35 = vpack.c.bf16 %v10162_v51, %v10170_v27  ;;  %v8065_v48 = vpack.i.bf16 %v10063_v61, %v10074_v62 }
 0x721   : > { %8061 = vrot.lane.b32.xlu0 %v8060_v32, %s8249_s19  ;;  %v10177_v16 = vsel %vm5465_vm8, 0.0, %v5445_v33  ;;  %v10180_v21 = vsel %vm5465_vm8, %v5445_v33, 0.0  ;;  %v5566_v22 = vrot.slane %v10098_v8, 1  ;;  %v5564_v58 = vrot.slane %v10069_v40, 1 }
 0x722   : > { %v5413_v4 = vmax.f32 %v5397_v6, 0.0  ;;  %v5398_v0 = vadd.f32 %v5380_v28, %v10525_v2  ;;  %7683 = vmatmul.mubr.msk.bf16.gmra.mxu1 %vm2590_vm5, %v6071_v35  ;;  %v5672_v25 = vrot.slane %v10177_v16, 2  ;;  %v5673_v56 = vrot.slane %v10180_v21, 2 }
 0x723   : > { %8056 = vrot.lane.b32.xlu1 %v8060_v32, %s8250_s25  ;;  %v8075_v43 = vpack.i.bf16 %v10129_v50, %v10063_v61  ;;  %v5563_v15 = vrot.slane %v10086_v14, 1  ;;  %v8070_v40 = vpack.i.bf16 %v10086_v14, %v10041_v53  ;;  %v10206_v41 = vsel %vm5532_vm9, %v5566_v22, %v5567_v17 }
 0x724   : > { %v5446_v38 = vrot.slane %v5413_v4, 7  ;;  %v5414_v46 = vmax.f32 %v5398_v0, 0.0  ;;  %v5674_v42 = vsel %vm5629_vm10, %v5672_v25, %v5673_v56  ;;  %v8080_v6 = vpack.i.bf16 %v10098_v8, %v10086_v14 }
 0x725   : > { %8066 = vrot.lane.b32.xlu0 %v8065_v48, %s8248_s29  ;;  %v10219_v33 = vsel %vm5532_vm9, %v5563_v15, %v5564_v58  ;;  %v8095_v2 = vpack.i.bf16 %v10123_v23, %v10129_v50  ;;  %v5573_v0 = vrot.slane %v10143_v59, 1  ;;  %v5572_v17 = vrot.slane %v10140_v13, 1 }
 0x726   : > { %v10194_v39 = vsel %vm5465_vm8, 0.0, %v5446_v38  ;;  %v5498_v37 = vsel %vm5465_vm8, %v5446_v38, 0.0  ;;  %v5447_v12 = vrot.slane %v5414_v46, 7  ;;  %v8090_v28 = vpack.i.bf16 %v10206_v41, %v10219_v33 }
 0x727   : > { %v5676_v62 = vrot.slane %v5498_v37, 2  ;;  %v5675_v55 = vrot.slane %v10194_v39, 2  ;;  %8076 = vrot.lane.b32.xlu1 %v8075_v43, %s8249_s19  ;;  %v8105_v38 = vpack.i.bf16 %v10170_v27, %v10123_v23  ;;  %v5569_v48 = vrot.slane %v10116_v36, 1 }
 0x728   : > { %v10209_v30 = vsel %vm5465_vm8, 0.0, %v5447_v12  ;;  %v5499_v61 = vsel %vm5465_vm8, %v5447_v12, 0.0  ;;  %v8100_v22 = vpack.i.bf16 %v10116_v36, %v10098_v8  ;;  %v10243_v50 = vsel %vm5532_vm9, %v5572_v17, %v5573_v0 }
 0x729   : > { %v5677_v5 = vsel %vm5629_vm10, %v5675_v55, %v5676_v62  ;;  %v5795_v20 = vrot.slane %v10209_v30, 2  ;;  %v5796_v52 = vrot.slane %v5499_v61, 2  ;;  %8071 = vrot.lane.b32.xlu0 %v8070_v40, %s8250_s25  ;;  %v8110_v59 = vpack.i.bf16 %v10140_v13, %v10116_v36 }
 0x72a   : > { %v6074_v32 = vpack.c.bf16 %v5677_v5, %v5674_v42  ;;  %v8125_v25 = vpack.i.bf16 %v10162_v51, %v10170_v27  ;;  %v5579_v56 = vrot.slane %v5498_v37, 1  ;;  %v5578_v46 = vrot.slane %v10194_v39, 1 }
 0x72b   : > { %8081 = vrot.lane.b32.xlu1 %v8080_v6, %s8248_s29  ;;  %v5797_v35 = vsel %vm5629_vm10, %v5795_v20, %v5796_v52  ;;  %v8135_v58 = vpack.i.bf16 %v5674_v42, %v10162_v51  ;;  %v5576_v43 = vrot.slane %v10180_v21, 1  ;;  %v5575_v62 = vrot.slane %v10177_v16, 1 }
 0x72c   : > { %7686 = vmatprep.mubr.msk.bf16.mxu1 %vm2590_vm5, %v6074_v32  ;;  %v6077_v4 = vpack.c.bf16 %v9879_v24, %v5797_v35  ;;  %v5570_v24 = vrot.slane %v10119_v3, 1  ;;  %v8130_v12 = vpack.i.bf16 %v10177_v16, %v10140_v13  ;;  %v10267_v55 = vsel %vm5532_vm9, %v5578_v46, %v5579_v56 }
 0x72d   : > { %8091 = vrot.lane.b32.xlu0 %v8090_v28, %s8249_s19  ;;  %v8140_v27 = vpack.i.bf16 %v10194_v39, %v10177_v16  ;;  %v10273_v51 = vsel %vm5532_vm9, %v5575_v62, %v5576_v43  ;;  %v8155_v37 = vpack.i.bf16 %v5677_v5, %v5674_v42  ;;  %v8160_v15 = vpack.i.bf16 %v9832_v31, %v10209_v30 }
 0x72e   : > { %7687 = vmatmul.mubr.msk.bf16.gmra.mxu1 %vm2590_vm5, %v6077_v4  ;;  %v10249_v23 = vsel %vm5532_vm9, %v5569_v48, %v5570_v24  ;;  %v8150_v21 = vpack.i.bf16 %v10267_v55, %v10273_v51  ;;  %v5777_v40 = vrot.slane %v5499_v61, 1  ;;  %v5776_v20 = vrot.slane %v10209_v30, 1 }
 0x72f   : > { %8086 = vrot.lane.b32.xlu1 %v8090_v28, %s8250_s25  ;;  %v8120_v3 = vpack.i.bf16 %v10243_v50, %v10249_v23  ;;  %v8175_v52 = vpack.i.bf16 %v10209_v30, %v10194_v39  ;;  %v8165_v6 = vpack.i.bf16 %v5797_v35, %v5677_v5 }
 0x730   : > { %v10289_v32 = vsel %vm5532_vm9, %v5776_v20, %v5777_v40 }
 0x731   : > { %8096 = vrot.lane.b32.xlu0 %v8095_v2, %s8248_s29  ;;  %v8170_v42 = vpack.i.bf16 %v9853_v34, %v10289_v32 }
 0x733   : > { %8106 = vrot.lane.b32.xlu1 %v8105_v38, %s8249_s19 }
 0x735   : > { %8101 = vrot.lane.b32.xlu0 %v8100_v22, %s8250_s25 }
 0x737   : > { %8111 = vrot.lane.b32.xlu1 %v8110_v59, %s8248_s29 }
 0x739   : > { %8121 = vrot.lane.b32.xlu0 %v8120_v3, %s8249_s19 }
 0x73b   : > { %8116 = vrot.lane.b32.xlu1 %v8120_v3, %s8250_s25 }
 0x73d   : > { %8126 = vrot.lane.b32.xlu0 %v8125_v25, %s8248_s29 }
 0x73f   : > { %8136 = vrot.lane.b32.xlu1 %v8135_v58, %s8249_s19 }
 0x741   : > { %8131 = vrot.lane.b32.xlu0 %v8130_v12, %s8250_s25 }
 0x743   : > { %8141 = vrot.lane.b32.xlu1 %v8140_v27, %s8248_s29 }
 0x745   : > { %8151 = vrot.lane.b32.xlu0 %v8150_v21, %s8249_s19 }
 0x747   : > { %8146 = vrot.lane.b32.xlu1 %v8150_v21, %s8250_s25 }
 0x749   : > { %8156 = vrot.lane.b32.xlu0 %v8155_v37, %s8248_s29 }
 0x74b   : > { %8161 = vrot.lane.b32.xlu1 %v8160_v15, %s8248_s29 }
 0x74d   : > { %8176 = vrot.lane.b32.xlu0 %v8175_v52, %s8250_s25 }
 0x74f   : > { %8166 = vrot.lane.b32.xlu1 %v8165_v6, %s8249_s19 }
 0x753   : > { %8171 = vrot.lane.b32.xlu1 %v8170_v42, %s8250_s25 }
 0x763   : > { %v7942_v61 = vpop.permute.xlu0 %7941 }
 0x764   : > { %v7944_v0 = vunpack.i.h.bf16 %v7942_v61  ;;  %v7943_v17 = vunpack.i.l.bf16 %v7942_v61 }
 0x766   : > { %v5959_v34 = vsel %vm2590_vm5, %v9847_v18, %v7944_v0  ;;  %v5958_v56 = vsel %vm2590_vm5, %v9832_v31, %v7943_v17 }
 0x767   : > { %v7947_v28 = vpop.permute.xlu0 %7946 }
 0x768   : > { %v7949_v30 = vunpack.i.h.bf16 %v7947_v28  ;;  %v7948_v5 = vunpack.i.l.bf16 %v7947_v28 }
 0x769   : > { %v7957_v4 = vpop.permute.xlu1 %7956 }
 0x76a   : > { %v7959_v38 = vunpack.i.h.bf16 %v7957_v4  ;;  %v7958_v24 = vunpack.i.l.bf16 %v7957_v4  ;;  %v5974_v46 = vsel %vm2605_vm6, %v5958_v56, %v7948_v5  ;;  %v5975_v58 = vsel %vm2605_vm6, %v5959_v34, %v7949_v30 }
 0x76b   : > { %v7952_v2 = vpop.permute.xlu0 %7951 }
 0x76c   : > { %v7954_v59 = vunpack.i.h.bf16 %v7952_v2  ;;  %v7953_v3 = vunpack.i.l.bf16 %v7952_v2  ;;  %v6007_v62 = vsel %vm2590_vm5, %v9932_v47, %v7959_v38  ;;  %v6006_v12 = vsel %vm2590_vm5, %v9867_v60, %v7958_v24 }
 0x76d   : > { %v7962_v35 = vpop.permute.xlu1 %7961 }
 0x76e   : > { %v7964_v48 = vunpack.i.h.bf16 %v7962_v35  ;;  %v7963_v22 = vunpack.i.l.bf16 %v7962_v35  ;;  %v5990_v15 = vsel %vm2621_vm7, %v5974_v46, %v7953_v3  ;;  %v5991_v31 = vsel %vm2621_vm7, %v5975_v58, %v7954_v59 }
 0x76f   : > { %v7972_v25 = vpop.permute.xlu0 %7971  ;;  %v6054_v42 = vpack.c.bf16 %v5991_v31, %v5990_v15 }
 0x770   : > { %v6022_v37 = vsel %vm2605_vm6, %v6006_v12, %v7963_v22  ;;  %v6023_v18 = vsel %vm2605_vm6, %v6007_v62, %v7964_v48  ;;  %v7974_v61 = vunpack.i.h.bf16 %v7972_v25  ;;  %v7973_v28 = vunpack.i.l.bf16 %v7972_v25 }
 0x771   : > { %v7967_v43 = vpop.permute.xlu1 %7966 }
 0x772   : > { %v7969_v27 = vunpack.i.h.bf16 %v7967_v43  ;;  %v7968_v21 = vunpack.i.l.bf16 %v7967_v43  ;;  %v5961_v22 = vsel %vm2590_vm5, %v9898_v29, %v7974_v61  ;;  %v5960_v59 = vsel %vm2590_vm5, %v9870_v1, %v7973_v28 }
 0x773   : > { %v7977_v40 = vpop.permute.xlu0 %7976 }
 0x774   : > { %v6038_v20 = vsel %vm2621_vm7, %v6022_v37, %v7968_v21  ;;  %v6039_v52 = vsel %vm2621_vm7, %v6023_v18, %v7969_v27  ;;  %v7979_v4 = vunpack.i.h.bf16 %v7977_v40  ;;  %v7978_v2 = vunpack.i.l.bf16 %v7977_v40 }
 0x775   : > { %v7987_v6 = vpop.permute.xlu1 %7986  ;;  %v6055_v47 = vpack.c.bf16 %v6039_v52, %v6038_v20 }
 0x776   : > { %v7989_v17 = vunpack.i.h.bf16 %v7987_v6  ;;  %v7988_v30 = vunpack.i.l.bf16 %v7987_v6  ;;  %v5976_v3 = vsel %vm2605_vm6, %v5960_v59, %v7978_v2  ;;  %v5977_v25 = vsel %vm2605_vm6, %v5961_v22, %v7979_v4 }
 0x777   : > { %6285 = vmatprep.mubr.bf16.mxu0 %v6055_v47  ;;  %v7982_v60 = vpop.permute.xlu0 %7981 }
 0x778   : > { %6286 = vmatmul.mubr.bf16.vlgmr.msra.gmra.mxu0 %v6054_v42  ;;  %v7984_v38 = vunpack.i.h.bf16 %v7982_v60  ;;  %v7983_v24 = vunpack.i.l.bf16 %v7982_v60  ;;  %v6009_v56 = vsel %vm2590_vm5, %v9998_v57, %v7989_v17  ;;  %v6008_v46 = vsel %vm2590_vm5, %v9936_v45, %v7988_v30 }
 0x779   : > { %v7992_v0 = vpop.permute.xlu1 %7991 }
 0x77a   : > { %v7994_v5 = vunpack.i.h.bf16 %v7992_v0  ;;  %v7993_v35 = vunpack.i.l.bf16 %v7992_v0  ;;  %v5992_v12 = vsel %vm2621_vm7, %v5976_v3, %v7983_v24  ;;  %v5993_v1 = vsel %vm2621_vm7, %v5977_v25, %v7984_v38 }
 0x77b   : > { %v8002_v48 = vpop.permute.xlu0 %8001  ;;  %v6057_v15 = vpack.c.bf16 %v5993_v1, %v5992_v12 }
 0x77c   : > { %v6024_v62 = vsel %vm2605_vm6, %v6008_v46, %v7993_v35  ;;  %v6025_v29 = vsel %vm2605_vm6, %v6009_v56, %v7994_v5  ;;  %v8004_v31 = vunpack.i.h.bf16 %v8002_v48  ;;  %v8003_v40 = vunpack.i.l.bf16 %v8002_v48 }
 0x77d   : > { %v7997_v34 = vpop.permute.xlu1 %7996 }
 0x77e   : > { %v7999_v58 = vunpack.i.h.bf16 %v7997_v34  ;;  %v7998_v43 = vunpack.i.l.bf16 %v7997_v34  ;;  %v5963_v0 = vsel %vm2590_vm5, %v9948_v26, %v8004_v31  ;;  %v5962_v17 = vsel %vm2590_vm5, %v9923_v44, %v8003_v40 }
 0x77f   : > { %v8007_v27 = vpop.permute.xlu0 %8006 }
 0x780   : > { %v6040_v21 = vsel %vm2621_vm7, %v6024_v62, %v7998_v43  ;;  %v6041_v37 = vsel %vm2621_vm7, %v6025_v29, %v7999_v58  ;;  %v8009_v20 = vunpack.i.h.bf16 %v8007_v27  ;;  %v8008_v52 = vunpack.i.l.bf16 %v8007_v27 }
 0x781   : > { %v8017_v18 = vpop.permute.xlu1 %8016  ;;  %v6058_v57 = vpack.c.bf16 %v6041_v37, %v6040_v21 }
 0x782   : > { %v8019_v47 = vunpack.i.h.bf16 %v8017_v18  ;;  %v8018_v42 = vunpack.i.l.bf16 %v8017_v18  ;;  %v5978_v30 = vsel %vm2605_vm6, %v5962_v17, %v8008_v52  ;;  %v5979_v5 = vsel %vm2605_vm6, %v5963_v0, %v8009_v20 }
 0x783   : > { %6293 = vmatprep.mubr.bf16.mxu0 %v6058_v57  ;;  %v8012_v45 = vpop.permute.xlu0 %8011 }
 0x784   : > { %6294 = vmatmul.mubr.bf16.gmra.mxu0 %v6057_v15  ;;  %v8014_v28 = vunpack.i.h.bf16 %v8012_v45  ;;  %v8013_v4 = vunpack.i.l.bf16 %v8012_v45  ;;  %v6011_v38 = vsel %vm2590_vm5, %v10083_v9, %v8019_v47  ;;  %v6010_v24 = vsel %vm2590_vm5, %v10001_v54, %v8018_v42 }
 0x785   : > { %v8022_v6 = vpop.permute.xlu1 %8021 }
 0x786   : > { %v8024_v60 = vunpack.i.h.bf16 %v8022_v6  ;;  %v8023_v61 = vunpack.i.l.bf16 %v8022_v6  ;;  %v5994_v3 = vsel %vm2621_vm7, %v5978_v30, %v8013_v4  ;;  %v5995_v44 = vsel %vm2621_vm7, %v5979_v5, %v8014_v28 }
 0x787   : > { %v8032_v2 = vpop.permute.xlu0 %8031  ;;  %v6060_v58 = vpack.c.bf16 %v5995_v44, %v5994_v3 }
 0x788   : > { %v6026_v59 = vsel %vm2605_vm6, %v6010_v24, %v8023_v61  ;;  %v6027_v26 = vsel %vm2605_vm6, %v6011_v38, %v8024_v60  ;;  %v8034_v43 = vunpack.i.h.bf16 %v8032_v2  ;;  %v8033_v62 = vunpack.i.l.bf16 %v8032_v2 }
 0x789   : > { %v8027_v35 = vpop.permute.xlu1 %8026 }
 0x78a   : > { %v8029_v48 = vunpack.i.h.bf16 %v8027_v35  ;;  %v8028_v22 = vunpack.i.l.bf16 %v8027_v35  ;;  %v5965_v31 = vsel %vm2590_vm5, %v9990_v7, %v8034_v43  ;;  %v5964_v40 = vsel %vm2590_vm5, %v9981_v63, %v8033_v62 }
 0x78b   : > { %v8037_v25 = vpop.permute.xlu0 %8036 }
 0x78c   : > { %v6042_v34 = vsel %vm2621_vm7, %v6026_v59, %v8028_v22  ;;  %v6043_v56 = vsel %vm2621_vm7, %v6027_v26, %v8029_v48  ;;  %v8039_v29 = vunpack.i.h.bf16 %v8037_v25  ;;  %v8038_v12 = vunpack.i.l.bf16 %v8037_v25 }
 0x78d   : > { %v8047_v46 = vpop.permute.xlu1 %8046  ;;  %v6061_v9 = vpack.c.bf16 %v6043_v56, %v6042_v34 }
 0x78e   : > { %v8049_v27 = vunpack.i.h.bf16 %v8047_v46  ;;  %v8048_v21 = vunpack.i.l.bf16 %v8047_v46  ;;  %v5980_v20 = vsel %vm2605_vm6, %v5964_v40, %v8038_v12  ;;  %v5981_v52 = vsel %vm2605_vm6, %v5965_v31, %v8039_v29 }
 0x78f   : > { %6301 = vmatprep.mubr.bf16.mxu0 %v6061_v9  ;;  %v8042_v54 = vpop.permute.xlu0 %8041 }
 0x790   : > { %6302 = vmatmul.mubr.bf16.gmra.mxu0 %v6060_v58  ;;  %v8044_v57 = vunpack.i.h.bf16 %v8042_v54  ;;  %v8043_v15 = vunpack.i.l.bf16 %v8042_v54  ;;  %v6013_v47 = vsel %vm2590_vm5, %v10159_v11, %v8049_v27  ;;  %v6012_v42 = vsel %vm2590_vm5, %v10066_v10, %v8048_v21 }
 0x791   : > { %v8052_v1 = vpop.permute.xlu1 %8051 }
 0x792   : > { %v8054_v37 = vunpack.i.h.bf16 %v8052_v1  ;;  %v8053_v18 = vunpack.i.l.bf16 %v8052_v1  ;;  %v5996_v4 = vsel %vm2621_vm7, %v5980_v20, %v8043_v15  ;;  %v5997_v63 = vsel %vm2621_vm7, %v5981_v52, %v8044_v57 }
 0x793   : > { %v8062_v45 = vpop.permute.xlu0 %8061  ;;  %v6063_v5 = vpack.c.bf16 %v5997_v63, %v5996_v4 }
 0x794   : > { %v6028_v28 = vsel %vm2605_vm6, %v6012_v42, %v8053_v18  ;;  %v6029_v7 = vsel %vm2605_vm6, %v6013_v47, %v8054_v37  ;;  %v8064_v35 = vunpack.i.h.bf16 %v8062_v45  ;;  %v8063_v38 = vunpack.i.l.bf16 %v8062_v45 }
 0x795   : > { %v8057_v6 = vpop.permute.xlu1 %8056 }
 0x796   : > { %v8059_v60 = vunpack.i.h.bf16 %v8057_v6  ;;  %v8058_v61 = vunpack.i.l.bf16 %v8057_v6  ;;  %v5967_v46 = vsel %vm2590_vm5, %v10041_v53, %v8064_v35  ;;  %v5966_v9 = vsel %vm2590_vm5, %v10014_v49, %v8063_v38 }
 0x797   : > { %v8067_v2 = vpop.permute.xlu0 %8066 }
 0x798   : > { %v6044_v0 = vsel %vm2621_vm7, %v6028_v28, %v8058_v61  ;;  %v6045_v17 = vsel %vm2621_vm7, %v6029_v7, %v8059_v60  ;;  %v8069_v24 = vunpack.i.h.bf16 %v8067_v2  ;;  %v8068_v48 = vunpack.i.l.bf16 %v8067_v2 }
 0x799   : > { %v8077_v30 = vpop.permute.xlu1 %8076  ;;  %v6064_v11 = vpack.c.bf16 %v6045_v17, %v6044_v0 }
 0x79a   : > { %v8079_v59 = vunpack.i.h.bf16 %v8077_v30  ;;  %v8078_v26 = vunpack.i.l.bf16 %v8077_v30  ;;  %v5982_v58 = vsel %vm2605_vm6, %v5966_v9, %v8068_v48  ;;  %v5983_v54 = vsel %vm2605_vm6, %v5967_v46, %v8069_v24 }
 0x79b   : > { %6309 = vmatprep.mubr.bf16.mxu0 %v6064_v11  ;;  %v8072_v10 = vpop.permute.xlu0 %8071 }
 0x79c   : > { %6310 = vmatmul.mubr.bf16.gmra.mxu0 %v6063_v5  ;;  %v8074_v25 = vunpack.i.h.bf16 %v8072_v10  ;;  %v8073_v34 = vunpack.i.l.bf16 %v8072_v10  ;;  %v6015_v62 = vsel %vm2590_vm5, %v10219_v33, %v8079_v59  ;;  %v6014_v29 = vsel %vm2590_vm5, %v10146_v19, %v8078_v26 }
 0x79d   : > { %v8082_v22 = vpop.permute.xlu1 %8081 }
 0x79e   : > { %v8084_v3 = vunpack.i.h.bf16 %v8082_v22  ;;  %v8083_v44 = vunpack.i.l.bf16 %v8082_v22  ;;  %v5998_v21 = vsel %vm2621_vm7, %v5982_v58, %v8073_v34  ;;  %v5999_v49 = vsel %vm2621_vm7, %v5983_v54, %v8074_v25 }
 0x79f   : > { %v8092_v56 = vpop.permute.xlu0 %8091  ;;  %v6066_v45 = vpack.c.bf16 %v5999_v49, %v5998_v21 }
 0x7a0   : > { %v6030_v27 = vsel %vm2605_vm6, %v6014_v29, %v8083_v44  ;;  %v6031_v53 = vsel %vm2605_vm6, %v6015_v62, %v8084_v3  ;;  %v8094_v31 = vunpack.i.h.bf16 %v8092_v56  ;;  %v8093_v40 = vunpack.i.l.bf16 %v8092_v56 }
 0x7a1   : > { %v8087_v43 = vpop.permute.xlu1 %8086 }
 0x7a2   : > { %v8089_v12 = vunpack.i.h.bf16 %v8087_v43  ;;  %v8088_v1 = vunpack.i.l.bf16 %v8087_v43  ;;  %v5969_v63 = vsel %vm2590_vm5, %v10098_v8, %v8094_v31  ;;  %v5968_v2 = vsel %vm2590_vm5, %v10086_v14, %v8093_v40 }
 0x7a3   : > { %v8097_v37 = vpop.permute.xlu0 %8096 }
 0x7a4   : > { %v6046_v18 = vsel %vm2621_vm7, %v6030_v27, %v8088_v1  ;;  %v6047_v57 = vsel %vm2621_vm7, %v6031_v53, %v8089_v12  ;;  %v8099_v20 = vunpack.i.h.bf16 %v8097_v37  ;;  %v8098_v52 = vunpack.i.l.bf16 %v8097_v37 }
 0x7a5   : > { %v8107_v15 = vpop.permute.xlu1 %8106  ;;  %v6067_v33 = vpack.c.bf16 %v6047_v57, %v6046_v18 }
 0x7a6   : > { %v8109_v47 = vunpack.i.h.bf16 %v8107_v15  ;;  %v8108_v42 = vunpack.i.l.bf16 %v8107_v15  ;;  %v5984_v0 = vsel %vm2605_vm6, %v5968_v2, %v8098_v52  ;;  %v5985_v17 = vsel %vm2605_vm6, %v5969_v63, %v8099_v20 }
 0x7a7   : > { %6317 = vmatprep.mubr.bf16.mxu0 %v6067_v33  ;;  %v8102_v19 = vpop.permute.xlu0 %8101 }
 0x7a8   : > { %6318 = vmatmul.mubr.bf16.gmra.mxu0 %v6066_v45  ;;  %v8104_v28 = vunpack.i.h.bf16 %v8102_v19  ;;  %v8103_v7 = vunpack.i.l.bf16 %v8102_v19  ;;  %v6017_v11 = vsel %vm2590_vm5, %v10249_v23, %v8109_v47  ;;  %v6016_v5 = vsel %vm2590_vm5, %v10206_v41, %v8108_v42 }
 0x7a9   : > { %v8112_v6 = vpop.permute.xlu1 %8111 }
 0x7aa   : > { %v8114_v60 = vunpack.i.h.bf16 %v8112_v6  ;;  %v8113_v61 = vunpack.i.l.bf16 %v8112_v6  ;;  %v6000_v24 = vsel %vm2621_vm7, %v5984_v0, %v8103_v7  ;;  %v6001_v14 = vsel %vm2621_vm7, %v5985_v17, %v8104_v28 }
 0x7ab   : > { %v8122_v4 = vpop.permute.xlu0 %8121  ;;  %v6069_v3 = vpack.c.bf16 %v6001_v14, %v6000_v24 }
 0x7ac   : > { %v6032_v38 = vsel %vm2605_vm6, %v6016_v5, %v8113_v61  ;;  %v6033_v8 = vsel %vm2605_vm6, %v6017_v11, %v8114_v60  ;;  %v8124_v44 = vunpack.i.h.bf16 %v8122_v4  ;;  %v8123_v25 = vunpack.i.l.bf16 %v8122_v4 }
 0x7ad   : > { %v8117_v30 = vpop.permute.xlu1 %8116 }
 0x7ae   : > { %v8119_v10 = vunpack.i.h.bf16 %v8117_v30  ;;  %v8118_v35 = vunpack.i.l.bf16 %v8117_v30  ;;  %v5971_v1 = vsel %vm2590_vm5, %v10140_v13, %v8124_v44  ;;  %v5970_v27 = vsel %vm2590_vm5, %v10116_v36, %v8123_v25 }
 0x7af   : > { %v8127_v48 = vpop.permute.xlu0 %8126 }
 0x7b0   : > { %v6048_v22 = vsel %vm2621_vm7, %v6032_v38, %v8118_v35  ;;  %v6049_v59 = vsel %vm2621_vm7, %v6033_v8, %v8119_v10  ;;  %v8129_v34 = vunpack.i.h.bf16 %v8127_v48  ;;  %v8128_v56 = vunpack.i.l.bf16 %v8127_v48 }
 0x7b1   : > { %v8137_v26 = vpop.permute.xlu1 %8136  ;;  %v6070_v23 = vpack.c.bf16 %v6049_v59, %v6048_v22 }
 0x7b2   : > { %v8139_v9 = vunpack.i.h.bf16 %v8137_v26  ;;  %v8138_v58 = vunpack.i.l.bf16 %v8137_v26  ;;  %v5986_v53 = vsel %vm2605_vm6, %v5970_v27, %v8128_v56  ;;  %v5987_v21 = vsel %vm2605_vm6, %v5971_v1, %v8129_v34 }
 0x7b3   : > { %6325 = vmatprep.mubr.bf16.mxu0 %v6070_v23  ;;  %v8132_v41 = vpop.permute.xlu0 %8131 }
 0x7b4   : > { %6326 = vmatmul.mubr.bf16.gmra.mxu0 %v6069_v3  ;;  %v8134_v62 = vunpack.i.h.bf16 %v8132_v41  ;;  %v8133_v29 = vunpack.i.l.bf16 %v8132_v41  ;;  %v6019_v37 = vsel %vm2590_vm5, %v10273_v51, %v8139_v9  ;;  %v6018_v18 = vsel %vm2590_vm5, %v10243_v50, %v8138_v58  ;;  %v10426_v41 = vld [vmem:[%s10500_s15] ss:$0 sm:$0xff] }
 0x7b5   : > { %v8142_v46 = vpop.permute.xlu1 %8141 }
 0x7b6   : > { %v8144_v54 = vunpack.i.h.bf16 %v8142_v46  ;;  %v8143_v43 = vunpack.i.l.bf16 %v8142_v46  ;;  %v6002_v45 = vsel %vm2621_vm7, %v5986_v53, %v8133_v29  ;;  %v6003_v36 = vsel %vm2621_vm7, %v5987_v21, %v8134_v62 }
 0x7b7   : > { %v8152_v12 = vpop.permute.xlu0 %8151  ;;  %v6072_v52 = vpack.c.bf16 %v6003_v36, %v6002_v45 }
 0x7b8   : > { %v6034_v33 = vsel %vm2605_vm6, %v6018_v18, %v8143_v43  ;;  %v6035_v13 = vsel %vm2605_vm6, %v6019_v37, %v8144_v54  ;;  %v8154_v6 = vunpack.i.h.bf16 %v8152_v12  ;;  %v8153_v47 = vunpack.i.l.bf16 %v8152_v12 }
 0x7b9   : > { %v8147_v49 = vpop.permute.xlu1 %8146 }
 0x7ba   : > { %v8149_v57 = vunpack.i.h.bf16 %v8147_v49  ;;  %v8148_v15 = vunpack.i.l.bf16 %v8147_v49  ;;  %v5973_v17 = vsel %vm2590_vm5, %v10194_v39, %v8154_v6  ;;  %v5972_v30 = vsel %vm2590_vm5, %v10177_v16, %v8153_v47 }
 0x7bb   : > { %v8157_v19 = vpop.permute.xlu0 %8156 }
 0x7bc   : > { %v6050_v31 = vsel %vm2621_vm7, %v6034_v33, %v8148_v15  ;;  %v6051_v40 = vsel %vm2621_vm7, %v6035_v13, %v8149_v57  ;;  %v8159_v60 = vunpack.i.h.bf16 %v8157_v19  ;;  %v8158_v61 = vunpack.i.l.bf16 %v8157_v19 }
 0x7bd   : > { %v8162_v20 = vpop.permute.xlu1 %8161  ;;  %v6073_v51 = vpack.c.bf16 %v6051_v40, %v6050_v31 }
 0x7be   : > { %v8164_v11 = vunpack.i.h.bf16 %v8162_v20  ;;  %v8163_v5 = vunpack.i.l.bf16 %v8162_v20  ;;  %v5988_v35 = vsel %vm2605_vm6, %v5972_v30, %v8158_v61  ;;  %v5989_v38 = vsel %vm2605_vm6, %v5973_v17, %v8159_v60 }
 0x7bf   : > { %6333 = vmatprep.mubr.bf16.mxu0 %v6073_v51  ;;  %v8177_v50 = vpop.permute.xlu0 %8176 }
 0x7c0   : > { %6334 = vmatmul.mubr.bf16.gmra.mxu0 %v6072_v52  ;;  %v8179_v4 = vunpack.i.h.bf16 %v8177_v50  ;;  %v8178_v63 = vunpack.i.l.bf16 %v8177_v50 }
 0x7c1   : > { %v8167_v42 = vpop.permute.xlu1 %8166 }
 0x7c2   : > { %v8169_v28 = vunpack.i.h.bf16 %v8167_v42  ;;  %v8168_v7 = vunpack.i.l.bf16 %v8167_v42  ;;  %v6005_v14 = vsel %vm2621_vm7, %v5989_v38, %v8179_v4  ;;  %v7676_v26 = vpop.f32.mrf.mxu1 }
 0x7c4   : > { %v6021_v2 = vsel %vm2590_vm5, %v10289_v32, %v8169_v28  ;;  %v6020_v0 = vsel %vm2590_vm5, %v10267_v55, %v8168_v7  ;;  %v6004_v32 = vsel %vm2621_vm7, %v5988_v35, %v8178_v63  ;;  %v6384_v3 = vpop.f32.mrf.mxu1 }
 0x7c5   : > { %v8172_v10 = vpop.permute.xlu1 %8171  ;;  %v6036_v55 = vsel %vm2605_vm6, %v6020_v0, %v8163_v5  ;;  %v6037_v39 = vsel %vm2605_vm6, %v6021_v2, %v8164_v11  ;;  %v6075_v59 = vpack.c.bf16 %v6005_v14, %v6004_v32 }
 0x7c6   : > { %v8174_v8 = vunpack.i.h.bf16 %v8172_v10  ;;  %v8173_v24 = vunpack.i.l.bf16 %v8172_v10  ;;  %v7677_v46 = vpop.f32.mrf.mxu1 }
 0x7c8   : > { %v6052_v16 = vsel %vm2621_vm7, %v6036_v55, %v8173_v24  ;;  %v6053_v48 = vsel %vm2621_vm7, %v6037_v39, %v8174_v8  ;;  %v6387_v62 = vpop.f32.mrf.mxu1 }
 0x7c9   : > { %v6076_v22 = vpack.c.bf16 %v6053_v48, %v6052_v16 }
 0x7cb   : > { %6341 = vmatprep.mubr.bf16.mxu0 %v6076_v22 }
 0x7cc   : > { %6342 = vmatmul.mubr.bf16.gmra.mxu0 %v6075_v59 }
 0x7d3   : > { %v7680_v15 = vpop.f32.mrf.mxu1 }
 0x7d5   : > { %v6400_v45 = vpop.f32.mrf.mxu1 }
 0x7d7   : > { %v7681_v20 = vpop.f32.mrf.mxu1 }
 0x7d9   : > { %v6403_v47 = vpop.f32.mrf.mxu1 }
 0x7e2   : > { %v7684_v30 = vpop.f32.mrf.mxu1 }
 0x7e4   : > { %v6416_v10 = vpop.f32.mrf.mxu1 }
 0x7e6   : > { %v7685_v32 = vpop.f32.mrf.mxu1 }
 0x7e8   : > { %v6419_v48 = vpop.f32.mrf.mxu1 }
 0x838   : > { %v7094_v23 = vpop.f32.mrf.mxu0 }
 0x83a   : > { %v7095_v44 = vpop.f32.mrf.mxu0 }
 0x83b   : > { %v7096_v25 = vadd.f32 %v7095_v44, %v7094_v23 }
 0x83c   : > { %v7097_v34 = vpop.f32.mrf.mxu0 }
 0x83d   : > { %v6288_v56 = vadd.f32 %v7096_v25, %v10426_v41 }
 0x83e   : > { %v7098_v9 = vpop.f32.mrf.mxu0 }
 0x83f   : > { %v6385_v58 = vadd.f32 %v6384_v3, %v6288_v56  ;;  %v7099_v54 = vadd.f32 %v7098_v9, %v7097_v34  ;;  %v7688_v9 = vpop.f32.mrf.mxu1 }
 0x841   : > { %6447 = vst.msk [vmem:[%s10433_s20] sm:$0xff] %vm639_vm1, %v6385_v58  ;;  %v6291_v43 = vadd.f32 %v7099_v54, %v10426_v41 }
 0x843   : > { %v6388_v29 = vadd.f32 %v6387_v62, %v6291_v43  ;;  %v6432_v43 = vpop.f32.mrf.mxu1 }
 0x844   : > { %v7100_v12 = vpop.f32.mrf.mxu0 }
 0x845   : > { %6448 = vst.msk [vmem:[%s10433_s20 + $0x8] sm:$0xff] %vm639_vm1, %v6388_v29 }
 0x846   : > { %v7101_v1 = vpop.f32.mrf.mxu0 }
 0x847   : > { %v7102_v27 = vadd.f32 %v7101_v1, %v7100_v12 }
 0x848   : > { %v7103_v53 = vpop.f32.mrf.mxu0 }
 0x849   : > { %v6296_v21 = vadd.f32 %v7102_v27, %v10426_v41  ;;  %v7689_v27 = vpop.f32.mrf.mxu1 }
 0x84a   : > { %v7104_v49 = vpop.f32.mrf.mxu0 }
 0x84b   : > { %v6393_v37 = vadd.f32 %v7676_v26, %v6296_v21  ;;  %v7105_v18 = vadd.f32 %v7104_v49, %v7103_v53 }
 0x84d   : > { %6449 = vst.msk [vmem:[%s10433_s20 + $0x10] sm:$0xff] %vm639_vm1, %v6393_v37  ;;  %v6299_v57 = vadd.f32 %v7105_v18, %v10426_v41  ;;  %v6435_v18 = vpop.f32.mrf.mxu1 }
 0x84f   : > { %v6396_v33 = vadd.f32 %v7677_v46, %v6299_v57 }
 0x850   : > { %v7106_v13 = vpop.f32.mrf.mxu0 }
 0x851   : > { %6450 = vst.msk [vmem:[%s10433_s20 + $0x18] sm:$0xff] %vm639_vm1, %v6396_v33 }
 0x852   : > { %v7107_v36 = vpop.f32.mrf.mxu0 }
 0x853   : > { %v7108_v19 = vadd.f32 %v7107_v36, %v7106_v13 }
 0x854   : > { %v7109_v31 = vpop.f32.mrf.mxu0 }
 0x855   : > { %v6304_v40 = vadd.f32 %v7108_v19, %v10426_v41 }
 0x856   : > { %v7110_v51 = vpop.f32.mrf.mxu0 }
 0x857   : > { %v6401_v52 = vadd.f32 %v6400_v45, %v6304_v40  ;;  %v7111_v50 = vadd.f32 %v7110_v51, %v7109_v31 }
 0x859   : > { %6451 = vst.msk [vmem:[%s10433_s20 + $0x20] sm:$0xff] %vm639_vm1, %v6401_v52  ;;  %v6307_v6 = vadd.f32 %v7111_v50, %v10426_v41 }
 0x85b   : > { %v6404_v42 = vadd.f32 %v6403_v47, %v6307_v6 }
 0x85c   : > { %v7112_v60 = vpop.f32.mrf.mxu0 }
 0x85d   : > { %6452 = vst.msk [vmem:[%s10433_s20 + $0x28] sm:$0xff] %vm639_vm1, %v6404_v42 }
 0x85e   : > { %v7113_v61 = vpop.f32.mrf.mxu0 }
 0x85f   : > { %v7114_v28 = vadd.f32 %v7113_v61, %v7112_v60 }
 0x860   : > { %v7115_v7 = vpop.f32.mrf.mxu0 }
 0x861   : > { %v6312_v4 = vadd.f32 %v7114_v28, %v10426_v41 }
 0x862   : > { %v7116_v63 = vpop.f32.mrf.mxu0 }
 0x863   : > { %v6409_v2 = vadd.f32 %v7680_v15, %v6312_v4  ;;  %v7117_v0 = vadd.f32 %v7116_v63, %v7115_v7 }
 0x865   : > { %6453 = vst.msk [vmem:[%s10433_s20 + $0x30] sm:$0xff] %vm639_vm1, %v6409_v2  ;;  %v6315_v17 = vadd.f32 %v7117_v0, %v10426_v41 }
 0x867   : > { %v6412_v11 = vadd.f32 %v7681_v20, %v6315_v17 }
 0x868   : > { %v7118_v5 = vpop.f32.mrf.mxu0 }
 0x869   : > { %6454 = vst.msk [vmem:[%s10433_s20 + $0x38] sm:$0xff] %vm639_vm1, %v6412_v11 }
 0x86a   : > { %v7119_v35 = vpop.f32.mrf.mxu0 }
 0x86b   : > { %v7120_v38 = vadd.f32 %v7119_v35, %v7118_v5 }
 0x86c   : > { %v7121_v8 = vpop.f32.mrf.mxu0 }
 0x86d   : > { %v6320_v24 = vadd.f32 %v7120_v38, %v10426_v41 }
 0x86e   : > { %v7122_v14 = vpop.f32.mrf.mxu0 }
 0x86f   : > { %v6417_v55 = vadd.f32 %v6416_v10, %v6320_v24  ;;  %v7123_v39 = vadd.f32 %v7122_v14, %v7121_v8 }
 0x871   : > { %6455 = vst.msk [vmem:[%s10433_s20 + $0x40] sm:$0xff] %vm639_vm1, %v6417_v55  ;;  %v6323_v16 = vadd.f32 %v7123_v39, %v10426_v41 }
 0x873   : > { %v6420_v22 = vadd.f32 %v6419_v48, %v6323_v16 }
 0x874   : > { %v7124_v59 = vpop.f32.mrf.mxu0 }
 0x875   : > { %6456 = vst.msk [vmem:[%s10433_s20 + $0x48] sm:$0xff] %vm639_vm1, %v6420_v22 }
 0x876   : > { %v7125_v26 = vpop.f32.mrf.mxu0 }
 0x877   : > { %v7126_v23 = vadd.f32 %v7125_v26, %v7124_v59 }
 0x878   : > { %v7127_v3 = vpop.f32.mrf.mxu0 }
 0x879   : > { %v6328_v44 = vadd.f32 %v7126_v23, %v10426_v41 }
 0x87a   : > { %v7128_v25 = vpop.f32.mrf.mxu0 }
 0x87b   : > { %v6425_v34 = vadd.f32 %v7684_v30, %v6328_v44  ;;  %v7129_v56 = vadd.f32 %v7128_v25, %v7127_v3 }
 0x87d   : > { %6457 = vst.msk [vmem:[%s10433_s20 + $0x50] sm:$0xff] %vm639_vm1, %v6425_v34  ;;  %v6331_v46 = vadd.f32 %v7129_v56, %v10426_v41 }
 0x87f   : > { %v6428_v58 = vadd.f32 %v7685_v32, %v6331_v46 }
 0x880   : > { %v7130_v54 = vpop.f32.mrf.mxu0 }
 0x881   : > { %6458 = vst.msk [vmem:[%s10433_s20 + $0x58] sm:$0xff] %vm639_vm1, %v6428_v58 }
 0x882   : > { %v7131_v62 = vpop.f32.mrf.mxu0 }
 0x883   : > { %v7132_v29 = vadd.f32 %v7131_v62, %v7130_v54 }
 0x884   : > { %v7133_v12 = vpop.f32.mrf.mxu0 }
 0x885   : > { %v6336_v1 = vadd.f32 %v7132_v29, %v10426_v41 }
 0x886   : > { %v7134_v53 = vpop.f32.mrf.mxu0 }
 0x887   : > { %v6433_v21 = vadd.f32 %v6432_v43, %v6336_v1  ;;  %v7135_v49 = vadd.f32 %v7134_v53, %v7133_v12 }
 0x889   : > { %6459 = vst.msk [vmem:[%s10433_s20 + $0x60] sm:$0xff] %vm639_vm1, %v6433_v21  ;;  %v6339_v37 = vadd.f32 %v7135_v49, %v10426_v41 }
 0x88b   : > { %v6436_v57 = vadd.f32 %v6435_v18, %v6339_v37 }
 0x88c   : > { %v7136_v15 = vpop.f32.mrf.mxu0 }
 0x88d   : > { %6460 = vst.msk [vmem:[%s10433_s20 + $0x68] sm:$0xff] %vm639_vm1, %v6436_v57 }
 0x88e   : > { %v7137_v33 = vpop.f32.mrf.mxu0 }
 0x88f   : > { %v7138_v13 = vadd.f32 %v7137_v33, %v7136_v15 }
 0x890   : > { %v7139_v45 = vpop.f32.mrf.mxu0 }
 0x891   : > { %v6344_v36 = vadd.f32 %v7138_v13, %v10426_v41 }
 0x892   : > { %v7140_v19 = vpop.f32.mrf.mxu0 }
 0x893   : > { %v6441_v31 = vadd.f32 %v7688_v9, %v6344_v36  ;;  %v7141_v40 = vadd.f32 %v7140_v19, %v7139_v45 }
 0x895   : > { %6461 = vst.msk [vmem:[%s10433_s20 + $0x70] sm:$0xff] %vm639_vm1, %v6441_v31  ;;  %v6347_v20 = vadd.f32 %v7141_v40, %v10426_v41 }
 0x897   : > { %v6444_v51 = vadd.f32 %v7689_v27, %v6347_v20 }
 0x899   : > { %6462 = vst.msk [vmem:[%s10433_s20 + $0x78] sm:$0xff] %vm639_vm1, %v6444_v51 }
 0x89a PF: > { %s26_s21 = sadd.s32 1, %s8244_s21  }
 0x89b   : > { %p23_p4 = scmp.ge.s32.totalorder %s26_s21, 4  }
 0x89d   :  { %25 = sbr.rel (!%p23_p4) target bundleno = 2 (0x2), region = 121 }

</bundles_post_ra>
